<compile_context>
chip_gen: v5e
topology: v5e:2x2
jax: 0.10.0
libtpu: 0.0.40
codegen_flags: <defaults>
</compile_context>

<pallas_src>
import math
import functools

import jax
import jax.numpy as jnp
from jax import lax
from jax.experimental import pallas as pl
from jax.experimental.pallas import tpu as pltpu

H = 32      # hidden_size (PyTorch default 25; 32 chosen for lane-friendly tiling)
E = 32      # embed_size (word2vec dimension)
LANE = 128  # one 128-lane slot per (direction, gate)


# --------------------------- fused GRU + attention ---------------------------
def word_att_kernel(x_ref,      # (T*Bp, 128)  embeddings (lanes 0:E) + ones column (lane E)
                    wih_ref,    # (128, 6*128) input weights, one 128-lane slot per gate; bias row at E
                    whhf_ref,   # (128, 3*128) fwd recurrent weights (state in lanes 0:H)
                    whhb_ref,   # (128, 3*128) bwd recurrent weights (state in lanes H:2H)
                    bhn_ref,    # (Bp, 2*128)  b_hn pre-broadcast: [fwd slot | bwd slot]
                    mask_ref,   # (N, N)       additive block-diagonal batch mask (0 / -1e30)
                    agg_ref,    # (Bp, N)      0/1 aggregation matrix (sum over queries per batch)
                    ctx_ref,    # out (Bp, 128)   attention context (lanes 0:2H meaningful)
                    hn_ref,     # out (2Bp, 128)  [final fwd hidden ; final bwd hidden]
                    *, hidden):
    Bp, N = agg_ref.shape
    T = N // Bp
    L = LANE
    L2, L3 = 2 * L, 3 * L

    # --- hoisted input projection: every timestep/gate/direction in ONE MXU matmul.
    #     Biases are folded in via the ones column of x / bias row of wih.
    gx = jnp.dot(x_ref[...], wih_ref[...], preferred_element_type=jnp.float32)   # (T*Bp, 6L)

    whh_f = whhf_ref[...]
    whh_b = whhb_ref[...]
    bhn_f = bhn_ref[:, 0:L]      # 128-aligned slices, already broadcast to (Bp, L)
    bhn_b = bhn_ref[:, L:L2]

    # fwd state lives in lanes 0:H, bwd state in lanes H:2H; all other lanes stay exactly 0.
    h_f = jnp.zeros((Bp, L), jnp.float32)
    h_b = jnp.zeros((Bp, L), jnp.float32)
    hf_t = [None] * T
    hb_t = [None] * T

    # --- two INDEPENDENT recurrence chains, fully unrolled (T static).  Every slice is
    #     sublane-(8) and lane-(128) aligned: no masked extracts on the serial chain.
    for t in range(T):
        sf = t            # forward direction processes time t
        sb = T - 1 - t    # backward direction processes time T-1-t

        hh_f = jnp.dot(h_f, whh_f, preferred_element_type=jnp.float32)   # (Bp, 3L)
        hh_b = jnp.dot(h_b, whh_b, preferred_element_type=jnp.float32)   # (Bp, 3L)
        gx_f = gx[sf * Bp:(sf + 1) * Bp, 0:L3]
        gx_b = gx[sb * Bp:(sb + 1) * Bp, L3:2 * L3]

        # forward direction (time sf)
        r_f = jax.nn.sigmoid(gx_f[:, 0:L] + hh_f[:, 0:L])
        z_f = jax.nn.sigmoid(gx_f[:, L:L2] + hh_f[:, L:L2])
        n_f = jnp.tanh(gx_f[:, L2:L3] + r_f * (hh_f[:, L2:L3] + bhn_f))
        h_f = n_f + z_f * (h_f - n_f)            # (1-z)*n + z*h_prev

        # backward direction (time sb)
        r_b = jax.nn.sigmoid(gx_b[:, 0:L] + hh_b[:, 0:L])
        z_b = jax.nn.sigmoid(gx_b[:, L:L2] + hh_b[:, L:L2])
        n_b = jnp.tanh(gx_b[:, L2:L3] + r_b * (hh_b[:, L2:L3] + bhn_b))
        h_b = n_b + z_b * (h_b - n_b)

        hf_t[sf] = h_f
        hb_t[sb] = h_b

    # final hidden states (PyTorch h_n): rows 0:Bp fwd (after t=T-1), rows Bp:2Bp bwd (after t=0)
    hn_ref[0:Bp, :] = h_f
    hn_ref[Bp:2 * Bp, :] = h_b

    # --- features stay in registers; fwd (lanes 0:H) and bwd (lanes H:2H) occupy disjoint lane
    #     ranges with zeros elsewhere, so the bidirectional concat is a plain add.
    #     Rows are time-major: flat index i = s*Bp + b.
    feat = jnp.concatenate([hf_t[s] + hb_t[s] for s in range(T)], axis=0)        # (N, L)

    # --- self-attention flattened to 2D MXU matmuls with a block-diagonal batch mask.
    #     The 1/sqrt(2H) scale is folded into one matmul operand only.
    feat_q = feat * (1.0 / math.sqrt(2.0 * hidden))
    scores = lax.dot_general(feat_q, feat, (((1,), (1,)), ((), ())),
                             preferred_element_type=jnp.float32)                 # (N, N)
    scores = scores + mask_ref[...]
    m = jnp.max(scores, axis=-1, keepdims=True)
    e = jnp.exp(scores - m)
    denom = jnp.sum(e, axis=-1, keepdims=True)
    p = e * pl.reciprocal(denom, approx=True)                                    # softmax(dim=-1)
    # context_b = sum_t (p_b @ feat_b)[t]  ==  (agg @ p) @ feat   (query-sum folded in)
    col = jnp.dot(agg_ref[...], p, preferred_element_type=jnp.float32)           # (Bp, N)
    ctx_ref[...] = jnp.dot(col, feat, preferred_element_type=jnp.float32)        # (Bp, L)


def word_att_fused(x_aug, wih_aug, whh_fp, whh_bp, bhn_bc, neg_mask, agg, *, T, Bp):
    """Single grid-less pallas_call; everything fits in VMEM at these sizes."""
    # TODO(synk): if this is invoked per-sentence inside SentAttNet, add a parallel grid
    #             axis over sentences (2 TensorCores on v7x) instead of one call per sentence.
    N = T * Bp
    L = LANE
    flops = (2 * (T * Bp) * L * 6 * L            # hoisted input projection
             + T * 2 * 2 * Bp * L * 3 * L        # recurrent matmuls (both chains)
             + 2 * N * L * N                     # attention scores
             + 2 * Bp * N * N + 2 * Bp * N * L)  # aggregation + context matmuls
    transcendentals = T * 2 * 3 * Bp * L + N * N
    bytes_accessed = 4 * (T * Bp * L + L * 6 * L + 2 * L * 3 * L
                          + Bp * 2 * L + N * N + Bp * N + Bp * L + 2 * Bp * L)
    vmem = pl.BlockSpec(memory_space=pltpu.MemorySpace.VMEM)
    return pl.pallas_call(
        functools.partial(word_att_kernel, hidden=H),
        out_shape=(
            jax.ShapeDtypeStruct((Bp, L), jnp.float32),       # ctx (lanes 0:2H meaningful)
            jax.ShapeDtypeStruct((2 * Bp, L), jnp.float32),   # h_n [fwd ; bwd]
        ),
        in_specs=[vmem] * 7,
        out_specs=(vmem, vmem),
        cost_estimate=pl.CostEstimate(flops=flops, transcendentals=transcendentals,
                                      bytes_accessed=bytes_accessed),
    )(x_aug, wih_aug, whh_fp, whh_bp, bhn_bc, neg_mask, agg)


# ------------------------------ parameter packing ----------------------------
def pack_gru_params(gru_params):
    """Per-direction (3,in,H)/(3,1,H) gate params -> 128-lane-slot packed kernel operands.

    One 128-lane slot per (direction, gate).  Forward values occupy lanes 0:H of their slots,
    backward values lanes H:2H, so every in-kernel slice is vreg-aligned and the bidirectional
    feature concat is a plain add.
    """
    (wih_f, whh_f, bih_f, bhh_f, wih_b, whh_b, bih_b, bhh_b) = gru_params
    L = LANE

    def lane_slot(w, off):                       # (rows, H) -> (rows, L)
        return jnp.zeros((w.shape[0], L), jnp.float32).at[:, off:off + H].set(w)

    # input weights, one slot per gate: [fwd r,z,n | bwd r,z,n]
    w_top = jnp.concatenate(
        [lane_slot(wih_f[0], 0), lane_slot(wih_f[1], 0), lane_slot(wih_f[2], 0),
         lane_slot(wih_b[0], H), lane_slot(wih_b[1], H), lane_slot(wih_b[2], H)], axis=1)   # (E, 6L)
    # fold b_ih + b_hh for r,z; keep only b_ih for n (b_hn stays inside r*(...), PyTorch semantics)
    b_row = jnp.concatenate(
        [lane_slot(bih_f[0] + bhh_f[0], 0), lane_slot(bih_f[1] + bhh_f[1], 0), lane_slot(bih_f[2], 0),
         lane_slot(bih_b[0] + bhh_b[0], H), lane_slot(bih_b[1] + bhh_b[1], H), lane_slot(bih_b[2], H)],
        axis=1)                                                                             # (1, 6L)
    # contraction dim padded to 128; bias row at row E (paired with the ones column of x)
    wih_aug = jnp.zeros((L, 6 * L), jnp.float32).at[0:E, :].set(w_top).at[E, :].set(b_row[0])

    # recurrent weights, separate per direction so the two chains stay independent
    whh_f_rows = jnp.concatenate([lane_slot(whh_f[0], 0), lane_slot(whh_f[1], 0),
                                  lane_slot(whh_f[2], 0)], axis=1)                          # (H, 3L)
    whh_fp = jnp.zeros((L, 3 * L), jnp.float32).at[0:H, :].set(whh_f_rows)
    whh_b_rows = jnp.concatenate([lane_slot(whh_b[0], H), lane_slot(whh_b[1], H),
                                  lane_slot(whh_b[2], H)], axis=1)                          # (H, 3L)
    whh_bp = jnp.zeros((L, 3 * L), jnp.float32).at[H:2 * H, :].set(whh_b_rows)

    # b_hn, one slot per direction: [fwd | bwd]
    bhn = jnp.concatenate([lane_slot(bhh_f[2], 0), lane_slot(bhh_b[2], H)], axis=1)         # (1, 2L)
    return wih_aug, whh_fp, whh_bp, bhn


# ------------------------------- forward glue --------------------------------
@jax.jit
def word_att_forward(tokens, embed_w, gru_params):
    """Reproduces WordAttNet_GRU.forward (inference)."""
    # TODO(synk): Dropout(p=0.2) is treated as inference-mode identity (no training path).
    S0, S1 = tokens.shape
    T = S0                                  # GRU sequence length (batch_first batch dim is S1)
    Bp = ((S1 + 7) // 8) * 8                # pad batch to a full 8-sublane group
    L = LANE

    # nn.Embedding lookup (data-dependent gather kept as XLA glue): (S0, S1) -> (S0, S1, E)
    feature = jnp.take(embed_w, tokens, axis=0)
    # transpose(0,1) + batch_first GRU  <=>  time-major GRU with T=S0, B=S1; (S0,S1,E) is
    # already time-major.  Pad batch to Bp, pad lanes to 128 and add the bias ones-column.
    x = jnp.zeros((T, Bp, L), jnp.float32)
    x = x.at[:, :S1, :E].set(feature)
    x = x.at[:, :, E].set(1.0)              # ones column -> bias folded into the projection matmul
    x_aug = x.reshape(T * Bp, L)

    wih_aug, whh_fp, whh_bp, bhn = pack_gru_params(gru_params)
    bhn_bc = jnp.broadcast_to(bhn, (Bp, 2 * L))

    # block-diagonal batch mask / query-sum aggregation for the flattened 2D attention
    # (rows are time-major: flat index i = t*Bp + b  =>  batch(i) = i % Bp)
    N = T * Bp
    row_b = jnp.arange(N, dtype=jnp.int32) % Bp
    neg_mask = jnp.where(row_b[:, None] == row_b[None, :], 0.0, -1e30).astype(jnp.float32)
    agg = (row_b[None, :] == jnp.arange(Bp, dtype=jnp.int32)[:, None]).astype(jnp.float32)

    ctx, hn = word_att_fused(x_aug, wih_aug, whh_fp, whh_bp, bhn_bc, neg_mask, agg, T=T, Bp=Bp)

    attn_output = ctx[:S1, :2 * H][None]                                      # (1, S1, 2H)
    h_n = jnp.stack([hn[0:S1, 0:H], hn[Bp:Bp + S1, H:2 * H]], axis=0)         # (2, S1, H)
    return attn_output, h_n


# --------------------------- deterministic params ----------------------------
def init_params(key, vocab, embed_size, hidden):
    k = 1.0 / math.sqrt(hidden)             # PyTorch GRU init scale
    keys = jax.random.split(key, 9)

    # word2vec-style embedding table; row 0 is the "unknown word" zero row (padding_idx=0).
    embed = 0.1 * jax.random.normal(keys[0], (vocab, embed_size), jnp.float32)
    embed = embed.at[0].set(0.0)

    def u(kk, shape):
        return jax.random.uniform(kk, shape, jnp.float32, minval=-k, maxval=k)

    # Each gate stored transposed as (in, H), stacked -> (3, in, H); gate order [r, z, n].
    wih_f = u(keys[1], (3, embed_size, hidden))
    whh_f = u(keys[2], (3, hidden, hidden))
    bih_f = u(keys[3], (3, 1, hidden))
    bhh_f = u(keys[4], (3, 1, hidden))
    wih_b = u(keys[5], (3, embed_size, hidden))
    whh_b = u(keys[6], (3, hidden, hidden))
    bih_b = u(keys[7], (3, 1, hidden))
    bhh_b = u(keys[8], (3, 1, hidden))
    gru_params = (wih_f, whh_f, bih_f, bhh_f, wih_b, whh_b, bih_b, bhh_b)
    return embed, gru_params


if __name__ == "__main__":
    key = jax.random.PRNGKey(0)
    k_params, k_tokens = jax.random.split(key)

    vocab = 50          # dict_len (49 word2vec rows + 1 unknown/pad row)
    S0, S1 = 8, 4       # token matrix: GRU sequence length = S0, GRU batch = S1

    embed_w, gru_params = init_params(k_params, vocab, E, H)
    tokens = jax.random.randint(k_tokens, (S0, S1), 0, vocab, dtype=jnp.int32)

    attn_output, h_n = word_att_forward(tokens, embed_w, gru_params)
    jax.block_until_ready((attn_output, h_n))

    assert attn_output.shape == (1, S1, 2 * H), attn_output.shape
    assert h_n.shape == (2, S1, H), h_n.shape
    assert bool(jnp.all(jnp.isfinite(attn_output))) and bool(jnp.all(jnp.isfinite(h_n)))
    print("KERNEL_OK")
</pallas_src>

<mosaic_0001>
module attributes {stable_mosaic.version = 11 : i64} {
  func.func @word_att_kernel(%arg0: memref<64x128xf32, #tpu.memory_space<vmem>>, %arg1: memref<128x768xf32, #tpu.memory_space<vmem>>, %arg2: memref<128x384xf32, #tpu.memory_space<vmem>>, %arg3: memref<128x384xf32, #tpu.memory_space<vmem>>, %arg4: memref<8x256xf32, #tpu.memory_space<vmem>>, %arg5: memref<64x64xf32, #tpu.memory_space<vmem>>, %arg6: memref<8x64xf32, #tpu.memory_space<vmem>>, %arg7: memref<8x128xf32, #tpu.memory_space<vmem>>, %arg8: memref<16x128xf32, #tpu.memory_space<vmem>>) attributes {dimension_semantics = [], scalar_prefetch = 0 : i64, scratch_operands = 0 : i64, tpu.core_type = #tpu.core_type<tc>} {
    %c0 = arith.constant 0 : index
    %c0_0 = arith.constant 0 : index
    %0 = vector.load %arg0[%c0, %c0_0] : memref<64x128xf32, #tpu.memory_space<vmem>>, vector<64x128xf32>
    %c0_1 = arith.constant 0 : index
    %c0_2 = arith.constant 0 : index
    %1 = vector.load %arg1[%c0_1, %c0_2] : memref<128x768xf32, #tpu.memory_space<vmem>>, vector<128x768xf32>
    %cst = arith.constant dense<0.000000e+00> : vector<64x768xf32>
    %2 = tpu.matmul %0, %1, %cst {dimension_numbers = #tpu.dot_dimension_numbers<[1], [0], [0], [1], [0, 0, 1, 1], [], []>} : vector<64x128xf32>, vector<128x768xf32>, vector<64x768xf32> -> vector<64x768xf32>
    %c0_3 = arith.constant 0 : index
    %c0_4 = arith.constant 0 : index
    %3 = vector.load %arg2[%c0_3, %c0_4] : memref<128x384xf32, #tpu.memory_space<vmem>>, vector<128x384xf32>
    %c0_5 = arith.constant 0 : index
    %c0_6 = arith.constant 0 : index
    %4 = vector.load %arg3[%c0_5, %c0_6] : memref<128x384xf32, #tpu.memory_space<vmem>>, vector<128x384xf32>
    %c0_7 = arith.constant 0 : index
    %c0_8 = arith.constant 0 : index
    %5 = vector.load %arg4[%c0_7, %c0_8] : memref<8x256xf32, #tpu.memory_space<vmem>>, vector<8x128xf32>
    %c0_9 = arith.constant 0 : index
    %c128 = arith.constant 128 : index
    %6 = vector.load %arg4[%c0_9, %c128] : memref<8x256xf32, #tpu.memory_space<vmem>>, vector<8x128xf32>
    %cst_10 = arith.constant 0.000000e+00 : f32
    %7 = vector.broadcast %cst_10 : f32 to vector<8x128xf32>
    %cst_11 = arith.constant 0.000000e+00 : f32
    %8 = vector.broadcast %cst_11 : f32 to vector<8x128xf32>
    %cst_12 = arith.constant dense<0.000000e+00> : vector<8x384xf32>
    %9 = tpu.matmul %7, %3, %cst_12 {dimension_numbers = #tpu.dot_dimension_numbers<[1], [0], [0], [1], [0, 0, 1, 1], [], []>} : vector<8x128xf32>, vector<128x384xf32>, vector<8x384xf32> -> vector<8x384xf32>
    %cst_13 = arith.constant dense<0.000000e+00> : vector<8x384xf32>
    %10 = tpu.matmul %8, %4, %cst_13 {dimension_numbers = #tpu.dot_dimension_numbers<[1], [0], [0], [1], [0, 0, 1, 1], [], []>} : vector<8x128xf32>, vector<128x384xf32>, vector<8x384xf32> -> vector<8x384xf32>
    %11 = vector.extract_strided_slice %2 {offsets = [0, 0], sizes = [8, 384], strides = [1, 1]} : vector<64x768xf32> to vector<8x384xf32>
    %12 = vector.extract_strided_slice %2 {offsets = [56, 384], sizes = [8, 384], strides = [1, 1]} : vector<64x768xf32> to vector<8x384xf32>
    %13 = vector.extract_strided_slice %11 {offsets = [0, 0], sizes = [8, 128], strides = [1, 1]} : vector<8x384xf32> to vector<8x128xf32>
    %14 = vector.extract_strided_slice %9 {offsets = [0, 0], sizes = [8, 128], strides = [1, 1]} : vector<8x384xf32> to vector<8x128xf32>
    %15 = arith.addf %13, %14 : vector<8x128xf32>
    %16 = arith.negf %15 : vector<8x128xf32>
    %17 = math.exp %16 : vector<8x128xf32>
    %cst_14 = arith.constant 1.000000e+00 : f32
    %18 = vector.broadcast %cst_14 : f32 to vector<8x128xf32>
    %19 = arith.addf %18, %17 : vector<8x128xf32>
    %20 = arith.divf %18, %19 : vector<8x128xf32>
    %21 = vector.extract_strided_slice %11 {offsets = [0, 128], sizes = [8, 128], strides = [1, 1]} : vector<8x384xf32> to vector<8x128xf32>
    %22 = vector.extract_strided_slice %9 {offsets = [0, 128], sizes = [8, 128], strides = [1, 1]} : vector<8x384xf32> to vector<8x128xf32>
    %23 = arith.addf %21, %22 : vector<8x128xf32>
    %24 = arith.negf %23 : vector<8x128xf32>
    %25 = math.exp %24 : vector<8x128xf32>
    %cst_15 = arith.constant 1.000000e+00 : f32
    %26 = vector.broadcast %cst_15 : f32 to vector<8x128xf32>
    %27 = arith.addf %26, %25 : vector<8x128xf32>
    %28 = arith.divf %26, %27 : vector<8x128xf32>
    %29 = vector.extract_strided_slice %11 {offsets = [0, 256], sizes = [8, 128], strides = [1, 1]} : vector<8x384xf32> to vector<8x128xf32>
    %30 = vector.extract_strided_slice %9 {offsets = [0, 256], sizes = [8, 128], strides = [1, 1]} : vector<8x384xf32> to vector<8x128xf32>
    %31 = arith.addf %30, %5 : vector<8x128xf32>
    %32 = arith.mulf %20, %31 : vector<8x128xf32>
    %33 = arith.addf %29, %32 : vector<8x128xf32>
    %34 = math.tanh %33 : vector<8x128xf32>
    %35 = arith.subf %7, %34 : vector<8x128xf32>
    %36 = arith.mulf %28, %35 : vector<8x128xf32>
    %37 = arith.addf %34, %36 : vector<8x128xf32>
    %38 = vector.extract_strided_slice %12 {offsets = [0, 0], sizes = [8, 128], strides = [1, 1]} : vector<8x384xf32> to vector<8x128xf32>
    %39 = vector.extract_strided_slice %10 {offsets = [0, 0], sizes = [8, 128], strides = [1, 1]} : vector<8x384xf32> to vector<8x128xf32>
    %40 = arith.addf %38, %39 : vector<8x128xf32>
    %41 = arith.negf %40 : vector<8x128xf32>
    %42 = math.exp %41 : vector<8x128xf32>
    %cst_16 = arith.constant 1.000000e+00 : f32
    %43 = vector.broadcast %cst_16 : f32 to vector<8x128xf32>
    %44 = arith.addf %43, %42 : vector<8x128xf32>
    %45 = arith.divf %43, %44 : vector<8x128xf32>
    %46 = vector.extract_strided_slice %12 {offsets = [0, 128], sizes = [8, 128], strides = [1, 1]} : vector<8x384xf32> to vector<8x128xf32>
    %47 = vector.extract_strided_slice %10 {offsets = [0, 128], sizes = [8, 128], strides = [1, 1]} : vector<8x384xf32> to vector<8x128xf32>
    %48 = arith.addf %46, %47 : vector<8x128xf32>
    %49 = arith.negf %48 : vector<8x128xf32>
    %50 = math.exp %49 : vector<8x128xf32>
    %cst_17 = arith.constant 1.000000e+00 : f32
    %51 = vector.broadcast %cst_17 : f32 to vector<8x128xf32>
    %52 = arith.addf %51, %50 : vector<8x128xf32>
    %53 = arith.divf %51, %52 : vector<8x128xf32>
    %54 = vector.extract_strided_slice %12 {offsets = [0, 256], sizes = [8, 128], strides = [1, 1]} : vector<8x384xf32> to vector<8x128xf32>
    %55 = vector.extract_strided_slice %10 {offsets = [0, 256], sizes = [8, 128], strides = [1, 1]} : vector<8x384xf32> to vector<8x128xf32>
    %56 = arith.addf %55, %6 : vector<8x128xf32>
    %57 = arith.mulf %45, %56 : vector<8x128xf32>
    %58 = arith.addf %54, %57 : vector<8x128xf32>
    %59 = math.tanh %58 : vector<8x128xf32>
    %60 = arith.subf %8, %59 : vector<8x128xf32>
    %61 = arith.mulf %53, %60 : vector<8x128xf32>
    %62 = arith.addf %59, %61 : vector<8x128xf32>
    %cst_18 = arith.constant dense<0.000000e+00> : vector<8x384xf32>
    %63 = tpu.matmul %37, %3, %cst_18 {dimension_numbers = #tpu.dot_dimension_numbers<[1], [0], [0], [1], [0, 0, 1, 1], [], []>} : vector<8x128xf32>, vector<128x384xf32>, vector<8x384xf32> -> vector<8x384xf32>
    %cst_19 = arith.constant dense<0.000000e+00> : vector<8x384xf32>
    %64 = tpu.matmul %62, %4, %cst_19 {dimension_numbers = #tpu.dot_dimension_numbers<[1], [0], [0], [1], [0, 0, 1, 1], [], []>} : vector<8x128xf32>, vector<128x384xf32>, vector<8x384xf32> -> vector<8x384xf32>
    %65 = vector.extract_strided_slice %2 {offsets = [8, 0], sizes = [8, 384], strides = [1, 1]} : vector<64x768xf32> to vector<8x384xf32>
    %66 = vector.extract_strided_slice %2 {offsets = [48, 384], sizes = [8, 384], strides = [1, 1]} : vector<64x768xf32> to vector<8x384xf32>
    %67 = vector.extract_strided_slice %65 {offsets = [0, 0], sizes = [8, 128], strides = [1, 1]} : vector<8x384xf32> to vector<8x128xf32>
    %68 = vector.extract_strided_slice %63 {offsets = [0, 0], sizes = [8, 128], strides = [1, 1]} : vector<8x384xf32> to vector<8x128xf32>
    %69 = arith.addf %67, %68 : vector<8x128xf32>
    %70 = arith.negf %69 : vector<8x128xf32>
    %71 = math.exp %70 : vector<8x128xf32>
    %cst_20 = arith.constant 1.000000e+00 : f32
    %72 = vector.broadcast %cst_20 : f32 to vector<8x128xf32>
    %73 = arith.addf %72, %71 : vector<8x128xf32>
    %74 = arith.divf %72, %73 : vector<8x128xf32>
    %75 = vector.extract_strided_slice %65 {offsets = [0, 128], sizes = [8, 128], strides = [1, 1]} : vector<8x384xf32> to vector<8x128xf32>
    %76 = vector.extract_strided_slice %63 {offsets = [0, 128], sizes = [8, 128], strides = [1, 1]} : vector<8x384xf32> to vector<8x128xf32>
    %77 = arith.addf %75, %76 : vector<8x128xf32>
    %78 = arith.negf %77 : vector<8x128xf32>
    %79 = math.exp %78 : vector<8x128xf32>
    %cst_21 = arith.constant 1.000000e+00 : f32
    %80 = vector.broadcast %cst_21 : f32 to vector<8x128xf32>
    %81 = arith.addf %80, %79 : vector<8x128xf32>
    %82 = arith.divf %80, %81 : vector<8x128xf32>
    %83 = vector.extract_strided_slice %65 {offsets = [0, 256], sizes = [8, 128], strides = [1, 1]} : vector<8x384xf32> to vector<8x128xf32>
    %84 = vector.extract_strided_slice %63 {offsets = [0, 256], sizes = [8, 128], strides = [1, 1]} : vector<8x384xf32> to vector<8x128xf32>
    %85 = arith.addf %84, %5 : vector<8x128xf32>
    %86 = arith.mulf %74, %85 : vector<8x128xf32>
    %87 = arith.addf %83, %86 : vector<8x128xf32>
    %88 = math.tanh %87 : vector<8x128xf32>
    %89 = arith.subf %37, %88 : vector<8x128xf32>
    %90 = arith.mulf %82, %89 : vector<8x128xf32>
    %91 = arith.addf %88, %90 : vector<8x128xf32>
    %92 = vector.extract_strided_slice %66 {offsets = [0, 0], sizes = [8, 128], strides = [1, 1]} : vector<8x384xf32> to vector<8x128xf32>
    %93 = vector.extract_strided_slice %64 {offsets = [0, 0], sizes = [8, 128], strides = [1, 1]} : vector<8x384xf32> to vector<8x128xf32>
    %94 = arith.addf %92, %93 : vector<8x128xf32>
    %95 = arith.negf %94 : vector<8x128xf32>
    %96 = math.exp %95 : vector<8x128xf32>
    %cst_22 = arith.constant 1.000000e+00 : f32
    %97 = vector.broadcast %cst_22 : f32 to vector<8x128xf32>
    %98 = arith.addf %97, %96 : vector<8x128xf32>
    %99 = arith.divf %97, %98 : vector<8x128xf32>
    %100 = vector.extract_strided_slice %66 {offsets = [0, 128], sizes = [8, 128], strides = [1, 1]} : vector<8x384xf32> to vector<8x128xf32>
    %101 = vector.extract_strided_slice %64 {offsets = [0, 128], sizes = [8, 128], strides = [1, 1]} : vector<8x384xf32> to vector<8x128xf32>
    %102 = arith.addf %100, %101 : vector<8x128xf32>
    %103 = arith.negf %102 : vector<8x128xf32>
    %104 = math.exp %103 : vector<8x128xf32>
    %cst_23 = arith.constant 1.000000e+00 : f32
    %105 = vector.broadcast %cst_23 : f32 to vector<8x128xf32>
    %106 = arith.addf %105, %104 : vector<8x128xf32>
    %107 = arith.divf %105, %106 : vector<8x128xf32>
    %108 = vector.extract_strided_slice %66 {offsets = [0, 256], sizes = [8, 128], strides = [1, 1]} : vector<8x384xf32> to vector<8x128xf32>
    %109 = vector.extract_strided_slice %64 {offsets = [0, 256], sizes = [8, 128], strides = [1, 1]} : vector<8x384xf32> to vector<8x128xf32>
    %110 = arith.addf %109, %6 : vector<8x128xf32>
    %111 = arith.mulf %99, %110 : vector<8x128xf32>
    %112 = arith.addf %108, %111 : vector<8x128xf32>
    %113 = math.tanh %112 : vector<8x128xf32>
    %114 = arith.subf %62, %113 : vector<8x128xf32>
    %115 = arith.mulf %107, %114 : vector<8x128xf32>
    %116 = arith.addf %113, %115 : vector<8x128xf32>
    %cst_24 = arith.constant dense<0.000000e+00> : vector<8x384xf32>
    %117 = tpu.matmul %91, %3, %cst_24 {dimension_numbers = #tpu.dot_dimension_numbers<[1], [0], [0], [1], [0, 0, 1, 1], [], []>} : vector<8x128xf32>, vector<128x384xf32>, vector<8x384xf32> -> vector<8x384xf32>
    %cst_25 = arith.constant dense<0.000000e+00> : vector<8x384xf32>
    %118 = tpu.matmul %116, %4, %cst_25 {dimension_numbers = #tpu.dot_dimension_numbers<[1], [0], [0], [1], [0, 0, 1, 1], [], []>} : vector<8x128xf32>, vector<128x384xf32>, vector<8x384xf32> -> vector<8x384xf32>
    %119 = vector.extract_strided_slice %2 {offsets = [16, 0], sizes = [8, 384], strides = [1, 1]} : vector<64x768xf32> to vector<8x384xf32>
    %120 = vector.extract_strided_slice %2 {offsets = [40, 384], sizes = [8, 384], strides = [1, 1]} : vector<64x768xf32> to vector<8x384xf32>
    %121 = vector.extract_strided_slice %119 {offsets = [0, 0], sizes = [8, 128], strides = [1, 1]} : vector<8x384xf32> to vector<8x128xf32>
    %122 = vector.extract_strided_slice %117 {offsets = [0, 0], sizes = [8, 128], strides = [1, 1]} : vector<8x384xf32> to vector<8x128xf32>
    %123 = arith.addf %121, %122 : vector<8x128xf32>
    %124 = arith.negf %123 : vector<8x128xf32>
    %125 = math.exp %124 : vector<8x128xf32>
    %cst_26 = arith.constant 1.000000e+00 : f32
    %126 = vector.broadcast %cst_26 : f32 to vector<8x128xf32>
    %127 = arith.addf %126, %125 : vector<8x128xf32>
    %128 = arith.divf %126, %127 : vector<8x128xf32>
    %129 = vector.extract_strided_slice %119 {offsets = [0, 128], sizes = [8, 128], strides = [1, 1]} : vector<8x384xf32> to vector<8x128xf32>
    %130 = vector.extract_strided_slice %117 {offsets = [0, 128], sizes = [8, 128], strides = [1, 1]} : vector<8x384xf32> to vector<8x128xf32>
    %131 = arith.addf %129, %130 : vector<8x128xf32>
    %132 = arith.negf %131 : vector<8x128xf32>
    %133 = math.exp %132 : vector<8x128xf32>
    %cst_27 = arith.constant 1.000000e+00 : f32
    %134 = vector.broadcast %cst_27 : f32 to vector<8x128xf32>
    %135 = arith.addf %134, %133 : vector<8x128xf32>
    %136 = arith.divf %134, %135 : vector<8x128xf32>
    %137 = vector.extract_strided_slice %119 {offsets = [0, 256], sizes = [8, 128], strides = [1, 1]} : vector<8x384xf32> to vector<8x128xf32>
    %138 = vector.extract_strided_slice %117 {offsets = [0, 256], sizes = [8, 128], strides = [1, 1]} : vector<8x384xf32> to vector<8x128xf32>
    %139 = arith.addf %138, %5 : vector<8x128xf32>
    %140 = arith.mulf %128, %139 : vector<8x128xf32>
    %141 = arith.addf %137, %140 : vector<8x128xf32>
    %142 = math.tanh %141 : vector<8x128xf32>
    %143 = arith.subf %91, %142 : vector<8x128xf32>
    %144 = arith.mulf %136, %143 : vector<8x128xf32>
    %145 = arith.addf %142, %144 : vector<8x128xf32>
    %146 = vector.extract_strided_slice %120 {offsets = [0, 0], sizes = [8, 128], strides = [1, 1]} : vector<8x384xf32> to vector<8x128xf32>
    %147 = vector.extract_strided_slice %118 {offsets = [0, 0], sizes = [8, 128], strides = [1, 1]} : vector<8x384xf32> to vector<8x128xf32>
    %148 = arith.addf %146, %147 : vector<8x128xf32>
    %149 = arith.negf %148 : vector<8x128xf32>
    %150 = math.exp %149 : vector<8x128xf32>
    %cst_28 = arith.constant 1.000000e+00 : f32
    %151 = vector.broadcast %cst_28 : f32 to vector<8x128xf32>
    %152 = arith.addf %151, %150 : vector<8x128xf32>
    %153 = arith.divf %151, %152 : vector<8x128xf32>
    %154 = vector.extract_strided_slice %120 {offsets = [0, 128], sizes = [8, 128], strides = [1, 1]} : vector<8x384xf32> to vector<8x128xf32>
    %155 = vector.extract_strided_slice %118 {offsets = [0, 128], sizes = [8, 128], strides = [1, 1]} : vector<8x384xf32> to vector<8x128xf32>
    %156 = arith.addf %154, %155 : vector<8x128xf32>
    %157 = arith.negf %156 : vector<8x128xf32>
    %158 = math.exp %157 : vector<8x128xf32>
    %cst_29 = arith.constant 1.000000e+00 : f32
    %159 = vector.broadcast %cst_29 : f32 to vector<8x128xf32>
    %160 = arith.addf %159, %158 : vector<8x128xf32>
    %161 = arith.divf %159, %160 : vector<8x128xf32>
    %162 = vector.extract_strided_slice %120 {offsets = [0, 256], sizes = [8, 128], strides = [1, 1]} : vector<8x384xf32> to vector<8x128xf32>
    %163 = vector.extract_strided_slice %118 {offsets = [0, 256], sizes = [8, 128], strides = [1, 1]} : vector<8x384xf32> to vector<8x128xf32>
    %164 = arith.addf %163, %6 : vector<8x128xf32>
    %165 = arith.mulf %153, %164 : vector<8x128xf32>
    %166 = arith.addf %162, %165 : vector<8x128xf32>
    %167 = math.tanh %166 : vector<8x128xf32>
    %168 = arith.subf %116, %167 : vector<8x128xf32>
    %169 = arith.mulf %161, %168 : vector<8x128xf32>
    %170 = arith.addf %167, %169 : vector<8x128xf32>
    %cst_30 = arith.constant dense<0.000000e+00> : vector<8x384xf32>
    %171 = tpu.matmul %145, %3, %cst_30 {dimension_numbers = #tpu.dot_dimension_numbers<[1], [0], [0], [1], [0, 0, 1, 1], [], []>} : vector<8x128xf32>, vector<128x384xf32>, vector<8x384xf32> -> vector<8x384xf32>
    %cst_31 = arith.constant dense<0.000000e+00> : vector<8x384xf32>
    %172 = tpu.matmul %170, %4, %cst_31 {dimension_numbers = #tpu.dot_dimension_numbers<[1], [0], [0], [1], [0, 0, 1, 1], [], []>} : vector<8x128xf32>, vector<128x384xf32>, vector<8x384xf32> -> vector<8x384xf32>
    %173 = vector.extract_strided_slice %2 {offsets = [24, 0], sizes = [8, 384], strides = [1, 1]} : vector<64x768xf32> to vector<8x384xf32>
    %174 = vector.extract_strided_slice %2 {offsets = [32, 384], sizes = [8, 384], strides = [1, 1]} : vector<64x768xf32> to vector<8x384xf32>
    %175 = vector.extract_strided_slice %173 {offsets = [0, 0], sizes = [8, 128], strides = [1, 1]} : vector<8x384xf32> to vector<8x128xf32>
    %176 = vector.extract_strided_slice %171 {offsets = [0, 0], sizes = [8, 128], strides = [1, 1]} : vector<8x384xf32> to vector<8x128xf32>
    %177 = arith.addf %175, %176 : vector<8x128xf32>
    %178 = arith.negf %177 : vector<8x128xf32>
    %179 = math.exp %178 : vector<8x128xf32>
    %cst_32 = arith.constant 1.000000e+00 : f32
    %180 = vector.broadcast %cst_32 : f32 to vector<8x128xf32>
    %181 = arith.addf %180, %179 : vector<8x128xf32>
    %182 = arith.divf %180, %181 : vector<8x128xf32>
    %183 = vector.extract_strided_slice %173 {offsets = [0, 128], sizes = [8, 128], strides = [1, 1]} : vector<8x384xf32> to vector<8x128xf32>
    %184 = vector.extract_strided_slice %171 {offsets = [0, 128], sizes = [8, 128], strides = [1, 1]} : vector<8x384xf32> to vector<8x128xf32>
    %185 = arith.addf %183, %184 : vector<8x128xf32>
    %186 = arith.negf %185 : vector<8x128xf32>
    %187 = math.exp %186 : vector<8x128xf32>
    %cst_33 = arith.constant 1.000000e+00 : f32
    %188 = vector.broadcast %cst_33 : f32 to vector<8x128xf32>
    %189 = arith.addf %188, %187 : vector<8x128xf32>
    %190 = arith.divf %188, %189 : vector<8x128xf32>
    %191 = vector.extract_strided_slice %173 {offsets = [0, 256], sizes = [8, 128], strides = [1, 1]} : vector<8x384xf32> to vector<8x128xf32>
    %192 = vector.extract_strided_slice %171 {offsets = [0, 256], sizes = [8, 128], strides = [1, 1]} : vector<8x384xf32> to vector<8x128xf32>
    %193 = arith.addf %192, %5 : vector<8x128xf32>
    %194 = arith.mulf %182, %193 : vector<8x128xf32>
    %195 = arith.addf %191, %194 : vector<8x128xf32>
    %196 = math.tanh %195 : vector<8x128xf32>
    %197 = arith.subf %145, %196 : vector<8x128xf32>
    %198 = arith.mulf %190, %197 : vector<8x128xf32>
    %199 = arith.addf %196, %198 : vector<8x128xf32>
    %200 = vector.extract_strided_slice %174 {offsets = [0, 0], sizes = [8, 128], strides = [1, 1]} : vector<8x384xf32> to vector<8x128xf32>
    %201 = vector.extract_strided_slice %172 {offsets = [0, 0], sizes = [8, 128], strides = [1, 1]} : vector<8x384xf32> to vector<8x128xf32>
    %202 = arith.addf %200, %201 : vector<8x128xf32>
    %203 = arith.negf %202 : vector<8x128xf32>
    %204 = math.exp %203 : vector<8x128xf32>
    %cst_34 = arith.constant 1.000000e+00 : f32
    %205 = vector.broadcast %cst_34 : f32 to vector<8x128xf32>
    %206 = arith.addf %205, %204 : vector<8x128xf32>
    %207 = arith.divf %205, %206 : vector<8x128xf32>
    %208 = vector.extract_strided_slice %174 {offsets = [0, 128], sizes = [8, 128], strides = [1, 1]} : vector<8x384xf32> to vector<8x128xf32>
    %209 = vector.extract_strided_slice %172 {offsets = [0, 128], sizes = [8, 128], strides = [1, 1]} : vector<8x384xf32> to vector<8x128xf32>
    %210 = arith.addf %208, %209 : vector<8x128xf32>
    %211 = arith.negf %210 : vector<8x128xf32>
    %212 = math.exp %211 : vector<8x128xf32>
    %cst_35 = arith.constant 1.000000e+00 : f32
    %213 = vector.broadcast %cst_35 : f32 to vector<8x128xf32>
    %214 = arith.addf %213, %212 : vector<8x128xf32>
    %215 = arith.divf %213, %214 : vector<8x128xf32>
    %216 = vector.extract_strided_slice %174 {offsets = [0, 256], sizes = [8, 128], strides = [1, 1]} : vector<8x384xf32> to vector<8x128xf32>
    %217 = vector.extract_strided_slice %172 {offsets = [0, 256], sizes = [8, 128], strides = [1, 1]} : vector<8x384xf32> to vector<8x128xf32>
    %218 = arith.addf %217, %6 : vector<8x128xf32>
    %219 = arith.mulf %207, %218 : vector<8x128xf32>
    %220 = arith.addf %216, %219 : vector<8x128xf32>
    %221 = math.tanh %220 : vector<8x128xf32>
    %222 = arith.subf %170, %221 : vector<8x128xf32>
    %223 = arith.mulf %215, %222 : vector<8x128xf32>
    %224 = arith.addf %221, %223 : vector<8x128xf32>
    %cst_36 = arith.constant dense<0.000000e+00> : vector<8x384xf32>
    %225 = tpu.matmul %199, %3, %cst_36 {dimension_numbers = #tpu.dot_dimension_numbers<[1], [0], [0], [1], [0, 0, 1, 1], [], []>} : vector<8x128xf32>, vector<128x384xf32>, vector<8x384xf32> -> vector<8x384xf32>
    %cst_37 = arith.constant dense<0.000000e+00> : vector<8x384xf32>
    %226 = tpu.matmul %224, %4, %cst_37 {dimension_numbers = #tpu.dot_dimension_numbers<[1], [0], [0], [1], [0, 0, 1, 1], [], []>} : vector<8x128xf32>, vector<128x384xf32>, vector<8x384xf32> -> vector<8x384xf32>
    %227 = vector.extract_strided_slice %2 {offsets = [32, 0], sizes = [8, 384], strides = [1, 1]} : vector<64x768xf32> to vector<8x384xf32>
    %228 = vector.extract_strided_slice %2 {offsets = [24, 384], sizes = [8, 384], strides = [1, 1]} : vector<64x768xf32> to vector<8x384xf32>
    %229 = vector.extract_strided_slice %227 {offsets = [0, 0], sizes = [8, 128], strides = [1, 1]} : vector<8x384xf32> to vector<8x128xf32>
    %230 = vector.extract_strided_slice %225 {offsets = [0, 0], sizes = [8, 128], strides = [1, 1]} : vector<8x384xf32> to vector<8x128xf32>
    %231 = arith.addf %229, %230 : vector<8x128xf32>
    %232 = arith.negf %231 : vector<8x128xf32>
    %233 = math.exp %232 : vector<8x128xf32>
    %cst_38 = arith.constant 1.000000e+00 : f32
    %234 = vector.broadcast %cst_38 : f32 to vector<8x128xf32>
    %235 = arith.addf %234, %233 : vector<8x128xf32>
    %236 = arith.divf %234, %235 : vector<8x128xf32>
    %237 = vector.extract_strided_slice %227 {offsets = [0, 128], sizes = [8, 128], strides = [1, 1]} : vector<8x384xf32> to vector<8x128xf32>
    %238 = vector.extract_strided_slice %225 {offsets = [0, 128], sizes = [8, 128], strides = [1, 1]} : vector<8x384xf32> to vector<8x128xf32>
    %239 = arith.addf %237, %238 : vector<8x128xf32>
    %240 = arith.negf %239 : vector<8x128xf32>
    %241 = math.exp %240 : vector<8x128xf32>
    %cst_39 = arith.constant 1.000000e+00 : f32
    %242 = vector.broadcast %cst_39 : f32 to vector<8x128xf32>
    %243 = arith.addf %242, %241 : vector<8x128xf32>
    %244 = arith.divf %242, %243 : vector<8x128xf32>
    %245 = vector.extract_strided_slice %227 {offsets = [0, 256], sizes = [8, 128], strides = [1, 1]} : vector<8x384xf32> to vector<8x128xf32>
    %246 = vector.extract_strided_slice %225 {offsets = [0, 256], sizes = [8, 128], strides = [1, 1]} : vector<8x384xf32> to vector<8x128xf32>
    %247 = arith.addf %246, %5 : vector<8x128xf32>
    %248 = arith.mulf %236, %247 : vector<8x128xf32>
    %249 = arith.addf %245, %248 : vector<8x128xf32>
    %250 = math.tanh %249 : vector<8x128xf32>
    %251 = arith.subf %199, %250 : vector<8x128xf32>
    %252 = arith.mulf %244, %251 : vector<8x128xf32>
    %253 = arith.addf %250, %252 : vector<8x128xf32>
    %254 = vector.extract_strided_slice %228 {offsets = [0, 0], sizes = [8, 128], strides = [1, 1]} : vector<8x384xf32> to vector<8x128xf32>
    %255 = vector.extract_strided_slice %226 {offsets = [0, 0], sizes = [8, 128], strides = [1, 1]} : vector<8x384xf32> to vector<8x128xf32>
    %256 = arith.addf %254, %255 : vector<8x128xf32>
    %257 = arith.negf %256 : vector<8x128xf32>
    %258 = math.exp %257 : vector<8x128xf32>
    %cst_40 = arith.constant 1.000000e+00 : f32
    %259 = vector.broadcast %cst_40 : f32 to vector<8x128xf32>
    %260 = arith.addf %259, %258 : vector<8x128xf32>
    %261 = arith.divf %259, %260 : vector<8x128xf32>
    %262 = vector.extract_strided_slice %228 {offsets = [0, 128], sizes = [8, 128], strides = [1, 1]} : vector<8x384xf32> to vector<8x128xf32>
    %263 = vector.extract_strided_slice %226 {offsets = [0, 128], sizes = [8, 128], strides = [1, 1]} : vector<8x384xf32> to vector<8x128xf32>
    %264 = arith.addf %262, %263 : vector<8x128xf32>
    %265 = arith.negf %264 : vector<8x128xf32>
    %266 = math.exp %265 : vector<8x128xf32>
    %cst_41 = arith.constant 1.000000e+00 : f32
    %267 = vector.broadcast %cst_41 : f32 to vector<8x128xf32>
    %268 = arith.addf %267, %266 : vector<8x128xf32>
    %269 = arith.divf %267, %268 : vector<8x128xf32>
    %270 = vector.extract_strided_slice %228 {offsets = [0, 256], sizes = [8, 128], strides = [1, 1]} : vector<8x384xf32> to vector<8x128xf32>
    %271 = vector.extract_strided_slice %226 {offsets = [0, 256], sizes = [8, 128], strides = [1, 1]} : vector<8x384xf32> to vector<8x128xf32>
    %272 = arith.addf %271, %6 : vector<8x128xf32>
    %273 = arith.mulf %261, %272 : vector<8x128xf32>
    %274 = arith.addf %270, %273 : vector<8x128xf32>
    %275 = math.tanh %274 : vector<8x128xf32>
    %276 = arith.subf %224, %275 : vector<8x128xf32>
    %277 = arith.mulf %269, %276 : vector<8x128xf32>
    %278 = arith.addf %275, %277 : vector<8x128xf32>
    %cst_42 = arith.constant dense<0.000000e+00> : vector<8x384xf32>
    %279 = tpu.matmul %253, %3, %cst_42 {dimension_numbers = #tpu.dot_dimension_numbers<[1], [0], [0], [1], [0, 0, 1, 1], [], []>} : vector<8x128xf32>, vector<128x384xf32>, vector<8x384xf32> -> vector<8x384xf32>
    %cst_43 = arith.constant dense<0.000000e+00> : vector<8x384xf32>
    %280 = tpu.matmul %278, %4, %cst_43 {dimension_numbers = #tpu.dot_dimension_numbers<[1], [0], [0], [1], [0, 0, 1, 1], [], []>} : vector<8x128xf32>, vector<128x384xf32>, vector<8x384xf32> -> vector<8x384xf32>
    %281 = vector.extract_strided_slice %2 {offsets = [40, 0], sizes = [8, 384], strides = [1, 1]} : vector<64x768xf32> to vector<8x384xf32>
    %282 = vector.extract_strided_slice %2 {offsets = [16, 384], sizes = [8, 384], strides = [1, 1]} : vector<64x768xf32> to vector<8x384xf32>
    %283 = vector.extract_strided_slice %281 {offsets = [0, 0], sizes = [8, 128], strides = [1, 1]} : vector<8x384xf32> to vector<8x128xf32>
    %284 = vector.extract_strided_slice %279 {offsets = [0, 0], sizes = [8, 128], strides = [1, 1]} : vector<8x384xf32> to vector<8x128xf32>
    %285 = arith.addf %283, %284 : vector<8x128xf32>
    %286 = arith.negf %285 : vector<8x128xf32>
    %287 = math.exp %286 : vector<8x128xf32>
    %cst_44 = arith.constant 1.000000e+00 : f32
    %288 = vector.broadcast %cst_44 : f32 to vector<8x128xf32>
    %289 = arith.addf %288, %287 : vector<8x128xf32>
    %290 = arith.divf %288, %289 : vector<8x128xf32>
    %291 = vector.extract_strided_slice %281 {offsets = [0, 128], sizes = [8, 128], strides = [1, 1]} : vector<8x384xf32> to vector<8x128xf32>
    %292 = vector.extract_strided_slice %279 {offsets = [0, 128], sizes = [8, 128], strides = [1, 1]} : vector<8x384xf32> to vector<8x128xf32>
    %293 = arith.addf %291, %292 : vector<8x128xf32>
    %294 = arith.negf %293 : vector<8x128xf32>
    %295 = math.exp %294 : vector<8x128xf32>
    %cst_45 = arith.constant 1.000000e+00 : f32
    %296 = vector.broadcast %cst_45 : f32 to vector<8x128xf32>
    %297 = arith.addf %296, %295 : vector<8x128xf32>
    %298 = arith.divf %296, %297 : vector<8x128xf32>
    %299 = vector.extract_strided_slice %281 {offsets = [0, 256], sizes = [8, 128], strides = [1, 1]} : vector<8x384xf32> to vector<8x128xf32>
    %300 = vector.extract_strided_slice %279 {offsets = [0, 256], sizes = [8, 128], strides = [1, 1]} : vector<8x384xf32> to vector<8x128xf32>
    %301 = arith.addf %300, %5 : vector<8x128xf32>
    %302 = arith.mulf %290, %301 : vector<8x128xf32>
    %303 = arith.addf %299, %302 : vector<8x128xf32>
    %304 = math.tanh %303 : vector<8x128xf32>
    %305 = arith.subf %253, %304 : vector<8x128xf32>
    %306 = arith.mulf %298, %305 : vector<8x128xf32>
    %307 = arith.addf %304, %306 : vector<8x128xf32>
    %308 = vector.extract_strided_slice %282 {offsets = [0, 0], sizes = [8, 128], strides = [1, 1]} : vector<8x384xf32> to vector<8x128xf32>
    %309 = vector.extract_strided_slice %280 {offsets = [0, 0], sizes = [8, 128], strides = [1, 1]} : vector<8x384xf32> to vector<8x128xf32>
    %310 = arith.addf %308, %309 : vector<8x128xf32>
    %311 = arith.negf %310 : vector<8x128xf32>
    %312 = math.exp %311 : vector<8x128xf32>
    %cst_46 = arith.constant 1.000000e+00 : f32
    %313 = vector.broadcast %cst_46 : f32 to vector<8x128xf32>
    %314 = arith.addf %313, %312 : vector<8x128xf32>
    %315 = arith.divf %313, %314 : vector<8x128xf32>
    %316 = vector.extract_strided_slice %282 {offsets = [0, 128], sizes = [8, 128], strides = [1, 1]} : vector<8x384xf32> to vector<8x128xf32>
    %317 = vector.extract_strided_slice %280 {offsets = [0, 128], sizes = [8, 128], strides = [1, 1]} : vector<8x384xf32> to vector<8x128xf32>
    %318 = arith.addf %316, %317 : vector<8x128xf32>
    %319 = arith.negf %318 : vector<8x128xf32>
    %320 = math.exp %319 : vector<8x128xf32>
    %cst_47 = arith.constant 1.000000e+00 : f32
    %321 = vector.broadcast %cst_47 : f32 to vector<8x128xf32>
    %322 = arith.addf %321, %320 : vector<8x128xf32>
    %323 = arith.divf %321, %322 : vector<8x128xf32>
    %324 = vector.extract_strided_slice %282 {offsets = [0, 256], sizes = [8, 128], strides = [1, 1]} : vector<8x384xf32> to vector<8x128xf32>
    %325 = vector.extract_strided_slice %280 {offsets = [0, 256], sizes = [8, 128], strides = [1, 1]} : vector<8x384xf32> to vector<8x128xf32>
    %326 = arith.addf %325, %6 : vector<8x128xf32>
    %327 = arith.mulf %315, %326 : vector<8x128xf32>
    %328 = arith.addf %324, %327 : vector<8x128xf32>
    %329 = math.tanh %328 : vector<8x128xf32>
    %330 = arith.subf %278, %329 : vector<8x128xf32>
    %331 = arith.mulf %323, %330 : vector<8x128xf32>
    %332 = arith.addf %329, %331 : vector<8x128xf32>
    %cst_48 = arith.constant dense<0.000000e+00> : vector<8x384xf32>
    %333 = tpu.matmul %307, %3, %cst_48 {dimension_numbers = #tpu.dot_dimension_numbers<[1], [0], [0], [1], [0, 0, 1, 1], [], []>} : vector<8x128xf32>, vector<128x384xf32>, vector<8x384xf32> -> vector<8x384xf32>
    %cst_49 = arith.constant dense<0.000000e+00> : vector<8x384xf32>
    %334 = tpu.matmul %332, %4, %cst_49 {dimension_numbers = #tpu.dot_dimension_numbers<[1], [0], [0], [1], [0, 0, 1, 1], [], []>} : vector<8x128xf32>, vector<128x384xf32>, vector<8x384xf32> -> vector<8x384xf32>
    %335 = vector.extract_strided_slice %2 {offsets = [48, 0], sizes = [8, 384], strides = [1, 1]} : vector<64x768xf32> to vector<8x384xf32>
    %336 = vector.extract_strided_slice %2 {offsets = [8, 384], sizes = [8, 384], strides = [1, 1]} : vector<64x768xf32> to vector<8x384xf32>
    %337 = vector.extract_strided_slice %335 {offsets = [0, 0], sizes = [8, 128], strides = [1, 1]} : vector<8x384xf32> to vector<8x128xf32>
    %338 = vector.extract_strided_slice %333 {offsets = [0, 0], sizes = [8, 128], strides = [1, 1]} : vector<8x384xf32> to vector<8x128xf32>
    %339 = arith.addf %337, %338 : vector<8x128xf32>
    %340 = arith.negf %339 : vector<8x128xf32>
    %341 = math.exp %340 : vector<8x128xf32>
    %cst_50 = arith.constant 1.000000e+00 : f32
    %342 = vector.broadcast %cst_50 : f32 to vector<8x128xf32>
    %343 = arith.addf %342, %341 : vector<8x128xf32>
    %344 = arith.divf %342, %343 : vector<8x128xf32>
    %345 = vector.extract_strided_slice %335 {offsets = [0, 128], sizes = [8, 128], strides = [1, 1]} : vector<8x384xf32> to vector<8x128xf32>
    %346 = vector.extract_strided_slice %333 {offsets = [0, 128], sizes = [8, 128], strides = [1, 1]} : vector<8x384xf32> to vector<8x128xf32>
    %347 = arith.addf %345, %346 : vector<8x128xf32>
    %348 = arith.negf %347 : vector<8x128xf32>
    %349 = math.exp %348 : vector<8x128xf32>
    %cst_51 = arith.constant 1.000000e+00 : f32
    %350 = vector.broadcast %cst_51 : f32 to vector<8x128xf32>
    %351 = arith.addf %350, %349 : vector<8x128xf32>
    %352 = arith.divf %350, %351 : vector<8x128xf32>
    %353 = vector.extract_strided_slice %335 {offsets = [0, 256], sizes = [8, 128], strides = [1, 1]} : vector<8x384xf32> to vector<8x128xf32>
    %354 = vector.extract_strided_slice %333 {offsets = [0, 256], sizes = [8, 128], strides = [1, 1]} : vector<8x384xf32> to vector<8x128xf32>
    %355 = arith.addf %354, %5 : vector<8x128xf32>
    %356 = arith.mulf %344, %355 : vector<8x128xf32>
    %357 = arith.addf %353, %356 : vector<8x128xf32>
    %358 = math.tanh %357 : vector<8x128xf32>
    %359 = arith.subf %307, %358 : vector<8x128xf32>
    %360 = arith.mulf %352, %359 : vector<8x128xf32>
    %361 = arith.addf %358, %360 : vector<8x128xf32>
    %362 = vector.extract_strided_slice %336 {offsets = [0, 0], sizes = [8, 128], strides = [1, 1]} : vector<8x384xf32> to vector<8x128xf32>
    %363 = vector.extract_strided_slice %334 {offsets = [0, 0], sizes = [8, 128], strides = [1, 1]} : vector<8x384xf32> to vector<8x128xf32>
    %364 = arith.addf %362, %363 : vector<8x128xf32>
    %365 = arith.negf %364 : vector<8x128xf32>
    %366 = math.exp %365 : vector<8x128xf32>
    %cst_52 = arith.constant 1.000000e+00 : f32
    %367 = vector.broadcast %cst_52 : f32 to vector<8x128xf32>
    %368 = arith.addf %367, %366 : vector<8x128xf32>
    %369 = arith.divf %367, %368 : vector<8x128xf32>
    %370 = vector.extract_strided_slice %336 {offsets = [0, 128], sizes = [8, 128], strides = [1, 1]} : vector<8x384xf32> to vector<8x128xf32>
    %371 = vector.extract_strided_slice %334 {offsets = [0, 128], sizes = [8, 128], strides = [1, 1]} : vector<8x384xf32> to vector<8x128xf32>
    %372 = arith.addf %370, %371 : vector<8x128xf32>
    %373 = arith.negf %372 : vector<8x128xf32>
    %374 = math.exp %373 : vector<8x128xf32>
    %cst_53 = arith.constant 1.000000e+00 : f32
    %375 = vector.broadcast %cst_53 : f32 to vector<8x128xf32>
    %376 = arith.addf %375, %374 : vector<8x128xf32>
    %377 = arith.divf %375, %376 : vector<8x128xf32>
    %378 = vector.extract_strided_slice %336 {offsets = [0, 256], sizes = [8, 128], strides = [1, 1]} : vector<8x384xf32> to vector<8x128xf32>
    %379 = vector.extract_strided_slice %334 {offsets = [0, 256], sizes = [8, 128], strides = [1, 1]} : vector<8x384xf32> to vector<8x128xf32>
    %380 = arith.addf %379, %6 : vector<8x128xf32>
    %381 = arith.mulf %369, %380 : vector<8x128xf32>
    %382 = arith.addf %378, %381 : vector<8x128xf32>
    %383 = math.tanh %382 : vector<8x128xf32>
    %384 = arith.subf %332, %383 : vector<8x128xf32>
    %385 = arith.mulf %377, %384 : vector<8x128xf32>
    %386 = arith.addf %383, %385 : vector<8x128xf32>
    %cst_54 = arith.constant dense<0.000000e+00> : vector<8x384xf32>
    %387 = tpu.matmul %361, %3, %cst_54 {dimension_numbers = #tpu.dot_dimension_numbers<[1], [0], [0], [1], [0, 0, 1, 1], [], []>} : vector<8x128xf32>, vector<128x384xf32>, vector<8x384xf32> -> vector<8x384xf32>
    %cst_55 = arith.constant dense<0.000000e+00> : vector<8x384xf32>
    %388 = tpu.matmul %386, %4, %cst_55 {dimension_numbers = #tpu.dot_dimension_numbers<[1], [0], [0], [1], [0, 0, 1, 1], [], []>} : vector<8x128xf32>, vector<128x384xf32>, vector<8x384xf32> -> vector<8x384xf32>
    %389 = vector.extract_strided_slice %2 {offsets = [56, 0], sizes = [8, 384], strides = [1, 1]} : vector<64x768xf32> to vector<8x384xf32>
    %390 = vector.extract_strided_slice %2 {offsets = [0, 384], sizes = [8, 384], strides = [1, 1]} : vector<64x768xf32> to vector<8x384xf32>
    %391 = vector.extract_strided_slice %389 {offsets = [0, 0], sizes = [8, 128], strides = [1, 1]} : vector<8x384xf32> to vector<8x128xf32>
    %392 = vector.extract_strided_slice %387 {offsets = [0, 0], sizes = [8, 128], strides = [1, 1]} : vector<8x384xf32> to vector<8x128xf32>
    %393 = arith.addf %391, %392 : vector<8x128xf32>
    %394 = arith.negf %393 : vector<8x128xf32>
    %395 = math.exp %394 : vector<8x128xf32>
    %cst_56 = arith.constant 1.000000e+00 : f32
    %396 = vector.broadcast %cst_56 : f32 to vector<8x128xf32>
    %397 = arith.addf %396, %395 : vector<8x128xf32>
    %398 = arith.divf %396, %397 : vector<8x128xf32>
    %399 = vector.extract_strided_slice %389 {offsets = [0, 128], sizes = [8, 128], strides = [1, 1]} : vector<8x384xf32> to vector<8x128xf32>
    %400 = vector.extract_strided_slice %387 {offsets = [0, 128], sizes = [8, 128], strides = [1, 1]} : vector<8x384xf32> to vector<8x128xf32>
    %401 = arith.addf %399, %400 : vector<8x128xf32>
    %402 = arith.negf %401 : vector<8x128xf32>
    %403 = math.exp %402 : vector<8x128xf32>
    %cst_57 = arith.constant 1.000000e+00 : f32
    %404 = vector.broadcast %cst_57 : f32 to vector<8x128xf32>
    %405 = arith.addf %404, %403 : vector<8x128xf32>
    %406 = arith.divf %404, %405 : vector<8x128xf32>
    %407 = vector.extract_strided_slice %389 {offsets = [0, 256], sizes = [8, 128], strides = [1, 1]} : vector<8x384xf32> to vector<8x128xf32>
    %408 = vector.extract_strided_slice %387 {offsets = [0, 256], sizes = [8, 128], strides = [1, 1]} : vector<8x384xf32> to vector<8x128xf32>
    %409 = arith.addf %408, %5 : vector<8x128xf32>
    %410 = arith.mulf %398, %409 : vector<8x128xf32>
    %411 = arith.addf %407, %410 : vector<8x128xf32>
    %412 = math.tanh %411 : vector<8x128xf32>
    %413 = arith.subf %361, %412 : vector<8x128xf32>
    %414 = arith.mulf %406, %413 : vector<8x128xf32>
    %415 = arith.addf %412, %414 : vector<8x128xf32>
    %416 = vector.extract_strided_slice %390 {offsets = [0, 0], sizes = [8, 128], strides = [1, 1]} : vector<8x384xf32> to vector<8x128xf32>
    %417 = vector.extract_strided_slice %388 {offsets = [0, 0], sizes = [8, 128], strides = [1, 1]} : vector<8x384xf32> to vector<8x128xf32>
    %418 = arith.addf %416, %417 : vector<8x128xf32>
    %419 = arith.negf %418 : vector<8x128xf32>
    %420 = math.exp %419 : vector<8x128xf32>
    %cst_58 = arith.constant 1.000000e+00 : f32
    %421 = vector.broadcast %cst_58 : f32 to vector<8x128xf32>
    %422 = arith.addf %421, %420 : vector<8x128xf32>
    %423 = arith.divf %421, %422 : vector<8x128xf32>
    %424 = vector.extract_strided_slice %390 {offsets = [0, 128], sizes = [8, 128], strides = [1, 1]} : vector<8x384xf32> to vector<8x128xf32>
    %425 = vector.extract_strided_slice %388 {offsets = [0, 128], sizes = [8, 128], strides = [1, 1]} : vector<8x384xf32> to vector<8x128xf32>
    %426 = arith.addf %424, %425 : vector<8x128xf32>
    %427 = arith.negf %426 : vector<8x128xf32>
    %428 = math.exp %427 : vector<8x128xf32>
    %cst_59 = arith.constant 1.000000e+00 : f32
    %429 = vector.broadcast %cst_59 : f32 to vector<8x128xf32>
    %430 = arith.addf %429, %428 : vector<8x128xf32>
    %431 = arith.divf %429, %430 : vector<8x128xf32>
    %432 = vector.extract_strided_slice %390 {offsets = [0, 256], sizes = [8, 128], strides = [1, 1]} : vector<8x384xf32> to vector<8x128xf32>
    %433 = vector.extract_strided_slice %388 {offsets = [0, 256], sizes = [8, 128], strides = [1, 1]} : vector<8x384xf32> to vector<8x128xf32>
    %434 = arith.addf %433, %6 : vector<8x128xf32>
    %435 = arith.mulf %423, %434 : vector<8x128xf32>
    %436 = arith.addf %432, %435 : vector<8x128xf32>
    %437 = math.tanh %436 : vector<8x128xf32>
    %438 = arith.subf %386, %437 : vector<8x128xf32>
    %439 = arith.mulf %431, %438 : vector<8x128xf32>
    %440 = arith.addf %437, %439 : vector<8x128xf32>
    %c0_60 = arith.constant 0 : index
    %c0_61 = arith.constant 0 : index
    %441 = vector.load %arg8[%c0_60, %c0_61] : memref<16x128xf32, #tpu.memory_space<vmem>>, vector<8x128xf32>
    tpu.vector_store %arg8[%c0_60, %c0_61], %415 {strides = array<i32>} : memref<16x128xf32, #tpu.memory_space<vmem>>, vector<8x128xf32>,
    %c8 = arith.constant 8 : index
    %c0_62 = arith.constant 0 : index
    %442 = vector.load %arg8[%c8, %c0_62] : memref<16x128xf32, #tpu.memory_space<vmem>>, vector<8x128xf32>
    tpu.vector_store %arg8[%c8, %c0_62], %440 {strides = array<i32>} : memref<16x128xf32, #tpu.memory_space<vmem>>, vector<8x128xf32>,
    %443 = arith.addf %37, %440 : vector<8x128xf32>
    %444 = arith.addf %91, %386 : vector<8x128xf32>
    %445 = arith.addf %145, %332 : vector<8x128xf32>
    %446 = arith.addf %199, %278 : vector<8x128xf32>
    %447 = arith.addf %253, %224 : vector<8x128xf32>
    %448 = arith.addf %307, %170 : vector<8x128xf32>
    %449 = arith.addf %361, %116 : vector<8x128xf32>
    %450 = arith.addf %415, %62 : vector<8x128xf32>
    %451 = tpu.concatenate %443, %444, %445, %446, %447, %448, %449, %450 in 0 : vector<8x128xf32>, vector<8x128xf32>, vector<8x128xf32>, vector<8x128xf32>, vector<8x128xf32>, vector<8x128xf32>, vector<8x128xf32>, vector<8x128xf32> -> vector<64x128xf32>
    %cst_63 = arith.constant 1.250000e-01 : f32
    %452 = vector.broadcast %cst_63 : f32 to vector<64x128xf32>
    %453 = arith.mulf %451, %452 : vector<64x128xf32>
    %cst_64 = arith.constant dense<0.000000e+00> : vector<64x64xf32>
    %454 = tpu.matmul %453, %451, %cst_64 {dimension_numbers = #tpu.dot_dimension_numbers<[1], [1], [0], [0], [0, 0, 1, 0], [], []>} : vector<64x128xf32>, vector<64x128xf32>, vector<64x64xf32> -> vector<64x64xf32>
    %c0_65 = arith.constant 0 : index
    %c0_66 = arith.constant 0 : index
    %455 = vector.load %arg5[%c0_65, %c0_66] : memref<64x64xf32, #tpu.memory_space<vmem>>, vector<64x64xf32>
    %456 = arith.addf %454, %455 : vector<64x64xf32>
    %cst_67 = arith.constant dense<0xFF800000> : vector<64xf32>
    %457 = vector.multi_reduction <maximumf>, %456, %cst_67 [1] : vector<64x64xf32> to vector<64xf32>
    %458 = vector.shape_cast %457 : vector<64xf32> to vector<64x1xf32>
    %459 = vector.broadcast %458 : vector<64x1xf32> to vector<64x64xf32>
    %460 = arith.subf %456, %459 : vector<64x64xf32>
    %461 = math.exp %460 : vector<64x64xf32>
    %cst_68 = arith.constant dense<0.000000e+00> : vector<64xf32>
    %462 = vector.multi_reduction <add>, %461, %cst_68 [1] : vector<64x64xf32> to vector<64xf32>
    %463 = vector.shape_cast %462 : vector<64xf32> to vector<64x1xf32>
    %464 = tpu.reciprocal %463 {approx = true} : vector<64x1xf32> -> vector<64x1xf32>
    %465 = vector.broadcast %464 : vector<64x1xf32> to vector<64x64xf32>
    %466 = arith.mulf %461, %465 : vector<64x64xf32>
    %c0_69 = arith.constant 0 : index
    %c0_70 = arith.constant 0 : index
    %467 = vector.load %arg6[%c0_69, %c0_70] : memref<8x64xf32, #tpu.memory_space<vmem>>, vector<8x64xf32>
    %cst_71 = arith.constant dense<0.000000e+00> : vector<8x64xf32>
    %468 = tpu.matmul %467, %466, %cst_71 {dimension_numbers = #tpu.dot_dimension_numbers<[1], [0], [0], [1], [0, 0, 1, 1], [], []>} : vector<8x64xf32>, vector<64x64xf32>, vector<8x64xf32> -> vector<8x64xf32>
    %cst_72 = arith.constant dense<0.000000e+00> : vector<8x128xf32>
    %469 = tpu.matmul %468, %451, %cst_72 {dimension_numbers = #tpu.dot_dimension_numbers<[1], [0], [0], [1], [0, 0, 1, 1], [], []>} : vector<8x64xf32>, vector<64x128xf32>, vector<8x128xf32> -> vector<8x128xf32>
    %c0_73 = arith.constant 0 : index
    %c0_74 = arith.constant 0 : index
    %470 = vector.load %arg7[%c0_73, %c0_74] : memref<8x128xf32, #tpu.memory_space<vmem>>, vector<8x128xf32>
    tpu.vector_store %arg7[%c0_73, %c0_74], %469 {strides = array<i32>} : memref<8x128xf32, #tpu.memory_space<vmem>>, vector<8x128xf32>,
    return
  }
}

</mosaic_0001>

<bundles_post_ra>
// kernel: word_att_forward.1
= control target key start
LH: loop header
LB: loop body
LE: loop exit
PB: predicated region body
PF: predicated region fallthrough
CT: control target
= control target key end

     0   :  { %s5944_s1 = inlined_call_operand.vmem [shape: f32[128,768], index: 1, kind: input, shape index: {}]   ;;  %s5945_s0 = inlined_call_operand.vmem [shape: f32[64,128], index: 0, kind: input, shape index: {}]   ;;  %s5946_s2 = inlined_call_operand.vmem [shape: f32[128,384], index: 2, kind: input, shape index: {}]   ;;  %s5947_s3 = inlined_call_operand.vmem [shape: f32[128,384], index: 3, kind: input, shape index: {}]   ;;  %s5948_s4 = inlined_call_operand.vmem [shape: f32[8,256], index: 4, kind: input, shape index: {}]   ;;  %s5949_s8 = inlined_call_operand.vmem [shape: f32[16,128], index: 8, kind: output, shape index: {1}]   ;;  %s5950_s5 = inlined_call_operand.vmem [shape: f32[64,64], index: 5, kind: input, shape index: {}]   ;;  %s5951_s6 = inlined_call_operand.vmem [shape: f32[8,64], index: 6, kind: input, shape index: {}]   ;;  %s5952_s7 = inlined_call_operand.vmem [shape: f32[8,128], index: 7, kind: output, shape index: {0}]  }
   0x1   :  { %v126_v0 = vld [vmem:[%s5944_s1 + $0x2d0] sm:$0xff]  ;;  %v128_v1 = vld [vmem:[%s5944_s1 + $0x2e0] sm:$0xff]  ;;  %v127_v34 = vld [vmem:[%s5944_s1 + $0x2d8] sm:$0xff] }
   0x2   :  { %v120_v2 = vld [vmem:[%s5944_s1 + $0x2a0] sm:$0xff]  ;;  %132 = vmatpush.msra.mxu1 %v126_v0  ;;  %2434 = vmatpush.msra.mxu3 %v126_v0  ;;  %v122_v3 = vld [vmem:[%s5944_s1 + $0x2b0] sm:$0xff]  ;;  %v129_v35 = vld [vmem:[%s5944_s1 + $0x2e8] sm:$0xff] }
   0x3   :  { %214 = vmatpush.msra.mxu2 %v128_v1  ;;  %v114_v4 = vld [vmem:[%s5944_s1 + $0x270] sm:$0xff]  ;;  %v116_v5 = vld [vmem:[%s5944_s1 + $0x280] sm:$0xff]  ;;  %v121_v36 = vld [vmem:[%s5944_s1 + $0x2a8] sm:$0xff] }
   0x4   :  { %133 = vmatpush.msra.mxu1 %v120_v2  ;;  %2435 = vmatpush.msra.mxu3 %v120_v2  ;;  %v108_v6 = vld [vmem:[%s5944_s1 + $0x240] sm:$0xff]  ;;  %v110_v7 = vld [vmem:[%s5944_s1 + $0x250] sm:$0xff]  ;;  %v3004_v37 = vld [vmem:[%s5946_s2 + $0x168] sm:$0xff] }
   0x5   :  { %215 = vmatpush.msra.mxu2 %v122_v3  ;;  %v102_v8 = vld [vmem:[%s5944_s1 + $0x210] sm:$0xff]  ;;  %v104_v9 = vld [vmem:[%s5944_s1 + $0x220] sm:$0xff]  ;;  %v123_v38 = vld [vmem:[%s5944_s1 + $0x2b8] sm:$0xff] }
   0x6   :  { %134 = vmatpush.msra.mxu1 %v114_v4  ;;  %2436 = vmatpush.msra.mxu3 %v114_v4  ;;  %v96_v10 = vld [vmem:[%s5944_s1 + $0x1e0] sm:$0xff]  ;;  %v98_v11 = vld [vmem:[%s5944_s1 + $0x1f0] sm:$0xff]  ;;  %v115_v40 = vld [vmem:[%s5944_s1 + $0x278] sm:$0xff] }
   0x7   :  { %216 = vmatpush.msra.mxu2 %v116_v5  ;;  %v90_v12 = vld [vmem:[%s5944_s1 + $0x1b0] sm:$0xff]  ;;  %v92_v13 = vld [vmem:[%s5944_s1 + $0x1c0] sm:$0xff]  ;;  %v117_v42 = vld [vmem:[%s5944_s1 + $0x288] sm:$0xff] }
   0x8   :  { %135 = vmatpush.msra.mxu1 %v108_v6  ;;  %2437 = vmatpush.msra.mxu3 %v108_v6  ;;  %v84_v14 = vld [vmem:[%s5944_s1 + $0x180] sm:$0xff]  ;;  %v86_v15 = vld [vmem:[%s5944_s1 + $0x190] sm:$0xff]  ;;  %v109_v44 = vld [vmem:[%s5944_s1 + $0x248] sm:$0xff] }
   0x9   :  { %217 = vmatpush.msra.mxu2 %v110_v7  ;;  %v78_v16 = vld [vmem:[%s5944_s1 + $0x150] sm:$0xff]  ;;  %v80_v17 = vld [vmem:[%s5944_s1 + $0x160] sm:$0xff]  ;;  %v3035_v45 = vld [vmem:[%s5946_s2 + $0x138] sm:$0xff] }
   0xa   :  { %136 = vmatpush.msra.mxu1 %v102_v8  ;;  %2438 = vmatpush.msra.mxu3 %v102_v8  ;;  %v72_v18 = vld [vmem:[%s5944_s1 + $0x120] sm:$0xff]  ;;  %v74_v19 = vld [vmem:[%s5944_s1 + $0x130] sm:$0xff]  ;;  %v111_v46 = vld [vmem:[%s5944_s1 + $0x258] sm:$0xff] }
   0xb   :  { %218 = vmatpush.msra.mxu2 %v104_v9  ;;  %v66_v20 = vld [vmem:[%s5944_s1 + $0xf0] sm:$0xff]  ;;  %v68_v21 = vld [vmem:[%s5944_s1 + $0x100] sm:$0xff]  ;;  %v3043_v47 = vld [vmem:[%s5945_s0 + $0x8] sm:$0xff] }
   0xc   :  { %137 = vmatpush.msra.mxu1 %v96_v10  ;;  %2439 = vmatpush.msra.mxu3 %v96_v10  ;;  %v60_v22 = vld [vmem:[%s5944_s1 + $0xc0] sm:$0xff]  ;;  %v62_v23 = vld [vmem:[%s5944_s1 + $0xd0] sm:$0xff]  ;;  %v3049_v48 = vld [vmem:[%s5945_s0 + $0x28] sm:$0xff] }
   0xd   :  { %219 = vmatpush.msra.mxu2 %v98_v11  ;;  %v54_v24 = vld [vmem:[%s5944_s1 + $0x90] sm:$0xff]  ;;  %v56_v25 = vld [vmem:[%s5944_s1 + $0xa0] sm:$0xff]  ;;  %v103_v49 = vld [vmem:[%s5944_s1 + $0x218] sm:$0xff] }
   0xe   :  { %138 = vmatpush.msra.mxu1 %v90_v12  ;;  %2440 = vmatpush.msra.mxu3 %v90_v12  ;;  %v48_v26 = vld [vmem:[%s5944_s1 + $0x60] sm:$0xff]  ;;  %v50_v27 = vld [vmem:[%s5944_s1 + $0x70] sm:$0xff]  ;;  %v105_v50 = vld [vmem:[%s5944_s1 + $0x228] sm:$0xff] }
   0xf   :  { %220 = vmatpush.msra.mxu2 %v92_v13  ;;  %v42_v28 = vld [vmem:[%s5944_s1 + $0x30] sm:$0xff]  ;;  %v44_v29 = vld [vmem:[%s5944_s1 + $0x40] sm:$0xff]  ;;  %v97_v51 = vld [vmem:[%s5944_s1 + $0x1e8] sm:$0xff] }
  0x10   :  { %139 = vmatpush.msra.mxu1 %v84_v14  ;;  %2441 = vmatpush.msra.mxu3 %v84_v14  ;;  %v36_v30 = vld [vmem:[%s5944_s1] sm:$0xff]  ;;  %v38_v31 = vld [vmem:[%s5944_s1 + $0x10] sm:$0xff]  ;;  %v99_v53 = vld [vmem:[%s5944_s1 + $0x1f8] sm:$0xff] }
  0x11   :  { %221 = vmatpush.msra.mxu2 %v86_v15  ;;  %v2984_v32 = vld [vmem:[%s5945_s0] sm:$0xff]  ;;  %v130_v39 = vld [vmem:[%s5944_s1 + $0x2f0] sm:$0xff]  ;;  %v91_v55 = vld [vmem:[%s5944_s1 + $0x1b8] sm:$0xff] }
  0x12   :  { %140 = vmatpush.msra.mxu1 %v78_v16  ;;  %2442 = vmatpush.msra.mxu3 %v78_v16  ;;  %v2989_v33 = vld [vmem:[%s5945_s0 + $0x20] sm:$0xff]  ;;  %v3020_v41 = vld [vmem:[%s5946_s2 + $0x150] sm:$0xff]  ;;  %v93_v57 = vld [vmem:[%s5944_s1 + $0x1c8] sm:$0xff] }
  0x13   :  { %222 = vmatpush.msra.mxu2 %v80_v17  ;;  %v124_v43 = vld [vmem:[%s5944_s1 + $0x2c0] sm:$0xff]  ;;  %296 = vmatpush.msra.mxu0 %v130_v39  ;;  %v118_v52 = vld [vmem:[%s5944_s1 + $0x290] sm:$0xff]  ;;  %v3087_v58 = vld [vmem:[%s5946_s2 + $0x108] sm:$0xff] }
  0x14   :  { %141 = vmatpush.msra.mxu1 %v72_v18  ;;  %2443 = vmatpush.msra.mxu3 %v72_v18  ;;  %v3072_v54 = vld [vmem:[%s5946_s2 + $0x120] sm:$0xff]  ;;  %v85_v59 = vld [vmem:[%s5944_s1 + $0x188] sm:$0xff]  ;;  %v106_v60 = vld [vmem:[%s5944_s1 + $0x230] sm:$0xff] }
  0x15   :  { %223 = vmatpush.msra.mxu2 %v74_v19  ;;  %297 = vmatpush.msra.mxu0 %v124_v43  ;;  %v112_v56 = vld [vmem:[%s5944_s1 + $0x260] sm:$0xff]  ;;  %v87_v61 = vld [vmem:[%s5944_s1 + $0x198] sm:$0xff]  ;;  %v3102_v62 = vld [vmem:[%s5945_s0 + $0x10] sm:$0xff] }
  0x16   :  { %142 = vmatpush.msra.mxu1 %v66_v20  ;;  %2444 = vmatpush.msra.mxu3 %v66_v20  ;;  %v3107_v63 = vld [vmem:[%s5945_s0 + $0x30] sm:$0xff]  ;;  %v79_v0 = vld [vmem:[%s5944_s1 + $0x158] sm:$0xff]  ;;  %v81_v1 = vld [vmem:[%s5944_s1 + $0x168] sm:$0xff] }
  0x17   :  { %224 = vmatpush.msra.mxu2 %v68_v21  ;;  %298 = vmatpush.msra.mxu0 %v118_v52  ;;  %v73_v2 = vld [vmem:[%s5944_s1 + $0x128] sm:$0xff]  ;;  %v100_v3 = vld [vmem:[%s5944_s1 + $0x200] sm:$0xff]  ;;  %v75_v4 = vld [vmem:[%s5944_s1 + $0x138] sm:$0xff] }
  0x18   :  { %143 = vmatpush.msra.mxu1 %v60_v22  ;;  %2445 = vmatpush.msra.mxu3 %v60_v22  ;;  %v3130_v5 = vld [vmem:[%s5946_s2 + $0xf0] sm:$0xff]  ;;  %v67_v6 = vld [vmem:[%s5944_s1 + $0xf8] sm:$0xff]  ;;  %v69_v8 = vld [vmem:[%s5944_s1 + $0x108] sm:$0xff] }
  0x19   :  { %225 = vmatpush.msra.mxu2 %v62_v23  ;;  %299 = vmatpush.msra.mxu0 %v112_v56  ;;  %v94_v7 = vld [vmem:[%s5944_s1 + $0x1d0] sm:$0xff]  ;;  %v3145_v9 = vld [vmem:[%s5946_s2 + $0xd8] sm:$0xff]  ;;  %v61_v10 = vld [vmem:[%s5944_s1 + $0xc8] sm:$0xff] }
  0x1a   :  { %144 = vmatpush.msra.mxu1 %v54_v24  ;;  %2446 = vmatpush.msra.mxu3 %v54_v24  ;;  %v88_v11 = vld [vmem:[%s5944_s1 + $0x1a0] sm:$0xff]  ;;  %v63_v12 = vld [vmem:[%s5944_s1 + $0xd8] sm:$0xff]  ;;  %v57_v16 = vld [vmem:[%s5944_s1 + $0xa8] sm:$0xff] }
  0x1b   :  { %226 = vmatpush.msra.mxu2 %v56_v25  ;;  %300 = vmatpush.msra.mxu0 %v106_v60  ;;  %v3160_v13 = vld [vmem:[%s5945_s0 + $0x18] sm:$0xff]  ;;  %v49_v17 = vld [vmem:[%s5944_s1 + $0x68] sm:$0xff]  ;;  %v3181_v18 = vld [vmem:[%s5946_s2 + $0xc0] sm:$0xff] }
  0x1c   :  { %145 = vmatpush.msra.mxu1 %v48_v26  ;;  %2447 = vmatpush.msra.mxu3 %v48_v26  ;;  %v3165_v14 = vld [vmem:[%s5945_s0 + $0x38] sm:$0xff]  ;;  %v82_v20 = vld [vmem:[%s5944_s1 + $0x170] sm:$0xff]  ;;  %v3197_v22 = vld [vmem:[%s5946_s2 + $0xa8] sm:$0xff] }
  0x1d   :  { %227 = vmatpush.msra.mxu2 %v50_v27  ;;  %301 = vmatpush.msra.mxu0 %v100_v3  ;;  %v55_v15 = vld [vmem:[%s5944_s1 + $0x98] sm:$0xff]  ;;  %v45_v23 = vld [vmem:[%s5944_s1 + $0x48] sm:$0xff]  ;;  %v76_v24 = vld [vmem:[%s5944_s1 + $0x140] sm:$0xff] }
  0x1e   :  { %146 = vmatpush.msra.mxu1 %v42_v28  ;;  %2448 = vmatpush.msra.mxu3 %v42_v28  ;;  %v51_v19 = vld [vmem:[%s5944_s1 + $0x78] sm:$0xff]  ;;  %v37_v25 = vld [vmem:[%s5944_s1 + $0x8] sm:$0xff]  ;;  %v3212_v26 = vld [vmem:[%s5946_s2 + $0x90] sm:$0xff] }
  0x1f   :  { %228 = vmatpush.msra.mxu2 %v44_v29  ;;  %302 = vmatpush.msra.mxu0 %v94_v7  ;;  %v43_v21 = vld [vmem:[%s5944_s1 + $0x38] sm:$0xff]  ;;  %v3224_v29 = vld [vmem:[%s5946_s2 + $0x170] sm:$0xff]  ;;  %v3256_v39 = vld [vmem:[%s5946_s2 + $0x140] sm:$0xff] }
  0x20   :  { %147 = vmatpush.msra.mxu1 %v36_v30  ;;  %2449 = vmatpush.msra.mxu3 %v36_v30  ;;  %v39_v27 = vld [vmem:[%s5944_s1 + $0x18] sm:$0xff]  ;;  %6183 = vst [vmem:[#allocation2_spill] sm:$0xff] %v3224_v29  ;;  %v125_v30 = vld [vmem:[%s5944_s1 + $0x2c8] sm:$0xff]  ;;  %v58_v43 = vld [vmem:[%s5944_s1 + $0xb0] sm:$0xff] }
  0x21   :  { %229 = vmatpush.msra.mxu2 %v38_v31  ;;  %148 = vmatmul.f32.vlgmr.msra.gmra.mxu1 %v2984_v32  ;;  %v131_v28 = vld [vmem:[%s5944_s1 + $0x2f8] sm:$0xff]  ;;  %v70_v31 = vld [vmem:[%s5944_s1 + $0x110] sm:$0xff]  ;;  %v3354_v3 = vld [vmem:[%s5946_s2] sm:$0xff] }
  0x22   :  { %160 = vmatmul.f32.vlgmr.msra.gmra.mxu3 %v2989_v33  ;;  %173 = vmatpush.msrb.mxu1 %v127_v34  ;;  %v3238_v34 = vld [vmem:[%s5946_s2 + $0x158] sm:$0xff]  ;;  %v3313_v56 = vld [vmem:[%s5946_s2 + $0x30] sm:$0xff] }
  0x23   :  { %230 = vmatmul.f32.vlgmr.msra.gmra.mxu2 %v2984_v32  ;;  %255 = vmatpush.msrb.mxu3 %v129_v35  ;;  %6184 = vst [vmem:[#allocation3_spill] sm:$0xff] %v3238_v34  ;;  %v3243_v35 = vld [vmem:[%s5946_s2 + $0x78] sm:$0xff] }
  0x24   :  { %174 = vmatpush.msrb.mxu1 %v121_v36  ;;  %476 = vmatpush.msrb.mxu2 %v3004_v37  ;;  %v119_v36 = vld [vmem:[%s5944_s1 + $0x298] sm:$0xff] }
  0x25   :  { %256 = vmatpush.msrb.mxu3 %v123_v38  ;;  %303 = vmatpush.msra.mxu0 %v88_v11  ;;  %v64_v38 = vld [vmem:[%s5944_s1 + $0xe0] sm:$0xff]  ;;  %v3300_v52 = vld [vmem:[%s5946_s2 + $0xf8] sm:$0xff] }
  0x26   :  { %175 = vmatpush.msrb.mxu1 %v115_v40  ;;  %477 = vmatpush.msrb.mxu2 %v3020_v41  ;;  %v3261_v40 = vld [vmem:[%s5946_s2 + $0x60] sm:$0xff]  ;;  %v3328_v60 = vld [vmem:[%s5946_s2 + $0x18] sm:$0xff] }
  0x27   :  { %257 = vmatpush.msrb.mxu3 %v117_v42  ;;  %304 = vmatpush.msra.mxu0 %v82_v20  ;;  %v113_v42 = vld [vmem:[%s5944_s1 + $0x268] sm:$0xff]  ;;  %v83_v7 = vld [vmem:[%s5944_s1 + $0x178] sm:$0xff]  ;;  %v3387_v11 = vld [vmem:[%s5946_s2 + $0x160] sm:$0xff] }
  0x28   :  { %176 = vmatpush.msrb.mxu1 %v109_v44  ;;  %478 = vmatpush.msrb.mxu2 %v3035_v45  ;;  %v3274_v44 = vld [vmem:[%s5946_s2 + $0x128] sm:$0xff]  ;;  %6186 = vst [vmem:[#allocation5_spill] sm:$0xff] %v3387_v11  ;;  %v3423_v20 = vld [vmem:[%s5946_s2 + $0x130] sm:$0xff] }
  0x29   :  { %258 = vmatpush.msrb.mxu3 %v111_v46  ;;  %151 = vmatmul.f32.gmra.mxu1 %v3043_v47  ;;  %v107_v46 = vld [vmem:[%s5944_s1 + $0x238] sm:$0xff]  ;;  %6189 = vst [vmem:[#allocation8_spill] sm:$0xff] %v3423_v20 }
  0x2a   :  { %163 = vmatmul.f32.gmra.mxu3 %v3049_v48  ;;  %177 = vmatpush.msrb.mxu1 %v103_v49  ;;  %v3284_v49 = vld [vmem:[%s5946_s2 + $0x110] sm:$0xff] }
  0x2b   :  { %233 = vmatmul.f32.gmra.mxu2 %v3043_v47  ;;  %259 = vmatpush.msrb.mxu3 %v105_v50  ;;  %v101_v50 = vld [vmem:[%s5944_s1 + $0x208] sm:$0xff] }
  0x2c   :  { %178 = vmatpush.msrb.mxu1 %v97_v51  ;;  %479 = vmatpush.msrb.mxu2 %v3072_v54  ;;  %v3294_v51 = vld [vmem:[%s5946_s2 + $0x48] sm:$0xff] }
  0x2d   :  { %260 = vmatpush.msrb.mxu3 %v99_v53  ;;  %305 = vmatpush.msra.mxu0 %v76_v24  ;;  %v52_v53 = vld [vmem:[%s5944_s1 + $0x80] sm:$0xff]  ;;  %v3440_v24 = vld [vmem:[%s5946_s2 + $0x118] sm:$0xff] }
  0x2e   :  { %179 = vmatpush.msrb.mxu1 %v91_v55  ;;  %480 = vmatpush.msrb.mxu2 %v3087_v58  ;;  %v95_v55 = vld [vmem:[%s5944_s1 + $0x1d8] sm:$0xff]  ;;  %6190 = vst [vmem:[#allocation9_spill] sm:$0xff] %v3440_v24 }
  0x2f   :  { %261 = vmatpush.msrb.mxu3 %v93_v57  ;;  %306 = vmatpush.msra.mxu0 %v70_v31  ;;  %v3319_v57 = vld [vmem:[%s5946_s2 + $0xe0] sm:$0xff]  ;;  %v3466_v31 = vld [vmem:[%s5947_s3 + $0x128] sm:$0xff] }
  0x30   :  { %180 = vmatpush.msrb.mxu1 %v85_v59  ;;  %481 = vmatpush.msrb.mxu2 %v3130_v5  ;;  %v46_v59 = vld [vmem:[%s5944_s1 + $0x50] sm:$0xff]  ;;  %6193 = vst [vmem:[#allocation12_spill] sm:$0xff] %v3466_v31 }
  0x31   :  { %262 = vmatpush.msrb.mxu3 %v87_v61  ;;  %154 = vmatmul.f32.gmra.mxu1 %v3102_v62  ;;  %v89_v61 = vld [vmem:[%s5944_s1 + $0x1a8] sm:$0xff] }
  0x32   :  { %166 = vmatmul.f32.gmra.mxu3 %v3107_v63  ;;  %181 = vmatpush.msrb.mxu1 %v79_v0  ;;  %v3337_v0 = vld [vmem:[%s5946_s2 + $0xc8] sm:$0xff] }
  0x33   :  { %236 = vmatmul.f32.gmra.mxu2 %v3102_v62  ;;  %263 = vmatpush.msrb.mxu3 %v81_v1  ;;  %v40_v1 = vld [vmem:[%s5944_s1 + $0x20] sm:$0xff] }
  0x34   :  { %182 = vmatpush.msrb.mxu1 %v73_v2  ;;  %482 = vmatpush.msrb.mxu2 %v3145_v9  ;;  %v3347_v2 = vld [vmem:[%s5946_s2 + $0xb0] sm:$0xff] }
  0x35   :  { %264 = vmatpush.msrb.mxu3 %v75_v4  ;;  %307 = vmatpush.msra.mxu0 %v64_v38  ;;  %v3360_v4 = vld [vmem:[%s5946_s2 + $0x98] sm:$0xff]  ;;  %v3479_v38 = vld [vmem:[%s5946_s2 + $0xe8] sm:$0xff] }
  0x36   :  { %183 = vmatpush.msrb.mxu1 %v67_v6  ;;  %483 = vmatpush.msrb.mxu2 %v3181_v18  ;;  %v3365_v6 = vld [vmem:[%s5946_s2 + $0x178] sm:$0xff]  ;;  %6194 = vst [vmem:[#allocation13_spill] sm:$0xff] %v3479_v38 }
  0x37   :  { %265 = vmatpush.msrb.mxu3 %v69_v8  ;;  %308 = vmatpush.msra.mxu0 %v58_v43  ;;  %v3375_v8 = vld [vmem:[%s5947_s3 + $0x170] sm:$0xff] }
  0x38   :  { %184 = vmatpush.msrb.mxu1 %v61_v10  ;;  %484 = vmatpush.msrb.mxu2 %v3197_v22  ;;  %6185 = vst [vmem:[#allocation4_spill] sm:$0xff] %v3375_v8  ;;  %v3382_v10 = vld [vmem:[%s5946_s2 + $0x80] sm:$0xff]  ;;  %v3493_v43 = vld [vmem:[%s5946_s2 + $0xd0] sm:$0xff] }
  0x39   :  { %266 = vmatpush.msrb.mxu3 %v63_v12  ;;  %157 = vmatmul.f32.gmra.mxu1 %v3160_v13  ;;  %v77_v12 = vld [vmem:[%s5944_s1 + $0x148] sm:$0xff]  ;;  %6195 = vst [vmem:[#allocation14_spill] sm:$0xff] %v3493_v43 }
  0x3a   :  { %169 = vmatmul.f32.gmra.mxu3 %v3165_v14  ;;  %185 = vmatpush.msrb.mxu1 %v55_v15  ;;  %v3397_v15 = vld [vmem:[%s5947_s3 + $0x158] sm:$0xff] }
  0x3b   :  { %239 = vmatmul.f32.gmra.mxu2 %v3160_v13  ;;  %267 = vmatpush.msrb.mxu3 %v57_v16  ;;  %6187 = vst [vmem:[#allocation6_spill] sm:$0xff] %v3397_v15  ;;  %v3402_v16 = vld [vmem:[%s5946_s2 + $0x68] sm:$0xff] }
  0x3c   :  { %186 = vmatpush.msrb.mxu1 %v49_v17  ;;  %485 = vmatpush.msrb.mxu2 %v3212_v26  ;;  %v3410_v17 = vld [vmem:[%s5946_s2 + $0x148] sm:$0xff] }
  0x3d   :  { %268 = vmatpush.msrb.mxu3 %v51_v19  ;;  %309 = vmatpush.msra.mxu0 %v52_v53  ;;  %6188 = vst [vmem:[#allocation7_spill] sm:$0xff] %v3410_v17  ;;  %v3415_v19 = vld [vmem:[%s5946_s2 + $0x50] sm:$0xff]  ;;  %v5953_v53 = vmov 0.0  }
  0x3e   :  { %187 = vmatpush.msrb.mxu1 %v43_v21  ;;  %486 = vmatpush.msrb.mxu2 %v3243_v35  ;;  %v3430_v21 = vld [vmem:[%s5946_s2 + $0x38] sm:$0xff] }
  0x3f   :  { %269 = vmatpush.msrb.mxu3 %v45_v23  ;;  %310 = vmatpush.msra.mxu0 %v46_v59  ;;  %v71_v23 = vld [vmem:[%s5944_s1 + $0x118] sm:$0xff]  ;;  %v3515_v59 = vld [vmem:[%s5947_s3 + $0x110] sm:$0xff] }
  0x40   :  { %188 = vmatpush.msrb.mxu1 %v37_v25  ;;  %487 = vmatpush.msrb.mxu2 %v3261_v40  ;;  %v3445_v25 = vld [vmem:[%s5947_s3 + $0x140] sm:$0xff]  ;;  %6198 = vst [vmem:[#allocation17_spill] sm:$0xff] %v3515_v59 }
  0x41   :  { %270 = vmatpush.msrb.mxu3 %v39_v27  ;;  %189 = vmatmul.f32.vlgmr.msrb.gmra.mxu1 %v2984_v32  ;;  %6191 = vst [vmem:[#allocation10_spill] sm:$0xff] %v3445_v25  ;;  %v3452_v27 = vld [vmem:[%s5946_s2 + $0x20] sm:$0xff] }
  0x42   :  { %271 = vmatmul.f32.vlgmr.msrb.gmra.mxu3 %v2984_v32  ;;  %337 = vmatpush.msra.mxu1 %v131_v28  ;;  %v65_v28 = vld [vmem:[%s5944_s1 + $0xe8] sm:$0xff] }
  0x43   :  { %242 = vmatmul.f32.gmra.mxu2 %v2989_v33  ;;  %496 = vmatpush.msra.mxu3 %v3224_v29 }
  0x44   :  { %338 = vmatpush.msra.mxu1 %v125_v30  ;;  %488 = vmatpush.msrb.mxu2 %v3294_v51  ;;  %v3461_v30 = vld [vmem:[%s5946_s2 + $0x100] sm:$0xff] }
  0x45   :  { %497 = vmatpush.msra.mxu3 %v3238_v34  ;;  %311 = vmatpush.msra.mxu0 %v40_v1  ;;  %6192 = vst [vmem:[#allocation11_spill] sm:$0xff] %v3461_v30  ;;  %v53_v1 = vld [vmem:[%s5944_s1 + $0x88] sm:$0xff] }
  0x46   :  { %339 = vmatpush.msra.mxu1 %v119_v36  ;;  %489 = vmatpush.msrb.mxu2 %v3313_v56  ;;  %v3472_v36 = vld [vmem:[%s5946_s2 + $0x8] sm:$0xff] }
  0x47   :  { %498 = vmatpush.msra.mxu3 %v3256_v39  ;;  %312 = vmatmul.f32.vlgmr.msra.gmra.mxu0 %v2984_v32 }
  0x48   :  { %340 = vmatpush.msra.mxu1 %v113_v42  ;;  %490 = vmatpush.msrb.mxu2 %v3328_v60  ;;  %v3485_v42 = vld [vmem:[%s5947_s3 + $0x168] sm:$0xff] }
  0x49   :  { %192 = vmatmul.f32.gmra.mxu1 %v3043_v47  ;;  %499 = vmatpush.msra.mxu3 %v3274_v44 }
  0x4a   :  { %274 = vmatmul.f32.gmra.mxu3 %v3043_v47  ;;  %341 = vmatpush.msra.mxu1 %v107_v46  ;;  %v3500_v46 = vld [vmem:[%s5947_s3 + $0x150] sm:$0xff] }
  0x4b   :  { %245 = vmatmul.f32.gmra.mxu2 %v3049_v48  ;;  %500 = vmatpush.msra.mxu3 %v3284_v49  ;;  %6196 = vst [vmem:[#allocation15_spill] sm:$0xff] %v3500_v46 }
  0x4c   :  { %342 = vmatpush.msra.mxu1 %v101_v50  ;;  %491 = vmatpush.msrb.mxu2 %v3354_v3  ;;  %v59_v50 = vld [vmem:[%s5944_s1 + $0xb8] sm:$0xff] }
  0x4d   :  { %501 = vmatpush.msra.mxu3 %v3300_v52  ;;  %556 = vmatpush.msrb.mxu0 %v3375_v8 }
  0x4e   :  { %343 = vmatpush.msra.mxu1 %v95_v55  ;;  %516 = vmatpush.msra.mxu2 %v3365_v6  ;;  %v3510_v55 = vld [vmem:[%s5946_s2 + $0xb8] sm:$0xff] }
  0x4f   :  { %502 = vmatpush.msra.mxu3 %v3319_v57  ;;  %557 = vmatpush.msrb.mxu0 %v3397_v15  ;;  %6197 = vst [vmem:[#allocation16_spill] sm:$0xff] %v3510_v55  ;;  %v3616_v15 = vld [vmem:[%s5947_s3 + $0xc0] sm:$0xff] }
  0x50   :  { %344 = vmatpush.msra.mxu1 %v89_v61  ;;  %517 = vmatpush.msra.mxu2 %v3387_v11  ;;  %v3522_v61 = vld [vmem:[%s5947_s3 + $0x138] sm:$0xff]  ;;  %6213 = vst [vmem:[#allocation32_spill] sm:$0xff] %v3616_v15 }
  0x51   :  { %195 = vmatmul.f32.gmra.mxu1 %v3102_v62  ;;  %503 = vmatpush.msra.mxu3 %v3337_v0  ;;  %6199 = vst [vmem:[#allocation18_spill] sm:$0xff] %v3522_v61 }
  0x52   :  { %277 = vmatmul.f32.gmra.mxu3 %v3102_v62  ;;  %345 = vmatpush.msra.mxu1 %v83_v7  ;;  %v3531_v7 = vld [vmem:[%s5946_s2 + $0xa0] sm:$0xff] }
  0x53   :  { %248 = vmatmul.f32.gmra.mxu2 %v3107_v63  ;;  %504 = vmatpush.msra.mxu3 %v3347_v2  ;;  %6200 = vst [vmem:[#allocation19_spill] sm:$0xff] %v3531_v7 }
  0x54   :  { %346 = vmatpush.msra.mxu1 %v77_v12  ;;  %518 = vmatpush.msra.mxu2 %v3410_v17  ;;  %v3536_v12 = vld [vmem:[%s5947_s3 + $0xf8] sm:$0xff] }
  0x55   :  { %505 = vmatpush.msra.mxu3 %v3360_v4  ;;  %315 = vmatmul.f32.gmra.mxu0 %v3043_v47  ;;  %6201 = vst [vmem:[#allocation20_spill] sm:$0xff] %v3536_v12 }
  0x56   :  { %519 = vmatpush.msra.mxu2 %v3423_v20  ;;  %347 = vmatpush.msra.mxu1 %v71_v23  ;;  %v3542_v23 = vld [vmem:[%s5947_s3 + $0x120] sm:$0xff] }
  0x57   :  { %506 = vmatpush.msra.mxu3 %v3382_v10  ;;  %558 = vmatpush.msrb.mxu0 %v3445_v25  ;;  %6202 = vst [vmem:[#allocation21_spill] sm:$0xff] %v3542_v23  ;;  %v3594_v25 = vld [vmem:[%s5947_s3 + $0xd8] sm:$0xff] }
  0x58   :  { %520 = vmatpush.msra.mxu2 %v3440_v24  ;;  %348 = vmatpush.msra.mxu1 %v65_v28  ;;  %v3549_v28 = vld [vmem:[%s5946_s2 + $0x88] sm:$0xff]  ;;  %6209 = vst [vmem:[#allocation28_spill] sm:$0xff] %v3594_v25 }
  0x59   :  { %198 = vmatmul.f32.gmra.mxu1 %v3160_v13  ;;  %507 = vmatpush.msra.mxu3 %v3402_v16  ;;  %6203 = vst [vmem:[#allocation22_spill] sm:$0xff] %v3549_v28 }
  0x5a   :  { %280 = vmatmul.f32.gmra.mxu3 %v3160_v13  ;;  %521 = vmatpush.msra.mxu2 %v3461_v30 }
  0x5b   :  { %251 = vmatmul.f32.gmra.mxu2 %v3165_v14  ;;  %508 = vmatpush.msra.mxu3 %v3415_v19 }
  0x5c   :  { %559 = vmatpush.msrb.mxu0 %v3466_v31  ;;  %522 = vmatpush.msra.mxu2 %v3479_v38  ;;  %v3582_v31 = vld [vmem:[%s5946_s2 + $0x58] sm:$0xff] }
  0x5d   :  { %509 = vmatpush.msra.mxu3 %v3430_v21  ;;  %318 = vmatmul.f32.gmra.mxu0 %v3102_v62  ;;  %6207 = vst [vmem:[#allocation26_spill] sm:$0xff] %v3582_v31 }
  0x5e   :  { %523 = vmatpush.msra.mxu2 %v3493_v43  ;;  %349 = vmatpush.msra.mxu1 %v59_v50  ;;  %v3555_v50 = vld [vmem:[%s5947_s3 + $0x108] sm:$0xff] }
  0x5f   :  { %510 = vmatpush.msra.mxu3 %v3452_v27  ;;  %560 = vmatpush.msrb.mxu0 %v3515_v59  ;;  %6204 = vst [vmem:[#allocation23_spill] sm:$0xff] %v3555_v50  ;;  %v3573_v59 = vld [vmem:[%s5947_s3 + $0xf0] sm:$0xff] }
  0x60   :  { %524 = vmatpush.msra.mxu2 %v3510_v55  ;;  %350 = vmatpush.msra.mxu1 %v53_v1  ;;  %v3566_v1 = vld [vmem:[%s5946_s2 + $0x70] sm:$0xff]  ;;  %6206 = vst [vmem:[#allocation25_spill] sm:$0xff] %v3573_v59 }
  0x61   :  { %201 = vmatmul.f32.gmra.mxu1 %v2989_v33  ;;  %511 = vmatpush.msra.mxu3 %v3472_v36  ;;  %6205 = vst [vmem:[#allocation24_spill] sm:$0xff] %v3566_v1 }
  0x62   :  { %283 = vmatmul.f32.gmra.mxu3 %v2989_v33  ;;  %525 = vmatpush.msra.mxu2 %v3531_v7 }
  0x63   :  { %492 = vmatmul.f32.vlgmr.msrb.gmra.mxu2 %v5953_v53  ;;  %536 = vmatpush.msrb.mxu3 %v3485_v42  ;;  %v47_v53 = vld [vmem:[%s5944_s1 + $0x58] sm:$0xff] }
  0x64   :  { %561 = vmatpush.msrb.mxu0 %v3536_v12  ;;  %526 = vmatpush.msra.mxu2 %v3549_v28  ;;  %v41_v12 = vld [vmem:[%s5944_s1 + $0x28] sm:$0xff] }
  0x65   :  { %537 = vmatpush.msrb.mxu3 %v3500_v46  ;;  %351 = vmatpush.msra.mxu1 %v47_v53  ;;  %v3605_v53 = vld [vmem:[%s5946_s2 + $0x40] sm:$0xff]  ;;  %v3700_v46 = vld [vmem:[%s5947_s3 + $0x48] sm:$0xff] }
  0x66   :  { %527 = vmatpush.msra.mxu2 %v3566_v1  ;;  %321 = vmatmul.f32.gmra.mxu0 %v3160_v13  ;;  %6211 = vst [vmem:[#allocation30_spill] sm:$0xff] %v3605_v53 }
  0x67   :  { %538 = vmatpush.msrb.mxu3 %v3522_v61  ;;  %352 = vmatpush.msra.mxu1 %v41_v12  ;;  %v3610_v61 = vld [vmem:[%s5947_s3 + $0x160] sm:$0xff]  ;;  %v3623_v12 = vld [vmem:[%s5946_s2 + $0x28] sm:$0xff]  ;;  %6227 = vst [vmem:[#allocation45_spill] sm:$0xff] %v3700_v46 }
  0x68   :  { %6212 = vst [vmem:[#allocation31_spill] sm:$0xff] %v3610_v61  ;;  %528 = vmatpush.msra.mxu2 %v3582_v31 }
  0x69   :  { %204 = vmatmul.f32.gmra.mxu1 %v3049_v48  ;;  %539 = vmatpush.msrb.mxu3 %v3542_v23  ;;  %v3587_v23 = vld [vmem:[%s5947_s3 + $0x178] sm:$0xff]  ;;  %6214 = vst [vmem:[#allocation33_spill] sm:$0xff] %v3623_v12 }
  0x6a   :  { %286 = vmatmul.f32.gmra.mxu3 %v3049_v48  ;;  %6208 = vst [vmem:[#allocation27_spill] sm:$0xff] %v3587_v23  ;;  %576 = vmatpush.msrb.mxu1 %v3587_v23  ;;  %v3662_v23 = vld [vmem:[%s5947_s3 + $0x130] sm:$0xff] }
  0x6b   :  { %540 = vmatpush.msrb.mxu3 %v3555_v50  ;;  %v3599_v50 = vld [vmem:[%s5947_s3 + $0xe0] sm:$0xff]  ;;  %529 = vmatpush.msra.mxu2 %v3605_v53  ;;  %6220 = vst [vmem:[#allocation39_spill] sm:$0xff] %v3662_v23 }
  0x6c   :  { %6210 = vst [vmem:[#allocation29_spill] sm:$0xff] %v3599_v50  ;;  %562 = vmatpush.msrb.mxu0 %v3599_v50  ;;  %577 = vmatpush.msrb.mxu1 %v3610_v61  ;;  %v3643_v50 = vld [vmem:[%s5946_s2 + $0x10] sm:$0xff]  ;;  %v3686_v53 = vld [vmem:[%s5947_s3 + $0x60] sm:$0xff] }
  0x6d   :  { %541 = vmatpush.msrb.mxu3 %v3573_v59  ;;  %v3630_v59 = vld [vmem:[%s5947_s3 + $0xa8] sm:$0xff]  ;;  %6217 = vst [vmem:[#allocation36_spill] sm:$0xff] %v3643_v50  ;;  %530 = vmatpush.msra.mxu2 %v3623_v12  ;;  %v3650_v61 = vld [vmem:[%s5947_s3 + $0x90] sm:$0xff] }
  0x6e   :  { %6215 = vst [vmem:[#allocation34_spill] sm:$0xff] %v3630_v59  ;;  %324 = vmatmul.f32.gmra.mxu0 %v2989_v33  ;;  %v3676_v12 = vld [vmem:[%s5947_s3 + $0xb0] sm:$0xff] }
  0x6f   :  { %542 = vmatpush.msrb.mxu3 %v3594_v25  ;;  %v3636_v25 = vld [vmem:[%s5947_s3 + $0x148] sm:$0xff]  ;;  %6218 = vst [vmem:[#allocation37_spill] sm:$0xff] %v3650_v61  ;;  %531 = vmatpush.msra.mxu2 %v3643_v50  ;;  %v3681_v50 = vld [vmem:[%s5947_s3 + $0x118] sm:$0xff] }
  0x70   :  { %6216 = vst [vmem:[#allocation35_spill] sm:$0xff] %v3636_v25  ;;  %578 = vmatpush.msrb.mxu1 %v3636_v25  ;;  %v6222_v25 = vmov 0.0  }
  0x71   :  { %207 = vmatmul.f32.gmra.mxu1 %v3107_v63  ;;  %543 = vmatpush.msrb.mxu3 %v3616_v15  ;;  %v3657_v15 = vld [vmem:[%s5947_s3 + $0xc8] sm:$0xff]  ;;  %6223 = vst [vmem:[#allocation41_spill] sm:$0xff] %v3676_v12 }
  0x72   :  { %289 = vmatmul.f32.gmra.mxu3 %v3107_v63  ;;  %6219 = vst [vmem:[#allocation38_spill] sm:$0xff] %v3657_v15  ;;  %532 = vmatmul.f32.vlgmr.msra.gmra.mxu2 %v6222_v25 }
  0x73   :  { %544 = vmatpush.msrb.mxu3 %v3630_v59  ;;  %v3669_v59 = vld [vmem:[%s5947_s3 + $0x78] sm:$0xff]  ;;  %6224 = vst [vmem:[#allocation42_spill] sm:$0xff] %v3681_v50  ;;  %563 = vmatpush.msrb.mxu0 %v3657_v15  ;;  %v3715_v15 = vld [vmem:[%s5947_s3 + $0x30] sm:$0xff] }
  0x74   :  { %6221 = vst [vmem:[#allocation40_spill] sm:$0xff] %v3669_v59  ;;  %579 = vmatpush.msrb.mxu1 %v3662_v23  ;;  %690 = vmatpush.msrb.mxu2 %v3004_v37 }
  0x75   :  { %545 = vmatpush.msrb.mxu3 %v3650_v61  ;;  %6225 = vst [vmem:[#allocation43_spill] sm:$0xff] %v3686_v53  ;;  %v3694_v61 = vld [vmem:[%s5947_s3 + $0x98] sm:$0xff]  ;;  %564 = vmatpush.msrb.mxu0 %v3676_v12  ;;  %v3721_v12 = vld [vmem:[%s5947_s3 + $0x80] sm:$0xff] }
  0x76   :  { %6226 = vst [vmem:[#allocation44_spill] sm:$0xff] %v3694_v61  ;;  %580 = vmatpush.msrb.mxu1 %v3681_v50  ;;  %327 = vmatmul.f32.gmra.mxu0 %v3049_v48  ;;  %v3739_v50 = vld [vmem:[%s5947_s3 + $0x68] sm:$0xff] }
  0x77   :  { %546 = vmatpush.msrb.mxu3 %v3669_v59  ;;  %v3707_v59 = vld [vmem:[%s5947_s3 + $0x100] sm:$0xff]  ;;  %6229 = vst [vmem:[#allocation47_spill] sm:$0xff] %v3715_v15  ;;  %565 = vmatpush.msrb.mxu0 %v3694_v61  ;;  %v3734_v61 = vld [vmem:[%s5947_s3 + $0x18] sm:$0xff] }
  0x78   :  { %6228 = vst [vmem:[#allocation46_spill] sm:$0xff] %v3707_v59  ;;  %581 = vmatpush.msrb.mxu1 %v3707_v59  ;;  %691 = vmatpush.msrb.mxu2 %v3020_v41  ;;  %v3752_v59 = vld [vmem:[%s5947_s3] sm:$0xff] }
  0x79   :  { %210 = vmatmul.f32.gmra.mxu1 %v3165_v14  ;;  %547 = vmatpush.msrb.mxu3 %v3686_v53  ;;  %6230 = vst [vmem:[#allocation48_spill] sm:$0xff] %v3721_v12  ;;  %v3728_v53 = vld [vmem:[%s5947_s3 + $0xe8] sm:$0xff] }
  0x7a   :  { %292 = vmatmul.f32.gmra.mxu3 %v3165_v14  ;;  %6231 = vst [vmem:[#allocation49_spill] sm:$0xff] %v3728_v53  ;;  %566 = vmatpush.msrb.mxu0 %v3721_v12  ;;  %v3770_v12 = vld [vmem:[%s5947_s3 + $0xb8] sm:$0xff] }
  0x7b   :  { %548 = vmatpush.msrb.mxu3 %v3700_v46  ;;  %6232 = vst [vmem:[#allocation50_spill] sm:$0xff] %v3734_v61  ;;  %v3747_v46 = vld [vmem:[%s5947_s3 + $0xd0] sm:$0xff]  ;;  %582 = vmatpush.msrb.mxu1 %v3728_v53 }
  0x7c   :  { %6233 = vst [vmem:[#allocation51_spill] sm:$0xff] %v3752_v59  ;;  %692 = vmatpush.msrb.mxu2 %v3035_v45  ;;  %567 = vmatpush.msrb.mxu0 %v3739_v50 }
  0x7d   :  { %549 = vmatpush.msrb.mxu3 %v3715_v15  ;;  %v3761_v15 = vld [vmem:[%s5947_s3 + $0x50] sm:$0xff]  ;;  %583 = vmatpush.msrb.mxu1 %v3747_v46 }
  0x7e   :  { %693 = vmatpush.msrb.mxu2 %v3072_v54  ;;  %568 = vmatpush.msrb.mxu0 %v3761_v15 }
  0x7f   :  { %550 = vmatpush.msrb.mxu3 %v3734_v61  ;;  %v3777_v61 = vld [vmem:[%s5947_s3 + $0x38] sm:$0xff]  ;;  %584 = vmatpush.msrb.mxu1 %v3770_v12 }
  0x80   :  { %330 = vmatmul.f32.gmra.mxu0 %v3107_v63  ;;  %694 = vmatpush.msrb.mxu2 %v3087_v58 }
  0x81   :  { %353 = vmatmul.f32.vlgmr.msra.gmra.mxu1 %v2984_v32  ;;  %551 = vmatpush.msrb.mxu3 %v3752_v59  ;;  %v3785_v32 = vld [vmem:[%s5947_s3 + $0x20] sm:$0xff]  ;;  %v3793_v59 = vld [vmem:[%s5947_s3 + $0x8] sm:$0xff] }
  0x82   :  { %512 = vmatmul.f32.vlgmr.msra.gmra.mxu3 %v6222_v25  ;;  %569 = vmatpush.msrb.mxu0 %v3777_v61 }
  0x83   :  { %710 = vmatpush.msra.mxu3 %v3224_v29  ;;  %v3798_v29 = vld [vmem:[%s5947_s3 + $0xa0] sm:$0xff]  ;;  %695 = vmatpush.msrb.mxu2 %v3130_v5 }
  0x84   :  { %570 = vmatpush.msrb.mxu0 %v3785_v32  ;;  %585 = vmatpush.msrb.mxu1 %v3798_v29 }
  0x85   :  { %711 = vmatpush.msra.mxu3 %v3238_v34  ;;  %696 = vmatpush.msrb.mxu2 %v3145_v9  ;;  %v3810_v34 = vld [vmem:[%s5947_s3 + $0x88] sm:$0xff] }
  0x86   :  { %571 = vmatpush.msrb.mxu0 %v3793_v59  ;;  %6234 = vst [vmem:[#allocation52_spill] sm:$0xff] %v3810_v34  ;;  %586 = vmatpush.msrb.mxu1 %v3810_v34 }
  0x87   :  { %712 = vmatpush.msra.mxu3 %v3256_v39  ;;  %697 = vmatpush.msrb.mxu2 %v3181_v18 }
  0x88   :  { %730 = vmatpush.msra.mxu0 %v3365_v6 }
  0x89   :  { %356 = vmatmul.f32.gmra.mxu1 %v3043_v47  ;;  %713 = vmatpush.msra.mxu3 %v3274_v44  ;;  %v3823_v47 = vld [vmem:[%s5947_s3 + $0x70] sm:$0xff] }
  0x8a   :  { %552 = vmatmul.f32.vlgmr.msrb.gmra.mxu3 %v6222_v25  ;;  %333 = vmatmul.f32.gmra.mxu0 %v3165_v14 }
  0x8b   :  { %731 = vmatpush.msra.mxu0 %v3387_v11  ;;  %714 = vmatpush.msra.mxu3 %v3284_v49  ;;  %v3834_v11 = vld [vmem:[%s5947_s3 + $0x58] sm:$0xff] }
  0x8c   :  { %698 = vmatpush.msrb.mxu2 %v3197_v22  ;;  %587 = vmatpush.msrb.mxu1 %v3823_v47 }
  0x8d   :  { %732 = vmatpush.msra.mxu0 %v3410_v17  ;;  %715 = vmatpush.msra.mxu3 %v3300_v52  ;;  %v6244_v17 = vld [vmem:[#allocation31_spill] sm:$0xff] }
  0x8e   :  { %699 = vmatpush.msrb.mxu2 %v3212_v26  ;;  %588 = vmatpush.msrb.mxu1 %v3834_v11 }
  0x8f   :  { %733 = vmatpush.msra.mxu0 %v3423_v20  ;;  %716 = vmatpush.msra.mxu3 %v3319_v57  ;;  %v6242_v20 = vld [vmem:[#allocation18_spill] sm:$0xff] }
  0x90   :  { %700 = vmatpush.msrb.mxu2 %v3243_v35 }
  0x91   :  { %359 = vmatmul.f32.gmra.mxu1 %v3102_v62  ;;  %734 = vmatpush.msra.mxu0 %v3440_v24  ;;  %v3848_v62 = vld [vmem:[%s5947_s3 + $0x40] sm:$0xff] }
  0x92   :  { %572 = vmatmul.f32.vlgmr.msrb.gmra.mxu0 %v6222_v25  ;;  %717 = vmatpush.msra.mxu3 %v3337_v0  ;;  %6235 = vst [vmem:[#allocation53_spill] sm:$0xff] %v3848_v62  ;;  %v6241_v24 = vld [vmem:[#allocation6_spill] sm:$0xff] }
  0x93   :  { %735 = vmatpush.msra.mxu0 %v3461_v30  ;;  %701 = vmatpush.msrb.mxu2 %v3261_v40  ;;  %v3859_v30 = vld [vmem:[%s5947_s3 + $0x28] sm:$0xff] }
  0x94   :  { %718 = vmatpush.msra.mxu3 %v3347_v2  ;;  %589 = vmatpush.msrb.mxu1 %v3848_v62 }
  0x95   :  { %736 = vmatpush.msra.mxu0 %v3479_v38  ;;  %702 = vmatpush.msrb.mxu2 %v3294_v51  ;;  %v6239_v38 = vld [vmem:[#allocation27_spill] sm:$0xff] }
  0x96   :  { %719 = vmatpush.msra.mxu3 %v3360_v4  ;;  %590 = vmatpush.msrb.mxu1 %v3859_v30 }
  0x97   :  { %737 = vmatpush.msra.mxu0 %v3493_v43  ;;  %703 = vmatpush.msrb.mxu2 %v3313_v56  ;;  %v3874_v43 = vld [vmem:[%s5947_s3 + $0x10] sm:$0xff] }
  0x98   :  { %720 = vmatpush.msra.mxu3 %v3382_v10  ;;  %591 = vmatpush.msrb.mxu1 %v3874_v43 }
  0x99   :  { %362 = vmatmul.f32.gmra.mxu1 %v3160_v13  ;;  %738 = vmatpush.msra.mxu0 %v3510_v55  ;;  %v6238_v55 = vld [vmem:[#allocation30_spill] sm:$0xff] }
  0x9a   :  { %721 = vmatpush.msra.mxu3 %v3402_v16  ;;  %704 = vmatpush.msrb.mxu2 %v3328_v60 }
  0x9b   :  { %739 = vmatpush.msra.mxu0 %v3531_v7  ;;  %750 = vmatpush.msra.mxu1 %v3485_v42  ;;  %v6236_v7 = vld [vmem:[#allocation15_spill] sm:$0xff] }
  0x9c   :  { %722 = vmatpush.msra.mxu3 %v3415_v19  ;;  %705 = vmatpush.msrb.mxu2 %v3354_v3 }
  0x9d   :  { %740 = vmatpush.msra.mxu0 %v3549_v28  ;;  %751 = vmatpush.msra.mxu1 %v6236_v7  ;;  %v6246_v7 = vld [vmem:[#allocation21_spill] sm:$0xff] }
  0x9e   :  { %v3869_v13 = vpop.f32.mrf.mxu1  ;;  %723 = vmatpush.msra.mxu3 %v3430_v21  ;;  %770 = vmatpush.msra.mxu2 %v3375_v8  ;;  %v6245_v8 = vld [vmem:[#allocation10_spill] sm:$0xff] }
  0x9f   :  { %741 = vmatpush.msra.mxu0 %v3566_v1  ;;  %752 = vmatpush.msra.mxu1 %v6242_v20 }
  0xa0   :  { %724 = vmatpush.msra.mxu3 %v3452_v27  ;;  %771 = vmatpush.msra.mxu2 %v6241_v24 }
  0xa1   :  { %365 = vmatmul.f32.gmra.mxu1 %v2989_v33  ;;  %742 = vmatpush.msra.mxu0 %v3582_v31  ;;  %v6243_v31 = vld [vmem:[#allocation33_spill] sm:$0xff] }
  0xa2   :  { %725 = vmatpush.msra.mxu3 %v3472_v36  ;;  %772 = vmatpush.msra.mxu2 %v6245_v8  ;;  %v6253_v8 = vld [vmem:[#allocation25_spill] sm:$0xff] }
  0xa3   :  { %743 = vmatpush.msra.mxu0 %v6238_v55  ;;  %753 = vmatpush.msra.mxu1 %v6246_v7  ;;  %v6249_v55 = vld [vmem:[#allocation12_spill] sm:$0xff] }
  0xa4   :  { %790 = vmatpush.msrb.mxu3 %v6239_v38  ;;  %v6248_v38 = vld [vmem:[#allocation35_spill] sm:$0xff]  ;;  %773 = vmatpush.msra.mxu2 %v6249_v55  ;;  %v6257_v55 = vld [vmem:[#allocation20_spill] sm:$0xff] }
  0xa5   :  { %v3889_v28 = vpop.f32.mrf.mxu3  ;;  %744 = vmatpush.msra.mxu0 %v6243_v31  ;;  %v6251_v31 = vld [vmem:[#allocation17_spill] sm:$0xff] }
  0xa6   :  { %6237 = vst [vmem:[#allocation54_spill] sm:$0xff] %v3889_v28  ;;  %v3893_v33 = vpop.f32.mrf.mxu2  ;;  %v3895_v1 = vpop.f32.mrf.mxu1  ;;  %791 = vmatpush.msrb.mxu3 %v6244_v17  ;;  %v6247_v28 = vld [vmem:[#allocation36_spill] sm:$0xff]  ;;  %774 = vmatpush.msra.mxu2 %v6251_v31 }
  0xa7   :  { %6240 = vst [vmem:[#allocation55_spill] sm:$0xff] %v3895_v1  ;;  %745 = vmatpush.msra.mxu0 %v6247_v28  ;;  %v6250_v1 = vld [vmem:[#allocation23_spill] sm:$0xff] }
  0xa8   :  { %792 = vmatpush.msrb.mxu3 %v6248_v38  ;;  %754 = vmatpush.msra.mxu1 %v6250_v1  ;;  %v6256_v38 = vld [vmem:[#allocation42_spill] sm:$0xff]  ;;  %v6258_v1 = vld [vmem:[#allocation28_spill] sm:$0xff] }
  0xa9   :  { %368 = vmatmul.f32.gmra.mxu1 %v3049_v48  ;;  %904 = vmatpush.msrb.mxu0 %v3004_v37  ;;  %v6259_v37 = vld [vmem:[#allocation46_spill] sm:$0xff] }
  0xaa   :  { %793 = vmatpush.msrb.mxu3 %v3662_v23  ;;  %755 = vmatpush.msra.mxu1 %v6253_v8  ;;  %v6260_v23 = vld [vmem:[#allocation29_spill] sm:$0xff] }
  0xab   :  { %905 = vmatpush.msrb.mxu0 %v3020_v41  ;;  %775 = vmatpush.msra.mxu2 %v6257_v55  ;;  %v6261_v41 = vld [vmem:[#allocation32_spill] sm:$0xff] }
  0xac   :  { %794 = vmatpush.msrb.mxu3 %v6256_v38  ;;  %756 = vmatpush.msra.mxu1 %v6258_v1 }
  0xad   :  { %v3911_v17 = vpop.f32.mrf.mxu3  ;;  %906 = vmatpush.msrb.mxu0 %v3035_v45  ;;  %776 = vmatpush.msra.mxu2 %v6260_v23 }
  0xae   :  { %6252 = vst [vmem:[#allocation6_spill] sm:$0xff] %v3911_v17  ;;  %v3915_v48 = vpop.f32.mrf.mxu2  ;;  %v3917_v28 = vpop.f32.mrf.mxu1  ;;  %795 = vmatpush.msrb.mxu3 %v6259_v37  ;;  %757 = vmatpush.msra.mxu1 %v6261_v41  ;;  %v6262_v17 = vld [vmem:[#allocation38_spill] sm:$0xff]  ;;  %v6269_v37 = vld [vmem:[#allocation44_spill] sm:$0xff] }
  0xaf   :  { %6254 = vst [vmem:[#allocation18_spill] sm:$0xff] %v3915_v48  ;;  %907 = vmatpush.msrb.mxu0 %v3072_v54  ;;  %777 = vmatpush.msra.mxu2 %v6262_v17  ;;  %v6265_v48 = vld [vmem:[#allocation41_spill] sm:$0xff] }
  0xb0   :  { %6255 = vst [vmem:[#allocation21_spill] sm:$0xff] %v3917_v28  ;;  %796 = vmatpush.msrb.mxu3 %v3728_v53  ;;  %v6263_v28 = vld [vmem:[#allocation34_spill] sm:$0xff]  ;;  %v6268_v53 = vld [vmem:[#allocation37_spill] sm:$0xff] }
  0xb1   :  { %371 = vmatmul.f32.gmra.mxu1 %v3107_v63  ;;  %908 = vmatpush.msrb.mxu0 %v3087_v58  ;;  %v6270_v58 = vld [vmem:[#allocation40_spill] sm:$0xff] }
  0xb2   :  { %797 = vmatpush.msrb.mxu3 %v3747_v46  ;;  %758 = vmatpush.msra.mxu1 %v6263_v28 }
  0xb3   :  { %778 = vmatpush.msra.mxu2 %v6265_v48  ;;  %909 = vmatpush.msrb.mxu0 %v3130_v5  ;;  %v6272_v5 = vld [vmem:[#allocation43_spill] sm:$0xff] }
  0xb4   :  { %798 = vmatpush.msrb.mxu3 %v3770_v12  ;;  %759 = vmatpush.msra.mxu1 %v6268_v53 }
  0xb5   :  { %v3933_v45 = vpop.f32.mrf.mxu3  ;;  %779 = vmatpush.msra.mxu2 %v6269_v37  ;;  %910 = vmatpush.msrb.mxu0 %v3145_v9 }
  0xb6   :  { %6264 = vst [vmem:[#allocation17_spill] sm:$0xff] %v3933_v45  ;;  %v3937_v63 = vpop.f32.mrf.mxu2  ;;  %v3939_v54 = vpop.f32.mrf.mxu1  ;;  %799 = vmatpush.msrb.mxu3 %v3798_v29  ;;  %760 = vmatpush.msra.mxu1 %v6270_v58  ;;  %v6271_v45 = vld [vmem:[#allocation48_spill] sm:$0xff] }
  0xb7   :  { %6266 = vst [vmem:[#allocation25_spill] sm:$0xff] %v3937_v63  ;;  %780 = vmatpush.msra.mxu2 %v6271_v45  ;;  %911 = vmatpush.msrb.mxu0 %v3181_v18  ;;  %v6277_v18 = vld [vmem:[#allocation50_spill] sm:$0xff] }
  0xb8   :  { %6267 = vst [vmem:[#allocation42_spill] sm:$0xff] %v3939_v54  ;;  %800 = vmatpush.msrb.mxu3 %v3810_v34  ;;  %761 = vmatpush.msra.mxu1 %v6272_v5  ;;  %v6273_v54 = vld [vmem:[#allocation45_spill] sm:$0xff]  ;;  %v6276_v34 = vld [vmem:[#allocation47_spill] sm:$0xff] }
  0xb9   :  { %374 = vmatmul.f32.gmra.mxu1 %v3165_v14  ;;  %781 = vmatpush.msra.mxu2 %v3739_v50 }
  0xba   :  { %801 = vmatpush.msrb.mxu3 %v3823_v47  ;;  %762 = vmatpush.msra.mxu1 %v6273_v54 }
  0xbb   :  { %782 = vmatpush.msra.mxu2 %v3761_v15  ;;  %912 = vmatpush.msrb.mxu0 %v3197_v22  ;;  %v6278_v22 = vld [vmem:[#allocation51_spill] sm:$0xff] }
  0xbc   :  { %802 = vmatpush.msrb.mxu3 %v3834_v11  ;;  %763 = vmatpush.msra.mxu1 %v6276_v34 }
  0xbd   :  { %v3955_v9 = vpop.f32.mrf.mxu3  ;;  %783 = vmatpush.msra.mxu2 %v3777_v61  ;;  %913 = vmatpush.msrb.mxu0 %v3212_v26 }
  0xbe   :  { %6274 = vst [vmem:[#allocation20_spill] sm:$0xff] %v3955_v9  ;;  %v3959_v14 = vpop.f32.mrf.mxu2  ;;  %v3961_v63 = vpop.f32.mrf.mxu1  ;;  %803 = vmatpush.msrb.mxu3 %v3848_v62  ;;  %764 = vmatpush.msra.mxu1 %v6277_v18  ;;  %v6279_v9 = vld [vmem:[#allocation2_spill] sm:$0xff] }
  0xbf   :  { %6275 = vst [vmem:[#allocation28_spill] sm:$0xff] %v3959_v14  ;;  %784 = vmatpush.msra.mxu2 %v3785_v32  ;;  %914 = vmatpush.msrb.mxu0 %v3243_v35  ;;  %v6281_v14 = vld [vmem:[#allocation3_spill] sm:$0xff] }
  0xc0   :  { %804 = vmatpush.msrb.mxu3 %v3859_v30  ;;  %765 = vmatpush.msra.mxu1 %v6278_v22 }
  0xc1   :  { %592 = vmatmul.f32.vlgmr.msrb.gmra.mxu1 %v6222_v25  ;;  %785 = vmatpush.msra.mxu2 %v3793_v59 }
  0xc2   :  { %924 = vmatpush.msrb.mxu1 %v6279_v9  ;;  %805 = vmatpush.msrb.mxu3 %v3874_v43 }
  0xc3   :  { %915 = vmatpush.msrb.mxu0 %v3261_v40 }
  0xc4   :  { %925 = vmatpush.msrb.mxu1 %v6281_v14 }
  0xc5   :  { %v3977_v26 = vpop.f32.mrf.mxu3  ;;  %916 = vmatpush.msrb.mxu0 %v3294_v51 }
  0xc6   :  { %6280 = vst [vmem:[#allocation29_spill] sm:$0xff] %v3977_v26  ;;  %v3980_v62 = vpop.f32.mrf.mxu2  ;;  %v3982_v25 = vpop.f32.mrf.mxu1  ;;  %926 = vmatpush.msrb.mxu1 %v3256_v39 }
  0xc7   :  { %6282 = vst [vmem:[#allocation32_spill] sm:$0xff] %v3980_v62  ;;  %917 = vmatpush.msrb.mxu0 %v3313_v56  ;;  %v4000_v39 = vpop.f32.mrf.mxu0 }
  0xc8   :  { %927 = vmatpush.msrb.mxu1 %v3274_v44  ;;  %6285 = vst [vmem:[#allocation41_spill] sm:$0xff] %v4000_v39 }
  0xc9   :  { %918 = vmatpush.msrb.mxu0 %v3328_v60 }
  0xca   :  { %928 = vmatpush.msrb.mxu1 %v3284_v49 }
  0xcb   :  { %919 = vmatpush.msrb.mxu0 %v3354_v3 }
  0xcc   :  { %929 = vmatpush.msrb.mxu1 %v3300_v52 }
  0xcd   :  { %v3991_v35 = vpop.f32.mrf.mxu3 }
  0xce   :  { %6283 = vst [vmem:[#allocation38_spill] sm:$0xff] %v3991_v35  ;;  %v3994_v9 = vpop.f32.mrf.mxu2  ;;  %v3996_v14 = vpop.f32.mrf.mxu1  ;;  %930 = vmatpush.msrb.mxu1 %v3319_v57 }
  0xcf   :  { %6284 = vst [vmem:[#allocation34_spill] sm:$0xff] %v3994_v9 }
  0xd0   :  { %931 = vmatpush.msrb.mxu1 %v3337_v0 }
  0xd2   :  { %932 = vmatpush.msrb.mxu1 %v3347_v2  ;;  %v4012_v51 = vpop.f32.mrf.mxu0 }
  0xd3   :  { %6289 = vst [vmem:[#allocation48_spill] sm:$0xff] %v4012_v51 }
  0xd4   :  { %933 = vmatpush.msrb.mxu1 %v3360_v4 }
  0xd5   :  { %v4004_v40 = vpop.f32.mrf.mxu3 }
  0xd6   :  { %6286 = vst [vmem:[#allocation37_spill] sm:$0xff] %v4004_v40  ;;  %v4007_v44 = vpop.f32.mrf.mxu2  ;;  %v4009_v49 = vpop.f32.mrf.mxu1  ;;  %934 = vmatpush.msrb.mxu1 %v3382_v10 }
  0xd7   :  { %6287 = vst [vmem:[#allocation44_spill] sm:$0xff] %v4007_v44 }
  0xd8   :  { %6288 = vst [vmem:[#allocation40_spill] sm:$0xff] %v4009_v49  ;;  %935 = vmatpush.msrb.mxu1 %v3402_v16 }
  0xda   :  { %936 = vmatpush.msrb.mxu1 %v3415_v19  ;;  %v4024_v60 = vpop.f32.mrf.mxu0 }
  0xdb   :  { %6293 = vst [vmem:[#allocation50_spill] sm:$0xff] %v4024_v60 }
  0xdc   :  { %937 = vmatpush.msrb.mxu1 %v3430_v21 }
  0xdd   :  { %v4016_v52 = vpop.f32.mrf.mxu3 }
  0xde   :  { %6290 = vst [vmem:[#allocation43_spill] sm:$0xff] %v4016_v52  ;;  %v4019_v56 = vpop.f32.mrf.mxu2  ;;  %v4021_v57 = vpop.f32.mrf.mxu1  ;;  %938 = vmatpush.msrb.mxu1 %v3452_v27 }
  0xdf   :  { %6291 = vst [vmem:[#allocation45_spill] sm:$0xff] %v4019_v56 }
  0xe0   :  { %6292 = vst [vmem:[#allocation47_spill] sm:$0xff] %v4021_v57  ;;  %939 = vmatpush.msrb.mxu1 %v3472_v36 }
  0xe3   :  { %v4032_v16 = vpop.f32.mrf.mxu0 }
  0xe4   :  { %6296 = vst [vmem:[#allocation3_spill] sm:$0xff] %v4032_v16  ;;  %v4056_v16 = vld [vmem:[%s5948_s4] sm:$0xff] }
  0xe5   :  { %v4027_v0 = vpop.f32.mrf.mxu3 }
  0xe6   :  { %6294 = vst [vmem:[#allocation51_spill] sm:$0xff] %v4027_v0  ;;  %v493_v2 = vpop.f32.mrf.mxu2  ;;  %v4029_v3 = vpop.f32.mrf.mxu1 }
  0xe7   :  { %6295 = vst [vmem:[#allocation2_spill] sm:$0xff] %v4029_v3  ;;  %v596_v4 = vadd.f32 %v493_v2, %v3869_v13 }
  0xe9   :  { %v2400_v10 = vmul.f32 -1.442695, %v596_v4 }
  0xeb   :  { %2451 = vpow2.f32 %v2400_v10  ;;  %v4038_v39 = vpop.f32.mrf.mxu0 }
  0xec   :  { %6299 = vst [vmem:[#allocation58_spill] sm:$0xff] %v4038_v39 }
  0xed   :  { %v4034_v19 = vpop.f32.mrf.mxu3 }
  0xee   :  { %6297 = vst [vmem:[#allocation56_spill] sm:$0xff] %v4034_v19  ;;  %v4036_v21 = vpop.f32.mrf.mxu1 }
  0xef   :  { %6298 = vst [vmem:[#allocation57_spill] sm:$0xff] %v4036_v21 }
  0xf1   :  { %v2452_v27 = vpop.eup %2451 }
  0xf2   :  { %v600_v26 = vadd.f32 1.0, %v2452_v27 }
  0xf3   :  { %v4044_v51 = vpop.f32.mrf.mxu0 }
  0xf4   :  { %2453 = vrcp.f32 %v600_v26  ;;  %v612_v3 = vand.u32 2147483648, %v600_v26  ;;  %vm606_vm1 = vweird.f32 %v600_v26  ;;  %v610_v52 = vand.u32 2147483647, %v600_v26 }
  0xf5   :  { %v4040_v36 = vpop.f32.mrf.mxu3 }
  0xf6   :  { %v4042_v56 = vpop.f32.mrf.mxu1  ;;  %vm611_vm3 = vcmp.eq.f32.partialorder %v610_v52, 8.507059e+37 }
  0xf7   :  { %6300 = vst [vmem:[#allocation59_spill] sm:$0xff] %v4042_v56 }
  0xfa   :  { %v2454_v35 = vpop.eup %2453 }
  0xfb   :  { %v602_v13 = vmul.f32 %v2454_v35, %v600_v26  ;;  %vm607_vm0 = vweird.f32 %v2454_v35 }
  0xfc   :  { %vm608_vm2 = vmor %vm606_vm1, %vm607_vm0 }
  0xfd   :  { %v293_v2 = vpop.f32.mrf.mxu3  ;;  %v603_v10 = vsub.f32 1.0, %v602_v13  ;;  %v4048_v60 = vpop.f32.mrf.mxu0 }
  0xfe   :  { %v4046_v4 = vpop.f32.mrf.mxu1  ;;  %v533_v13 = vpop.f32.mrf.mxu2 }
  0xff   :  { %6301 = vst [vmem:[#allocation60_spill] sm:$0xff] %v4046_v4  ;;  %v604_v44 = vmul.f32 %v2454_v35, %v603_v10  ;;  %v613_v4 = vor.u32 1.1754944e-38, %v612_v3 }
 0x101   :  { %v605_v9 = vadd.f32 %v2454_v35, %v604_v44 }
 0x103   :  { %v609_v10 = vsel %vm608_vm2, %v2454_v35, %v605_v9 }
 0x104   :  { %v614_v44 = vsel %vm611_vm3, %v613_v4, %v609_v10 }
 0x105   :  { %v513_v21 = vpop.f32.mrf.mxu3 }
 0x106   :  { %v616_v40 = vadd.f32 %v513_v21, %v3961_v63  ;;  %v4051_v27 = vpop.f32.mrf.mxu1  ;;  %v636_v63 = vadd.f32 %v533_v13, %v4056_v16 }
 0x107   :  { %6302 = vst [vmem:[#allocation61_spill] sm:$0xff] %v4051_v27 }
 0x108   :  { %v2401_v56 = vmul.f32 -1.442695, %v616_v40  ;;  %v334_v40 = vpop.f32.mrf.mxu0  ;;  %v637_v57 = vmul.f32 %v636_v63, %v614_v44 }
 0x10a   :  { %2455 = vpow2.f32 %v2401_v56  ;;  %v638_v49 = vadd.f32 %v637_v57, %v3893_v33 }
 0x10d   :  { %v553_v21 = vpop.f32.mrf.mxu3 }
 0x10e   :  { %v4059_v27 = vpop.f32.mrf.mxu1  ;;  %v643_v62 = vadd.f32 %v553_v21, %v293_v2 }
 0x10f   :  { %6303 = vst [vmem:[#allocation62_spill] sm:$0xff] %v4059_v27  ;;  %v6362_v27 = vld [vmem:[#allocation18_spill] sm:$0xff] }
 0x110   :  { %v2456_v26 = vpop.eup %2455  ;;  %v2402_v0 = vmul.f32 -1.442695, %v643_v62  ;;  %v573_v35 = vpop.f32.mrf.mxu0 }
 0x111   :  { %v620_v39 = vadd.f32 1.0, %v2456_v26  ;;  %v663_v56 = vadd.f32 %v573_v35, %v334_v40 }
 0x113   :  { %2457 = vrcp.f32 %v620_v39  ;;  %v632_v13 = vand.u32 2147483648, %v620_v39  ;;  %v630_v2 = vand.u32 2147483647, %v620_v39  ;;  %v2403_v62 = vmul.f32 -1.442695, %v663_v56 }
 0x114   :  { %2459 = vpow2.f32 %v2402_v0  ;;  %vm626_vm5 = vweird.f32 %v620_v39 }
 0x115   :  { %2461 = vtanh.f32 %v638_v49  ;;  %v633_v57 = vor.u32 1.1754944e-38, %v632_v13  ;;  %vm631_vm7 = vcmp.eq.f32.partialorder %v630_v2, 8.507059e+37  ;;  %v6311_v2 = vld [vmem:[#allocation7_spill] sm:$0xff] }
 0x116   :  { %v4062_v19 = vpop.f32.mrf.mxu1  ;;  %2463 = vpow2.f32 %v2403_v62  ;;  %v6314_v62 = vld [vmem:[#allocation12_spill] sm:$0xff] }
 0x117   :  { %6304 = vst [vmem:[#allocation63_spill] sm:$0xff] %v4062_v19 }
 0x119   :  { %v2458_v9 = vpop.eup %2457 }
 0x11a   :  { %v622_v52 = vmul.f32 %v2458_v9, %v620_v39  ;;  %v2460_v4 = vpop.eup %2459  ;;  %vm627_vm4 = vweird.f32 %v2458_v9 }
 0x11b   :  { %v2462_v21 = vpop.eup %2461  ;;  %v4066_v33 = vadd.f32 1.0, %v2460_v4  ;;  %vm628_vm6 = vmor %vm626_vm5, %vm627_vm4  ;;  %v6310_v4 = vld [vmem:[#allocation15_spill] sm:$0xff] }
 0x11c   :  { %v623_v3 = vsub.f32 1.0, %v622_v52  ;;  %v640_v0 = vsub.f32 0.0, %v2462_v21  ;;  %v2464_v39 = vpop.eup %2463 }
 0x11d   :  { %2465 = vrcp.f32 %v4066_v33  ;;  %v4082_v13 = vadd.f32 1.0, %v2464_v39  ;;  %v659_v39 = vand.u32 2147483648, %v4066_v33  ;;  %vm653_vm9 = vweird.f32 %v4066_v33 }
 0x11e   :  { %v624_v10 = vmul.f32 %v2458_v9, %v623_v3  ;;  %v4064_v63 = vpop.f32.mrf.mxu1  ;;  %v6309_v3 = vld [vmem:[#allocation5_spill] sm:$0xff] }
 0x11f   :  { %6305 = vst [vmem:[#allocation64_spill] sm:$0xff] %v4064_v63  ;;  %2467 = vrcp.f32 %v4082_v13  ;;  %vm673_vm12 = vweird.f32 %v4082_v13 }
 0x120   :  { %v625_v44 = vadd.f32 %v2458_v9, %v624_v10 }
 0x122   :  { %v629_v49 = vsel %vm628_vm6, %v2458_v9, %v625_v44  ;;  %v6308_v9 = vld [vmem:[#allocation4_spill] sm:$0xff]  ;;  %v6315_v44 = vld [vmem:[#allocation9_spill] sm:$0xff] }
 0x123   :  { %v634_v40 = vsel %vm631_vm7, %v633_v57, %v629_v49  ;;  %v2466_v56 = vpop.eup %2465  ;;  %v6316_v57 = vld [vmem:[#allocation23_spill] sm:$0xff]  ;;  %v6318_v49 = vld [vmem:[#allocation13_spill] sm:$0xff] }
 0x124   :  { %v641_v26 = vmul.f32 %v640_v0, %v634_v40  ;;  %v649_v10 = vmul.f32 %v2466_v56, %v4066_v33  ;;  %v6317_v0 = vld [vmem:[#allocation11_spill] sm:$0xff]  ;;  %vm654_vm8 = vweird.f32 %v2466_v56 }
 0x125   :  { %v2468_v40 = vpop.eup %2467  ;;  %vm655_vm10 = vmor %vm653_vm9, %vm654_vm8 }
 0x126   :  { %v4069_v35 = vpop.f32.mrf.mxu1  ;;  %v4071_v52 = vadd.f32 %v2462_v21, %v641_v26  ;;  %v6319_v26 = vld [vmem:[#allocation14_spill] sm:$0xff]  ;;  %vm674_vm13 = vweird.f32 %v2468_v40 }
 0x127   :  { %6306 = vst [vmem:[#allocation65_spill] sm:$0xff] %v4069_v35  ;;  %vm675_vm14 = vmor %vm673_vm12, %vm674_vm13 }
 0x128   :  { %6307 = vst [vmem:[#allocation66_spill] sm:$0xff] %v4071_v52  ;;  %706 = vmatmul.f32.vlgmr.msrb.gmra.mxu2 %v4071_v52  ;;  %726 = vmatmul.f32.vlgmr.msra.gmra.mxu3 %v4071_v52 }
 0x129   :  { %746 = vmatmul.f32.vlgmr.msra.gmra.mxu0 %v4071_v52  ;;  %944 = vmatpush.msrb.mxu2 %v3365_v6  ;;  %v6312_v6 = vld [vmem:[#allocation10_spill] sm:$0xff] }
 0x12a   :  { %964 = vmatpush.msra.mxu3 %v3485_v42  ;;  %984 = vmatpush.msra.mxu0 %v6308_v9  ;;  %v6313_v42 = vld [vmem:[#allocation8_spill] sm:$0xff] }
 0x12b   :  { %945 = vmatpush.msrb.mxu2 %v6309_v3  ;;  %v660_v3 = vor.u32 1.1754944e-38, %v659_v39  ;;  %v4223_v39 = vld [vmem:[%s5946_s2 + $0xf8] sm:$0xff] }
 0x12c   :  { %965 = vmatpush.msra.mxu3 %v6310_v4  ;;  %985 = vmatpush.msra.mxu0 %v6241_v24  ;;  %v650_v24 = vsub.f32 1.0, %v649_v10  ;;  %v6324_v4 = vld [vmem:[#allocation24_spill] sm:$0xff]  ;;  %6338 = vst [vmem:[#allocation8_spill] sm:$0xff] %v4223_v39 }
 0x12d   :  { %946 = vmatpush.msrb.mxu2 %v6311_v2 }
 0x12e   :  { %v4086_v21 = vpop.f32.mrf.mxu1  ;;  %966 = vmatpush.msra.mxu3 %v6242_v20  ;;  %986 = vmatpush.msra.mxu0 %v6312_v6  ;;  %v651_v20 = vmul.f32 %v2466_v56, %v650_v24 }
 0x12f   :  { %947 = vmatpush.msrb.mxu2 %v6313_v42 }
 0x130   :  { %967 = vmatpush.msra.mxu3 %v6246_v7  ;;  %987 = vmatpush.msra.mxu0 %v6314_v62 }
 0x131   :  { %948 = vmatpush.msrb.mxu2 %v6315_v44 }
 0x132   :  { %968 = vmatpush.msra.mxu3 %v6316_v57  ;;  %988 = vmatpush.msra.mxu0 %v6251_v31  ;;  %v652_v31 = vadd.f32 %v2466_v56, %v651_v20  ;;  %v4171_v57 = vld [vmem:[%s5946_s2 + $0x158] sm:$0xff] }
 0x133   :  { %949 = vmatpush.msrb.mxu2 %v6317_v0  ;;  %v6332_v0 = vld [vmem:[#allocation35_spill] sm:$0xff]  ;;  %v4178_v20 = vld [vmem:[%s5946_s2 + $0x138] sm:$0xff] }
 0x134   :  { %969 = vmatpush.msra.mxu3 %v6253_v8  ;;  %989 = vmatpush.msra.mxu0 %v6257_v55  ;;  %v6320_v8 = vld [vmem:[#allocation16_spill] sm:$0xff]  ;;  %v669_v55 = vmul.f32 %v2468_v40, %v4082_v13 }
 0x135   :  { %950 = vmatpush.msrb.mxu2 %v6318_v49  ;;  %v4184_v49 = vld [vmem:[%s5946_s2 + $0x140] sm:$0xff] }
 0x136   :  { %v375_v7 = vpop.f32.mrf.mxu1  ;;  %970 = vmatpush.msra.mxu3 %v6258_v1  ;;  %990 = vmatpush.msra.mxu0 %v6260_v23  ;;  %v657_v23 = vand.u32 2147483647, %v4066_v33  ;;  %v6321_v1 = vld [vmem:[#allocation19_spill] sm:$0xff]  ;;  %6333 = vst [vmem:[#allocation15_spill] sm:$0xff] %v4184_v49 }
 0x137   :  { %951 = vmatpush.msrb.mxu2 %v6319_v26  ;;  %v4197_v26 = vld [vmem:[%s5946_s2 + $0x128] sm:$0xff] }
 0x138   :  { %971 = vmatpush.msra.mxu3 %v6261_v41  ;;  %991 = vmatpush.msra.mxu0 %v6262_v17  ;;  %v4117_v17 = vld [vmem:[%s5948_s4 + $0x8] sm:$0xff]  ;;  %v656_v41 = vsel %vm655_vm10, %v2466_v56, %v652_v31  ;;  %vm658_vm11 = vcmp.eq.f32.partialorder %v657_v23, 8.507059e+37  ;;  %6335 = vst [vmem:[#allocation7_spill] sm:$0xff] %v4197_v26  ;;  %v6339_v23 = vld [vmem:[#allocation49_spill] sm:$0xff] }
 0x139   :  { %952 = vmatpush.msrb.mxu2 %v6320_v8  ;;  %6322 = vst [vmem:[#allocation4_spill] sm:$0xff] %v4117_v17  ;;  %v661_v10 = vsel %vm658_vm11, %v660_v3, %v656_v41  ;;  %v4204_v31 = vld [vmem:[%s5946_s2 + $0x108] sm:$0xff]  ;;  %v4210_v8 = vld [vmem:[%s5946_s2 + $0x110] sm:$0xff]  ;;  %v4236_v41 = vld [vmem:[%s5946_s2 + $0xe0] sm:$0xff] }
 0x13a   :  { %972 = vmatpush.msra.mxu3 %v6263_v28  ;;  %992 = vmatpush.msra.mxu0 %v6265_v48  ;;  %v6323_v28 = vld [vmem:[#allocation22_spill] sm:$0xff]  ;;  %v670_v48 = vsub.f32 1.0, %v669_v55  ;;  %6336 = vst [vmem:[#allocation10_spill] sm:$0xff] %v4210_v8  ;;  %v4275_v3 = vld [vmem:[%s5946_s2 + $0x98] sm:$0xff] }
 0x13b   :  { %953 = vmatpush.msrb.mxu2 %v6321_v1  ;;  %v6337_v55 = vld [vmem:[#allocation46_spill] sm:$0xff]  ;;  %v4230_v1 = vld [vmem:[%s5946_s2 + $0xd8] sm:$0xff]  ;;  %6340 = vst [vmem:[#allocation12_spill] sm:$0xff] %v4236_v41 }
 0x13c   :  { %973 = vmatpush.msra.mxu3 %v6268_v53  ;;  %993 = vmatpush.msra.mxu0 %v6269_v37  ;;  %v6325_v37 = vld [vmem:[#allocation26_spill] sm:$0xff]  ;;  %v671_v56 = vmul.f32 %v2468_v40, %v670_v48  ;;  %v4249_v48 = vld [vmem:[%s5946_s2 + $0xc8] sm:$0xff]  ;;  %6346 = vst [vmem:[#allocation16_spill] sm:$0xff] %v4275_v3 }
 0x13d   :  { %954 = vmatpush.msrb.mxu2 %v6323_v28  ;;  %v4243_v28 = vld [vmem:[%s5946_s2 + $0xc0] sm:$0xff]  ;;  %6342 = vst [vmem:[#allocation23_spill] sm:$0xff] %v4249_v48 }
 0x13e   :  { %v593_v9 = vpop.f32.mrf.mxu1  ;;  %974 = vmatpush.msra.mxu3 %v6270_v58  ;;  %994 = vmatpush.msra.mxu0 %v6271_v45  ;;  %v6326_v45 = vld [vmem:[#allocation30_spill] sm:$0xff]  ;;  %v672_v2 = vadd.f32 %v2468_v40, %v671_v56  ;;  %6341 = vst [vmem:[#allocation9_spill] sm:$0xff] %v4243_v28  ;;  %v6354_v56 = vld [vmem:[#allocation53_spill] sm:$0xff] }
 0x13f   :  { %v683_v33 = vadd.f32 %v593_v9, %v4117_v17  ;;  %955 = vmatpush.msrb.mxu2 %v6324_v4  ;;  %v4262_v9 = vld [vmem:[%s5946_s2 + $0xb0] sm:$0xff]  ;;  %v4288_v4 = vld [vmem:[%s5946_s2 + $0x80] sm:$0xff] }
 0x140   :  { %975 = vmatpush.msra.mxu3 %v6272_v5  ;;  %995 = vmatpush.msra.mxu0 %v3739_v50  ;;  %v679_v50 = vand.u32 2147483648, %v4082_v13  ;;  %v6327_v5 = vld [vmem:[#allocation33_spill] sm:$0xff]  ;;  %6344 = vst [vmem:[#allocation13_spill] sm:$0xff] %v4262_v9 }
 0x141   :  { %v684_v53 = vmul.f32 %v683_v33, %v661_v10  ;;  %956 = vmatpush.msrb.mxu2 %v6325_v37  ;;  %v6347_v33 = vld [vmem:[#allocation52_spill] sm:$0xff]  ;;  %6349 = vst [vmem:[#allocation22_spill] sm:$0xff] %v4288_v4  ;;  %v4295_v10 = vld [vmem:[%s5946_s2 + $0x60] sm:$0xff] }
 0x142   :  { %976 = vmatpush.msra.mxu3 %v6273_v54  ;;  %996 = vmatpush.msra.mxu0 %v3761_v15  ;;  %v677_v54 = vand.u32 2147483647, %v4082_v13  ;;  %v6328_v15 = vld [vmem:[#allocation36_spill] sm:$0xff]  ;;  %6350 = vst [vmem:[#allocation24_spill] sm:$0xff] %v4295_v10 }
 0x143   :  { %v685_v58 = vadd.f32 %v684_v53, %v375_v7  ;;  %957 = vmatpush.msrb.mxu2 %v6326_v45  ;;  %v4165_v13 = vld [vmem:[%s5946_s2 + $0x150] sm:$0xff]  ;;  %v6334_v7 = vld [vmem:[#allocation39_spill] sm:$0xff]  ;;  %v4334_v45 = vld [vmem:[%s5946_s2 + $0x18] sm:$0xff] }
 0x144   :  { %977 = vmatpush.msra.mxu3 %v6276_v34  ;;  %997 = vmatpush.msra.mxu0 %v3777_v61  ;;  %v680_v34 = vor.u32 1.1754944e-38, %v679_v50  ;;  %vm678_vm15 = vcmp.eq.f32.partialorder %v677_v54, 8.507059e+37  ;;  %v676_v61 = vsel %vm675_vm14, %v2468_v40, %v672_v2  ;;  %v4191_v40 = vld [vmem:[%s5946_s2 + $0x120] sm:$0xff]  ;;  %v4301_v53 = vld [vmem:[%s5946_s2 + $0x68] sm:$0xff]  ;;  %v4314_v37 = vld [vmem:[%s5946_s2 + $0x50] sm:$0xff] }
 0x145   :  { %2469 = vtanh.f32 %v685_v58  ;;  %958 = vmatpush.msrb.mxu2 %v6327_v5  ;;  %6351 = vst [vmem:[#allocation26_spill] sm:$0xff] %v4301_v53  ;;  %v4327_v58 = vld [vmem:[%s5946_s2 + $0x38] sm:$0xff]  ;;  %v4340_v50 = vld [vmem:[%s5946_s2 + $0x20] sm:$0xff]  ;;  %v4353_v5 = vld [vmem:[%s5946_s2 + $0x8] sm:$0xff] }
 0x146   :  { %978 = vmatpush.msra.mxu3 %v6277_v18  ;;  %998 = vmatpush.msra.mxu0 %v3785_v32  ;;  %v681_v62 = vsel %vm678_vm15, %v680_v34, %v676_v61  ;;  %v6330_v32 = vld [vmem:[#allocation27_spill] sm:$0xff]  ;;  %v4158_v18 = vld [vmem:[%s5946_s2 + $0x170] sm:$0xff]  ;;  %6353 = vst [vmem:[#allocation33_spill] sm:$0xff] %v4314_v37 }
 0x147   :  { %959 = vmatpush.msrb.mxu2 %v6328_v15  ;;  %6356 = vst [vmem:[#allocation27_spill] sm:$0xff] %v4327_v58  ;;  %v6361_v15 = vld [vmem:[#allocation55_spill] sm:$0xff] }
 0x148   :  { %979 = vmatpush.msra.mxu3 %v6278_v22  ;;  %999 = vmatpush.msra.mxu0 %v3793_v59  ;;  %v4152_v59 = vld [vmem:[%s5946_s2 + $0x168] sm:$0xff]  ;;  %6358 = vst [vmem:[#allocation35_spill] sm:$0xff] %v4340_v50 }
 0x149   :  { %v6331_v22 = vld [vmem:[#allocation31_spill] sm:$0xff]  ;;  %6360 = vst [vmem:[#allocation46_spill] sm:$0xff] %v4353_v5 }
 0x14a   :  { %6357 = vst [vmem:[#allocation31_spill] sm:$0xff] %v4334_v45 }
 0x14b   :  { %v2470_v6 = vpop.eup %2469 }
 0x14c   :  { %v687_v42 = vsub.f32 0.0, %v2470_v6 }
 0x14e   :  { %v688_v24 = vmul.f32 %v687_v42, %v681_v62 }
 0x150   :  { %v4143_v44 = vadd.f32 %v2470_v6, %v688_v24 }
 0x152   :  { %6329 = vst [vmem:[#allocation5_spill] sm:$0xff] %v4143_v44  ;;  %766 = vmatmul.f32.vlgmr.msra.gmra.mxu1 %v4143_v44  ;;  %786 = vmatmul.f32.vlgmr.msra.gmra.mxu2 %v4143_v44 }
 0x153   :  { %806 = vmatmul.f32.vlgmr.msrb.gmra.mxu3 %v4143_v44  ;;  %1004 = vmatpush.msra.mxu1 %v6330_v32 }
 0x154   :  { %1118 = vmatpush.msra.mxu2 %v4152_v59  ;;  %1138 = vmatpush.msrb.mxu3 %v4158_v18 }
 0x155   :  { %1005 = vmatpush.msra.mxu1 %v6331_v22 }
 0x156   :  { %1119 = vmatpush.msra.mxu2 %v4165_v13  ;;  %1139 = vmatpush.msrb.mxu3 %v4171_v57 }
 0x157   :  { %1006 = vmatpush.msra.mxu1 %v6332_v0 }
 0x158   :  { %1120 = vmatpush.msra.mxu2 %v4178_v20  ;;  %1140 = vmatpush.msrb.mxu3 %v4184_v49 }
 0x159   :  { %1007 = vmatpush.msra.mxu1 %v6334_v7 }
 0x15a   :  { %1121 = vmatpush.msra.mxu2 %v4191_v40  ;;  %1141 = vmatpush.msrb.mxu3 %v4197_v26 }
 0x15b   :  { %1008 = vmatpush.msra.mxu1 %v6256_v38  ;;  %v4217_v38 = vld [vmem:[%s5946_s2 + $0xf0] sm:$0xff] }
 0x15c   :  { %1122 = vmatpush.msra.mxu2 %v4204_v31  ;;  %1142 = vmatpush.msrb.mxu3 %v4210_v8 }
 0x15d   :  { %1009 = vmatpush.msra.mxu1 %v6337_v55 }
 0x15e   :  { %1123 = vmatpush.msra.mxu2 %v4217_v38  ;;  %1143 = vmatpush.msrb.mxu3 %v4223_v39 }
 0x15f   :  { %1010 = vmatpush.msra.mxu1 %v6339_v23 }
 0x160   :  { %1124 = vmatpush.msra.mxu2 %v4230_v1  ;;  %1144 = vmatpush.msrb.mxu3 %v4236_v41 }
 0x161   :  { %1011 = vmatpush.msra.mxu1 %v3747_v46  ;;  %v4256_v46 = vld [vmem:[%s5946_s2 + $0xa8] sm:$0xff] }
 0x162   :  { %1125 = vmatpush.msra.mxu2 %v4243_v28  ;;  %1145 = vmatpush.msrb.mxu3 %v4249_v48  ;;  %6343 = vst [vmem:[#allocation11_spill] sm:$0xff] %v4256_v46 }
 0x163   :  { %1012 = vmatpush.msra.mxu1 %v3770_v12  ;;  %v4269_v12 = vld [vmem:[%s5946_s2 + $0x90] sm:$0xff] }
 0x164   :  { %1126 = vmatpush.msra.mxu2 %v4256_v46  ;;  %1146 = vmatpush.msrb.mxu3 %v4262_v9  ;;  %6345 = vst [vmem:[#allocation14_spill] sm:$0xff] %v4269_v12 }
 0x165   :  { %1013 = vmatpush.msra.mxu1 %v3798_v29  ;;  %v4282_v29 = vld [vmem:[%s5946_s2 + $0x78] sm:$0xff] }
 0x166   :  { %1127 = vmatpush.msra.mxu2 %v4269_v12  ;;  %1147 = vmatpush.msrb.mxu3 %v4275_v3  ;;  %6348 = vst [vmem:[#allocation19_spill] sm:$0xff] %v4282_v29 }
 0x167   :  { %1014 = vmatpush.msra.mxu1 %v6347_v33 }
 0x168   :  { %1128 = vmatpush.msra.mxu2 %v4282_v29  ;;  %1148 = vmatpush.msrb.mxu3 %v4288_v4 }
 0x169   :  { %1015 = vmatpush.msra.mxu1 %v3823_v47  ;;  %v4308_v47 = vld [vmem:[%s5946_s2 + $0x48] sm:$0xff] }
 0x16a   :  { %1129 = vmatpush.msra.mxu2 %v4295_v10  ;;  %1149 = vmatpush.msrb.mxu3 %v4301_v53  ;;  %6352 = vst [vmem:[#allocation30_spill] sm:$0xff] %v4308_v47 }
 0x16b   :  { %1016 = vmatpush.msra.mxu1 %v3834_v11  ;;  %v4321_v11 = vld [vmem:[%s5946_s2 + $0x30] sm:$0xff] }
 0x16c   :  { %1130 = vmatpush.msra.mxu2 %v4308_v47  ;;  %1150 = vmatpush.msrb.mxu3 %v4314_v37  ;;  %6355 = vst [vmem:[#allocation36_spill] sm:$0xff] %v4321_v11 }
 0x16d   :  { %1017 = vmatpush.msra.mxu1 %v6354_v56 }
 0x16e   :  { %1131 = vmatpush.msra.mxu2 %v4321_v11  ;;  %1151 = vmatpush.msrb.mxu3 %v4327_v58 }
 0x16f   :  { %1018 = vmatpush.msra.mxu1 %v3859_v30  ;;  %v4347_v30 = vld [vmem:[%s5946_s2] sm:$0xff] }
 0x170   :  { %1132 = vmatpush.msra.mxu2 %v4334_v45  ;;  %1152 = vmatpush.msrb.mxu3 %v4340_v50  ;;  %6359 = vst [vmem:[#allocation39_spill] sm:$0xff] %v4347_v30 }
 0x171   :  { %1019 = vmatpush.msra.mxu1 %v3874_v43 }
 0x172   :  { %1133 = vmatpush.msra.mxu2 %v4347_v30  ;;  %1153 = vmatpush.msrb.mxu3 %v4353_v5 }
 0x1ab   :  { %v707_v2 = vpop.f32.mrf.mxu2  ;;  %v727_v54 = vpop.f32.mrf.mxu3 }
 0x1ac   :  { %v810_v34 = vadd.f32 %v707_v2, %v6361_v15  ;;  %v830_v43 = vadd.f32 %v727_v54, %v3982_v25  ;;  %v747_v25 = vpop.f32.mrf.mxu0 }
 0x1ae   :  { %v2404_v61 = vmul.f32 -1.442695, %v810_v34  ;;  %v2405_v6 = vmul.f32 -1.442695, %v830_v43  ;;  %v850_v43 = vadd.f32 %v747_v25, %v4056_v16 }
 0x1b0   :  { %2471 = vpow2.f32 %v2404_v61 }
 0x1b1   :  { %2473 = vpow2.f32 %v2405_v6 }
 0x1b6   :  { %v2472_v42 = vpop.eup %2471 }
 0x1b7   :  { %v2474_v62 = vpop.eup %2473  ;;  %v814_v24 = vadd.f32 1.0, %v2472_v42 }
 0x1b8   :  { %v834_v32 = vadd.f32 1.0, %v2474_v62 }
 0x1b9   :  { %2475 = vrcp.f32 %v814_v24  ;;  %v826_v23 = vand.u32 2147483648, %v814_v24  ;;  %v824_v2 = vand.u32 2147483647, %v814_v24  ;;  %vm820_vm1 = vweird.f32 %v814_v24 }
 0x1ba   :  { %2477 = vrcp.f32 %v834_v32  ;;  %v846_v63 = vand.u32 2147483648, %v834_v32  ;;  %vm840_vm5 = vweird.f32 %v834_v32 }
 0x1bb   :  { %v827_v15 = vor.u32 1.1754944e-38, %v826_v23  ;;  %vm825_vm3 = vcmp.eq.f32.partialorder %v824_v2, 8.507059e+37 }
 0x1bf   :  { %v2476_v22 = vpop.eup %2475 }
 0x1c0   :  { %v2478_v0 = vpop.eup %2477  ;;  %v816_v7 = vmul.f32 %v2476_v22, %v814_v24  ;;  %vm821_vm0 = vweird.f32 %v2476_v22  ;;  %v844_v24 = vand.u32 2147483647, %v834_v32 }
 0x1c1   :  { %v836_v33 = vmul.f32 %v2478_v0, %v834_v32  ;;  %vm822_vm2 = vmor %vm820_vm1, %vm821_vm0  ;;  %vm841_vm4 = vweird.f32 %v2478_v0 }
 0x1c2   :  { %v817_v55 = vsub.f32 1.0, %v816_v7  ;;  %vm842_vm6 = vmor %vm840_vm5, %vm841_vm4  ;;  %vm845_vm7 = vcmp.eq.f32.partialorder %v844_v24, 8.507059e+37  ;;  %v4424_v24 = vld [vmem:[%s5947_s3 + $0x140] sm:$0xff] }
 0x1c3   :  { %v837_v34 = vsub.f32 1.0, %v836_v33 }
 0x1c4   :  { %v818_v56 = vmul.f32 %v2476_v22, %v817_v55 }
 0x1c5   :  { %v838_v62 = vmul.f32 %v2478_v0, %v837_v34 }
 0x1c6   :  { %v819_v54 = vadd.f32 %v2476_v22, %v818_v56 }
 0x1c7   :  { %v839_v19 = vadd.f32 %v2478_v0, %v838_v62 }
 0x1c8   :  { %v823_v61 = vsel %vm822_vm2, %v2476_v22, %v819_v54  ;;  %v847_v22 = vor.u32 1.1754944e-38, %v846_v63  ;;  %v4386_v63 = vld [vmem:[%s5947_s3 + $0x170] sm:$0xff] }
 0x1c9   :  { %v828_v6 = vsel %vm825_vm3, %v827_v15, %v823_v61  ;;  %v843_v33 = vsel %vm842_vm6, %v2478_v0, %v839_v19  ;;  %v4373_v19 = vld [vmem:[%s5946_s2 + $0x178] sm:$0xff]  ;;  %v4392_v0 = vld [vmem:[%s5946_s2 + $0x160] sm:$0xff] }
 0x1ca   :  { %v851_v42 = vmul.f32 %v850_v43, %v828_v6  ;;  %v848_v15 = vsel %vm845_vm7, %v847_v22, %v843_v33  ;;  %v4398_v6 = vld [vmem:[%s5947_s3 + $0x150] sm:$0xff]  ;;  %v4443_v22 = vld [vmem:[%s5947_s3 + $0x128] sm:$0xff] }
 0x1cb   :  { %6365 = vst [vmem:[#allocation53_spill] sm:$0xff] %v4443_v22 }
 0x1cc   :  { %v852_v7 = vadd.f32 %v851_v42, %v6362_v27  ;;  %v4404_v42 = vld [vmem:[%s5947_s3 + $0x158] sm:$0xff] }
 0x1ce   :  { %2479 = vtanh.f32 %v852_v7  ;;  %v4410_v7 = vld [vmem:[%s5946_s2 + $0x148] sm:$0xff] }
 0x1cf   :  { %v767_v55 = vpop.f32.mrf.mxu1 }
 0x1d0   :  { %v857_v56 = vadd.f32 %v767_v55, %v4040_v36 }
 0x1d2   :  { %v2406_v23 = vmul.f32 -1.442695, %v857_v56  ;;  %v4418_v56 = vld [vmem:[%s5947_s3 + $0x138] sm:$0xff] }
 0x1d4   :  { %v2480_v25 = vpop.eup %2479  ;;  %2481 = vpow2.f32 %v2406_v23  ;;  %v4430_v23 = vld [vmem:[%s5946_s2 + $0x130] sm:$0xff] }
 0x1d5   :  { %v787_v2 = vpop.f32.mrf.mxu2  ;;  %v854_v54 = vsub.f32 %v4071_v52, %v2480_v25 }
 0x1d6   :  { %v877_v27 = vadd.f32 %v787_v2, %v4048_v60  ;;  %v4380_v60 = vld [vmem:[%s5947_s3 + $0x168] sm:$0xff] }
 0x1d7   :  { %v855_v34 = vmul.f32 %v854_v54, %v848_v15  ;;  %v4450_v54 = vld [vmem:[%s5946_s2 + $0x118] sm:$0xff]  ;;  %v4462_v15 = vld [vmem:[%s5947_s3 + $0x110] sm:$0xff] }
 0x1d8   :  { %v2407_v43 = vmul.f32 -1.442695, %v877_v27  ;;  %6366 = vst [vmem:[#allocation55_spill] sm:$0xff] %v4450_v54  ;;  %v4456_v27 = vld [vmem:[%s5947_s3 + $0x108] sm:$0xff] }
 0x1d9   :  { %v4363_v61 = vadd.f32 %v2480_v25, %v855_v34  ;;  %v4437_v25 = vld [vmem:[%s5947_s3 + $0x120] sm:$0xff]  ;;  %6367 = vst [vmem:[#allocation18_spill] sm:$0xff] %v4456_v27 }
 0x1da   :  { %v2482_v36 = vpop.eup %2481  ;;  %2483 = vpow2.f32 %v2407_v43  ;;  %6364 = vst [vmem:[#allocation52_spill] sm:$0xff] %v4437_v25  ;;  %v4468_v43 = vld [vmem:[%s5946_s2 + $0x100] sm:$0xff] }
 0x1db   :  { %6363 = vst [vmem:[#allocation49_spill] sm:$0xff] %v4363_v61  ;;  %v4365_v32 = vadd.f32 1.0, %v2482_v36  ;;  %920 = vmatmul.f32.vlgmr.msrb.gmra.mxu0 %v4363_v61  ;;  %940 = vmatmul.f32.vlgmr.msrb.gmra.mxu1 %v4363_v61 }
 0x1dc   :  { %960 = vmatmul.f32.vlgmr.msrb.gmra.mxu2 %v4363_v61  ;;  %1158 = vmatpush.msrb.mxu0 %v4373_v19  ;;  %6368 = vst [vmem:[#allocation67_spill] sm:$0xff] %v4462_v15 }
 0x1dd   :  { %2485 = vrcp.f32 %v4365_v32  ;;  %1178 = vmatpush.msrb.mxu1 %v4380_v60  ;;  %1198 = vmatpush.msrb.mxu2 %v4386_v63  ;;  %6369 = vst [vmem:[#allocation68_spill] sm:$0xff] %v4468_v43  ;;  %v873_v36 = vand.u32 2147483648, %v4365_v32  ;;  %v871_v35 = vand.u32 2147483647, %v4365_v32  ;;  %vm867_vm9 = vweird.f32 %v4365_v32 }
 0x1de   :  { %1159 = vmatpush.msrb.mxu0 %v4392_v0 }
 0x1df   :  { %1179 = vmatpush.msrb.mxu1 %v4398_v6  ;;  %1199 = vmatpush.msrb.mxu2 %v4404_v42  ;;  %vm872_vm11 = vcmp.eq.f32.partialorder %v871_v35, 8.507059e+37  ;;  %v4543_v35 = vld [vmem:[%s5947_s3 + $0xb0] sm:$0xff] }
 0x1e0   :  { %v2484_v62 = vpop.eup %2483  ;;  %1160 = vmatpush.msrb.mxu0 %v4410_v7  ;;  %6380 = vst [vmem:[#allocation79_spill] sm:$0xff] %v4543_v35 }
 0x1e1   :  { %v4413_v55 = vadd.f32 1.0, %v2484_v62  ;;  %1180 = vmatpush.msrb.mxu1 %v4418_v56  ;;  %1200 = vmatpush.msrb.mxu2 %v4424_v24  ;;  %v4475_v62 = vld [vmem:[%s5947_s3 + $0xf0] sm:$0xff] }
 0x1e2   :  { %1161 = vmatpush.msrb.mxu0 %v4430_v23  ;;  %6370 = vst [vmem:[#allocation69_spill] sm:$0xff] %v4475_v62 }
 0x1e3   :  { %v2486_v33 = vpop.eup %2485  ;;  %2487 = vrcp.f32 %v4413_v55  ;;  %1181 = vmatpush.msrb.mxu1 %v4437_v25  ;;  %1201 = vmatpush.msrb.mxu2 %v4443_v22  ;;  %v4537_v25 = vld [vmem:[%s5947_s3 + $0xa8] sm:$0xff]  ;;  %vm887_vm13 = vweird.f32 %v4413_v55 }
 0x1e4   :  { %v863_v2 = vmul.f32 %v2486_v33, %v4365_v32  ;;  %1162 = vmatpush.msrb.mxu0 %v4450_v54  ;;  %vm868_vm8 = vweird.f32 %v2486_v33  ;;  %v4511_v54 = vld [vmem:[%s5946_s2 + $0xd0] sm:$0xff]  ;;  %6379 = vst [vmem:[#allocation78_spill] sm:$0xff] %v4537_v25 }
 0x1e5   :  { %1182 = vmatpush.msrb.mxu1 %v4456_v27  ;;  %1202 = vmatpush.msrb.mxu2 %v4462_v15  ;;  %v4496_v27 = vld [vmem:[%s5947_s3 + $0xd8] sm:$0xff]  ;;  %6375 = vst [vmem:[#allocation74_spill] sm:$0xff] %v4511_v54  ;;  %vm869_vm10 = vmor %vm867_vm9, %vm868_vm8 }
 0x1e6   :  { %v864_v34 = vsub.f32 1.0, %v863_v2  ;;  %1163 = vmatpush.msrb.mxu0 %v4468_v43  ;;  %v4481_v2 = vld [vmem:[%s5947_s3 + $0xf8] sm:$0xff]  ;;  %v4488_v43 = vld [vmem:[%s5946_s2 + $0xe8] sm:$0xff]  ;;  %6373 = vst [vmem:[#allocation72_spill] sm:$0xff] %v4496_v27 }
 0x1e7   :  { %1183 = vmatpush.msrb.mxu1 %v4475_v62  ;;  %6371 = vst [vmem:[#allocation70_spill] sm:$0xff] %v4481_v2  ;;  %1203 = vmatpush.msrb.mxu2 %v4481_v2  ;;  %v807_v62 = vpop.f32.mrf.mxu3 }
 0x1e8   :  { %v865_v52 = vmul.f32 %v2486_v33, %v864_v34  ;;  %6372 = vst [vmem:[#allocation71_spill] sm:$0xff] %v4488_v43  ;;  %1164 = vmatpush.msrb.mxu0 %v4488_v43  ;;  %v4502_v34 = vld [vmem:[%s5947_s3 + $0xe0] sm:$0xff] }
 0x1e9   :  { %v4491_v15 = vpop.eup %2487  ;;  %1184 = vmatpush.msrb.mxu1 %v4496_v27  ;;  %6374 = vst [vmem:[#allocation73_spill] sm:$0xff] %v4502_v34  ;;  %1204 = vmatpush.msrb.mxu2 %v4502_v34  ;;  %v874_v27 = vor.u32 1.1754944e-38, %v873_v36  ;;  %v4518_v34 = vld [vmem:[%s5947_s3 + $0xc0] sm:$0xff]  ;;  %v4531_v36 = vld [vmem:[%s5946_s2 + $0xb8] sm:$0xff] }
 0x1ea   :  { %v883_v43 = vmul.f32 %v4491_v15, %v4413_v55  ;;  %v866_v2 = vadd.f32 %v2486_v33, %v865_v52  ;;  %1165 = vmatpush.msrb.mxu0 %v4511_v54  ;;  %6376 = vst [vmem:[#allocation75_spill] sm:$0xff] %v4518_v34  ;;  %v4524_v52 = vld [vmem:[%s5947_s3 + $0xc8] sm:$0xff]  ;;  %v897_v54 = vadd.f32 %v807_v62, %v4117_v17  ;;  %vm888_vm12 = vweird.f32 %v4491_v15  ;;  %v4595_v17 = vld [vmem:[%s5947_s3 + $0x60] sm:$0xff] }
 0x1eb   :  { %1185 = vmatpush.msrb.mxu1 %v4518_v34  ;;  %6377 = vst [vmem:[#allocation76_spill] sm:$0xff] %v4524_v52  ;;  %1205 = vmatpush.msrb.mxu2 %v4524_v52  ;;  %vm4625_vm14 = vmor %vm887_vm13, %vm888_vm12 }
 0x1ec   :  { %v884_v32 = vsub.f32 1.0, %v883_v43  ;;  %v870_v22 = vsel %vm869_vm10, %v2486_v33, %v866_v2  ;;  %6378 = vst [vmem:[#allocation77_spill] sm:$0xff] %v4531_v36  ;;  %1166 = vmatpush.msrb.mxu0 %v4531_v36  ;;  %v4549_v43 = vld [vmem:[%s5946_s2 + $0xa0] sm:$0xff]  ;;  %v4569_v2 = vld [vmem:[%s5946_s2 + $0x88] sm:$0xff] }
 0x1ed   :  { %v875_v34 = vsel %vm872_vm11, %v874_v27, %v870_v22  ;;  %1186 = vmatpush.msrb.mxu1 %v4537_v25  ;;  %1206 = vmatpush.msrb.mxu2 %v4543_v35  ;;  %6381 = vst [vmem:[#allocation80_spill] sm:$0xff] %v4549_v43  ;;  %v4556_v27 = vld [vmem:[%s5947_s3 + $0x90] sm:$0xff] }
 0x1ee   :  { %v898_v33 = vmul.f32 %v897_v54, %v875_v34  ;;  %1167 = vmatpush.msrb.mxu0 %v4549_v43  ;;  %v885_v22 = vmul.f32 %v4491_v15, %v884_v32  ;;  %6382 = vst [vmem:[#allocation81_spill] sm:$0xff] %v4556_v27  ;;  %v4562_v54 = vld [vmem:[%s5947_s3 + $0x98] sm:$0xff]  ;;  %v4581_v32 = vld [vmem:[%s5947_s3 + $0x80] sm:$0xff] }
 0x1ef   :  { %1187 = vmatpush.msrb.mxu1 %v4556_v27  ;;  %6383 = vst [vmem:[#allocation82_spill] sm:$0xff] %v4562_v54  ;;  %1207 = vmatpush.msrb.mxu2 %v4562_v54  ;;  %v4575_v34 = vld [vmem:[%s5947_s3 + $0x78] sm:$0xff] }
 0x1f0   :  { %v899_v62 = vadd.f32 %v898_v33, %v4086_v21  ;;  %6384 = vst [vmem:[#allocation83_spill] sm:$0xff] %v4569_v2  ;;  %1168 = vmatpush.msrb.mxu0 %v4569_v2  ;;  %v4587_v21 = vld [vmem:[%s5946_s2 + $0x70] sm:$0xff]  ;;  %v886_v33 = vadd.f32 %v4491_v15, %v885_v22  ;;  %v4608_v22 = vld [vmem:[%s5946_s2 + $0x58] sm:$0xff] }
 0x1f1   :  { %6385 = vst [vmem:[#allocation84_spill] sm:$0xff] %v4575_v34  ;;  %1188 = vmatpush.msrb.mxu1 %v4575_v34  ;;  %1208 = vmatpush.msrb.mxu2 %v4581_v32  ;;  %v4641_v34 = vld [vmem:[%s5947_s3 + $0x30] sm:$0xff] }
 0x1f2   :  { %6386 = vst [vmem:[#allocation85_spill] sm:$0xff] %v4581_v32  ;;  %2489 = vtanh.f32 %v899_v62  ;;  %1169 = vmatpush.msrb.mxu0 %v4587_v21  ;;  %v4601_v62 = vld [vmem:[%s5947_s3 + $0x68] sm:$0xff] }
 0x1f3   :  { %6387 = vst [vmem:[#allocation86_spill] sm:$0xff] %v4587_v21  ;;  %1189 = vmatpush.msrb.mxu1 %v4595_v17  ;;  %1209 = vmatpush.msrb.mxu2 %v4601_v62  ;;  %v893_v21 = vand.u32 2147483648, %v4413_v55  ;;  %v4616_v32 = vld [vmem:[%s5947_s3 + $0x48] sm:$0xff] }
 0x1f4   :  { %6388 = vst [vmem:[#allocation87_spill] sm:$0xff] %v4595_v17  ;;  %1170 = vmatpush.msrb.mxu0 %v4608_v22  ;;  %v891_v17 = vand.u32 2147483647, %v4413_v55  ;;  %v4632_v55 = vld [vmem:[%s5946_s2 + $0x40] sm:$0xff] }
 0x1f5   :  { %6389 = vst [vmem:[#allocation88_spill] sm:$0xff] %v4601_v62  ;;  %1190 = vmatpush.msrb.mxu1 %v4616_v32  ;;  %v4622_v62 = vld [vmem:[%s5947_s3 + $0x50] sm:$0xff] }
 0x1f6   :  { %6390 = vst [vmem:[#allocation89_spill] sm:$0xff] %v4608_v22  ;;  %1210 = vmatpush.msrb.mxu2 %v4622_v62  ;;  %1171 = vmatpush.msrb.mxu0 %v4632_v55  ;;  %vm892_vm15 = vcmp.eq.f32.partialorder %v891_v17, 8.507059e+37  ;;  %v4660_v22 = vld [vmem:[%s5947_s3 + $0x18] sm:$0xff]  ;;  %v4672_v17 = vld [vmem:[%s5946_s2 + $0x10] sm:$0xff] }
 0x1f7   :  { %6391 = vst [vmem:[#allocation90_spill] sm:$0xff] %v4616_v32  ;;  %v890_v32 = vsel %vm4625_vm14, %v4491_v15, %v886_v33  ;;  %1191 = vmatpush.msrb.mxu1 %v4641_v34  ;;  %v4653_v15 = vld [vmem:[%s5946_s2 + $0x28] sm:$0xff] }
 0x1f8   :  { %6392 = vst [vmem:[#allocation91_spill] sm:$0xff] %v4622_v62  ;;  %v4647_v62 = vld [vmem:[%s5947_s3 + $0x38] sm:$0xff]  ;;  %v2490_v2 = vpop.eup %2489  ;;  %1172 = vmatpush.msrb.mxu0 %v4653_v15 }
 0x1f9   :  { %6395 = vst [vmem:[#allocation92_spill] sm:$0xff] %v4632_v55  ;;  %1211 = vmatpush.msrb.mxu2 %v4647_v62  ;;  %v894_v55 = vor.u32 1.1754944e-38, %v893_v21  ;;  %v901_v33 = vsub.f32 %v4143_v44, %v2490_v2  ;;  %1192 = vmatpush.msrb.mxu1 %v4660_v22  ;;  %v4666_v21 = vld [vmem:[%s5947_s3 + $0x20] sm:$0xff] }
 0x1fa   :  { %6396 = vst [vmem:[#allocation93_spill] sm:$0xff] %v4647_v62  ;;  %1173 = vmatpush.msrb.mxu0 %v4672_v17 }
 0x1fb   :  { %6397 = vst [vmem:[#allocation94_spill] sm:$0xff] %v4660_v22  ;;  %1212 = vmatpush.msrb.mxu2 %v4666_v21  ;;  %v895_v62 = vsel %vm892_vm15, %v894_v55, %v890_v32  ;;  %v4678_v22 = vld [vmem:[%s5947_s3] sm:$0xff]  ;;  %v4719_v55 = vld [vmem:[%s5947_s3 + $0x130] sm:$0xff] }
 0x1fc   :  { %6398 = vst [vmem:[#allocation95_spill] sm:$0xff] %v4666_v21  ;;  %v902_v44 = vmul.f32 %v901_v33, %v895_v62  ;;  %1193 = vmatpush.msrb.mxu1 %v4678_v22  ;;  %v4684_v21 = vld [vmem:[%s5947_s3 + $0x8] sm:$0xff]  ;;  %v4695_v62 = vld [vmem:[%s5947_s3 + $0x178] sm:$0xff] }
 0x1fd   :  { %1213 = vmatpush.msrb.mxu2 %v4684_v21  ;;  %v4727_v33 = vld [vmem:[%s5947_s3 + $0x118] sm:$0xff] }
 0x1fe   :  { %v4687_v32 = vadd.f32 %v2490_v2, %v902_v44  ;;  %v4703_v44 = vld [vmem:[%s5947_s3 + $0x160] sm:$0xff]  ;;  %v4711_v2 = vld [vmem:[%s5947_s3 + $0x148] sm:$0xff]  ;;  %6400 = vst [vmem:[#allocation97_spill] sm:$0xff] %v4727_v33 }
 0x200   :  { %6399 = vst [vmem:[#allocation96_spill] sm:$0xff] %v4687_v32  ;;  %980 = vmatmul.f32.vlgmr.msra.gmra.mxu3 %v4687_v32  ;;  %1000 = vmatmul.f32.vlgmr.msra.gmra.mxu0 %v4687_v32 }
 0x201   :  { %1020 = vmatmul.f32.vlgmr.msra.gmra.mxu1 %v4687_v32  ;;  %1218 = vmatpush.msra.mxu3 %v4695_v62 }
 0x202   :  { %1332 = vmatpush.msra.mxu0 %v4152_v59  ;;  %1352 = vmatpush.msra.mxu1 %v4158_v18 }
 0x203   :  { %1219 = vmatpush.msra.mxu3 %v4703_v44 }
 0x204   :  { %1333 = vmatpush.msra.mxu0 %v4165_v13  ;;  %1353 = vmatpush.msra.mxu1 %v4171_v57 }
 0x205   :  { %1220 = vmatpush.msra.mxu3 %v4711_v2 }
 0x206   :  { %1334 = vmatpush.msra.mxu0 %v4178_v20  ;;  %1354 = vmatpush.msra.mxu1 %v4184_v49  ;;  %v4735_v49 = vld [vmem:[%s5947_s3 + $0x100] sm:$0xff] }
 0x207   :  { %1221 = vmatpush.msra.mxu3 %v4719_v55  ;;  %6401 = vst [vmem:[#allocation98_spill] sm:$0xff] %v4735_v49 }
 0x208   :  { %1335 = vmatpush.msra.mxu0 %v4191_v40  ;;  %1355 = vmatpush.msra.mxu1 %v4197_v26  ;;  %v4743_v26 = vld [vmem:[%s5947_s3 + $0xe8] sm:$0xff] }
 0x209   :  { %1222 = vmatpush.msra.mxu3 %v4727_v33  ;;  %6402 = vst [vmem:[#allocation99_spill] sm:$0xff] %v4743_v26 }
 0x20a   :  { %1336 = vmatpush.msra.mxu0 %v4204_v31  ;;  %1356 = vmatpush.msra.mxu1 %v4210_v8  ;;  %v4751_v8 = vld [vmem:[%s5947_s3 + $0xd0] sm:$0xff] }
 0x20b   :  { %1223 = vmatpush.msra.mxu3 %v4735_v49  ;;  %6403 = vst [vmem:[#allocation100_spill] sm:$0xff] %v4751_v8 }
 0x20c   :  { %1337 = vmatpush.msra.mxu0 %v4217_v38  ;;  %1357 = vmatpush.msra.mxu1 %v4223_v39  ;;  %v4759_v39 = vld [vmem:[%s5947_s3 + $0xb8] sm:$0xff] }
 0x20d   :  { %1224 = vmatpush.msra.mxu3 %v4743_v26  ;;  %6404 = vst [vmem:[#allocation101_spill] sm:$0xff] %v4759_v39 }
 0x20e   :  { %1338 = vmatpush.msra.mxu0 %v4230_v1  ;;  %1358 = vmatpush.msra.mxu1 %v4236_v41  ;;  %v4767_v41 = vld [vmem:[%s5947_s3 + $0xa0] sm:$0xff] }
 0x20f   :  { %1225 = vmatpush.msra.mxu3 %v4751_v8  ;;  %6405 = vst [vmem:[#allocation102_spill] sm:$0xff] %v4767_v41 }
 0x210   :  { %1339 = vmatpush.msra.mxu0 %v4243_v28  ;;  %1359 = vmatpush.msra.mxu1 %v4249_v48  ;;  %v4775_v48 = vld [vmem:[%s5947_s3 + $0x88] sm:$0xff] }
 0x211   :  { %1226 = vmatpush.msra.mxu3 %v4759_v39  ;;  %6406 = vst [vmem:[#allocation103_spill] sm:$0xff] %v4775_v48  ;;  %v6413_v39 = vld [vmem:[#allocation25_spill] sm:$0xff] }
 0x212   :  { %1340 = vmatpush.msra.mxu0 %v4256_v46  ;;  %1360 = vmatpush.msra.mxu1 %v4262_v9  ;;  %v4783_v9 = vld [vmem:[%s5947_s3 + $0x70] sm:$0xff] }
 0x213   :  { %1227 = vmatpush.msra.mxu3 %v4767_v41  ;;  %6407 = vst [vmem:[#allocation104_spill] sm:$0xff] %v4783_v9 }
 0x214   :  { %1341 = vmatpush.msra.mxu0 %v4269_v12  ;;  %1361 = vmatpush.msra.mxu1 %v4275_v3  ;;  %v4791_v3 = vld [vmem:[%s5947_s3 + $0x58] sm:$0xff] }
 0x215   :  { %1228 = vmatpush.msra.mxu3 %v4775_v48  ;;  %6408 = vst [vmem:[#allocation105_spill] sm:$0xff] %v4791_v3 }
 0x216   :  { %1342 = vmatpush.msra.mxu0 %v4282_v29  ;;  %1362 = vmatpush.msra.mxu1 %v4288_v4  ;;  %v4799_v4 = vld [vmem:[%s5947_s3 + $0x40] sm:$0xff] }
 0x217   :  { %1229 = vmatpush.msra.mxu3 %v4783_v9  ;;  %6409 = vst [vmem:[#allocation106_spill] sm:$0xff] %v4799_v4 }
 0x218   :  { %1343 = vmatpush.msra.mxu0 %v4295_v10  ;;  %1363 = vmatpush.msra.mxu1 %v4301_v53  ;;  %v4807_v53 = vld [vmem:[%s5947_s3 + $0x28] sm:$0xff] }
 0x219   :  { %1230 = vmatpush.msra.mxu3 %v4791_v3  ;;  %6410 = vst [vmem:[#allocation107_spill] sm:$0xff] %v4807_v53 }
 0x21a   :  { %1344 = vmatpush.msra.mxu0 %v4308_v47  ;;  %1364 = vmatpush.msra.mxu1 %v4314_v37  ;;  %v4815_v37 = vld [vmem:[%s5947_s3 + $0x10] sm:$0xff] }
 0x21b   :  { %1231 = vmatpush.msra.mxu3 %v4799_v4  ;;  %6411 = vst [vmem:[#allocation108_spill] sm:$0xff] %v4815_v37  ;;  %v6412_v4 = vld [vmem:[#allocation21_spill] sm:$0xff] }
 0x21c   :  { %1345 = vmatpush.msra.mxu0 %v4321_v11  ;;  %1365 = vmatpush.msra.mxu1 %v4327_v58 }
 0x21d   :  { %1232 = vmatpush.msra.mxu3 %v4807_v53 }
 0x21e   :  { %1346 = vmatpush.msra.mxu0 %v4334_v45  ;;  %1366 = vmatpush.msra.mxu1 %v4340_v50 }
 0x21f   :  { %1233 = vmatpush.msra.mxu3 %v4815_v37 }
 0x220   :  { %1347 = vmatpush.msra.mxu0 %v4347_v30  ;;  %1367 = vmatpush.msra.mxu1 %v4353_v5 }
 0x258   :  { %v921_v58 = vpop.f32.mrf.mxu0  ;;  %v941_v11 = vpop.f32.mrf.mxu1 }
 0x259   :  { %v1024_v47 = vadd.f32 %v921_v58, %v6412_v4  ;;  %v1044_v53 = vadd.f32 %v941_v11, %v3996_v14 }
 0x25b   :  { %v2408_v45 = vmul.f32 -1.442695, %v1024_v47  ;;  %v2409_v3 = vmul.f32 -1.442695, %v1044_v53 }
 0x25d   :  { %2491 = vpow2.f32 %v2408_v45 }
 0x25e   :  { %2493 = vpow2.f32 %v2409_v3 }
 0x25f   :  { %v961_v14 = vpop.f32.mrf.mxu2 }
 0x263   :  { %v2492_v50 = vpop.eup %2491 }
 0x264   :  { %v2494_v10 = vpop.eup %2493  ;;  %v1028_v9 = vadd.f32 1.0, %v2492_v50 }
 0x265   :  { %v1048_v29 = vadd.f32 1.0, %v2494_v10  ;;  %v1064_v10 = vadd.f32 %v961_v14, %v4056_v16 }
 0x266   :  { %2495 = vrcp.f32 %v1028_v9  ;;  %v1040_v41 = vand.u32 2147483648, %v1028_v9  ;;  %v1038_v4 = vand.u32 2147483647, %v1028_v9  ;;  %vm1034_vm1 = vweird.f32 %v1028_v9 }
 0x267   :  { %2497 = vrcp.f32 %v1048_v29  ;;  %v1060_v8 = vand.u32 2147483648, %v1048_v29  ;;  %vm1054_vm5 = vweird.f32 %v1048_v29 }
 0x268   :  { %v1041_v3 = vor.u32 1.1754944e-38, %v1040_v41  ;;  %vm1039_vm3 = vcmp.eq.f32.partialorder %v1038_v4, 8.507059e+37 }
 0x269   :  { %v1061_v4 = vor.u32 1.1754944e-38, %v1060_v8 }
 0x26c   :  { %v2496_v37 = vpop.eup %2495 }
 0x26d   :  { %v2498_v30 = vpop.eup %2497  ;;  %v1030_v48 = vmul.f32 %v2496_v37, %v1028_v9  ;;  %vm1035_vm0 = vweird.f32 %v2496_v37  ;;  %v1058_v9 = vand.u32 2147483647, %v1048_v29 }
 0x26e   :  { %v1050_v12 = vmul.f32 %v2498_v30, %v1048_v29  ;;  %vm1036_vm2 = vmor %vm1034_vm1, %vm1035_vm0  ;;  %vm1055_vm4 = vweird.f32 %v2498_v30 }
 0x26f   :  { %v1031_v5 = vsub.f32 1.0, %v1030_v48  ;;  %vm1056_vm6 = vmor %vm1054_vm5, %vm1055_vm4  ;;  %vm1059_vm7 = vcmp.eq.f32.partialorder %v1058_v9, 8.507059e+37  ;;  %v6423_v9 = vld [vmem:[#allocation70_spill] sm:$0xff] }
 0x270   :  { %v1051_v53 = vsub.f32 1.0, %v1050_v12 }
 0x271   :  { %v1032_v46 = vmul.f32 %v2496_v37, %v1031_v5 }
 0x272   :  { %v1052_v50 = vmul.f32 %v2498_v30, %v1051_v53 }
 0x273   :  { %v1033_v47 = vadd.f32 %v2496_v37, %v1032_v46 }
 0x274   :  { %v1053_v28 = vadd.f32 %v2498_v30, %v1052_v50  ;;  %v6419_v50 = vld [vmem:[#allocation18_spill] sm:$0xff] }
 0x275   :  { %v1037_v11 = vsel %vm1036_vm2, %v2496_v37, %v1033_v47  ;;  %v6414_v47 = vld [vmem:[#allocation56_spill] sm:$0xff] }
 0x276   :  { %v1042_v58 = vsel %vm1039_vm3, %v1041_v3, %v1037_v11  ;;  %v1057_v12 = vsel %vm1056_vm6, %v2498_v30, %v1053_v28  ;;  %v6416_v30 = vld [vmem:[#allocation52_spill] sm:$0xff] }
 0x277   :  { %v1065_v45 = vmul.f32 %v1064_v10, %v1042_v58  ;;  %v1062_v53 = vsel %vm1059_vm7, %v1061_v4, %v1057_v12  ;;  %v6417_v58 = vld [vmem:[#allocation53_spill] sm:$0xff] }
 0x278   :  { %v6426_v4 = vld [vmem:[#allocation73_spill] sm:$0xff] }
 0x279   :  { %v1066_v48 = vadd.f32 %v1065_v45, %v6413_v39  ;;  %v6418_v45 = vld [vmem:[#allocation55_spill] sm:$0xff] }
 0x27b   :  { %2499 = vtanh.f32 %v1066_v48  ;;  %v6420_v48 = vld [vmem:[#allocation67_spill] sm:$0xff] }
 0x27d   :  { %v1001_v5 = vpop.f32.mrf.mxu0 }
 0x27e   :  { %v1091_v46 = vadd.f32 %v1001_v5, %v4044_v51  ;;  %v6421_v5 = vld [vmem:[#allocation68_spill] sm:$0xff] }
 0x280   :  { %v2411_v41 = vmul.f32 -1.442695, %v1091_v46  ;;  %v6422_v46 = vld [vmem:[#allocation69_spill] sm:$0xff] }
 0x281   :  { %v2500_v37 = vpop.eup %2499 }
 0x282   :  { %v1068_v16 = vsub.f32 %v4363_v61, %v2500_v37  ;;  %2501 = vpow2.f32 %v2411_v41  ;;  %v6424_v41 = vld [vmem:[#allocation71_spill] sm:$0xff]  ;;  %v1021_v61 = vpop.f32.mrf.mxu1 }
 0x283   :  { %v981_v14 = vpop.f32.mrf.mxu3 }
 0x284   :  { %v1071_v39 = vadd.f32 %v981_v14, %v6414_v47  ;;  %v1069_v3 = vmul.f32 %v1068_v16, %v1062_v53  ;;  %v6427_v47 = vld [vmem:[#allocation74_spill] sm:$0xff] }
 0x286   :  { %v2410_v11 = vmul.f32 -1.442695, %v1071_v39  ;;  %v4827_v10 = vadd.f32 %v2500_v37, %v1069_v3  ;;  %v6425_v37 = vld [vmem:[#allocation72_spill] sm:$0xff]  ;;  %v6428_v39 = vld [vmem:[#allocation75_spill] sm:$0xff] }
 0x288   :  { %6415 = vst [vmem:[#allocation21_spill] sm:$0xff] %v4827_v10  ;;  %2503 = vpow2.f32 %v2410_v11  ;;  %1134 = vmatmul.f32.vlgmr.msra.gmra.mxu2 %v4827_v10  ;;  %1154 = vmatmul.f32.vlgmr.msrb.gmra.mxu3 %v4827_v10  ;;  %v2502_v51 = vpop.eup %2501 }
 0x289   :  { %1174 = vmatmul.f32.vlgmr.msrb.gmra.mxu0 %v4827_v10  ;;  %1372 = vmatpush.msra.mxu2 %v4373_v19  ;;  %v4838_v28 = vadd.f32 1.0, %v2502_v51 }
 0x28a   :  { %1392 = vmatpush.msrb.mxu3 %v4380_v60  ;;  %1412 = vmatpush.msrb.mxu0 %v4386_v63 }
 0x28b   :  { %1373 = vmatpush.msra.mxu2 %v4392_v0  ;;  %vm1101_vm13 = vweird.f32 %v4838_v28 }
 0x28c   :  { %1393 = vmatpush.msrb.mxu3 %v4398_v6  ;;  %1413 = vmatpush.msrb.mxu0 %v4404_v42 }
 0x28d   :  { %1374 = vmatpush.msra.mxu2 %v4410_v7 }
 0x28e   :  { %v2504_v8 = vpop.eup %2503  ;;  %1394 = vmatpush.msrb.mxu3 %v4418_v56  ;;  %1414 = vmatpush.msrb.mxu0 %v4424_v24 }
 0x28f   :  { %v1075_v29 = vadd.f32 1.0, %v2504_v8  ;;  %1375 = vmatpush.msra.mxu2 %v4430_v23 }
 0x290   :  { %1395 = vmatpush.msrb.mxu3 %v6416_v30  ;;  %1415 = vmatpush.msrb.mxu0 %v6417_v58 }
 0x291   :  { %2505 = vrcp.f32 %v1075_v29  ;;  %1376 = vmatpush.msra.mxu2 %v6418_v45  ;;  %v1087_v11 = vand.u32 2147483648, %v1075_v29  ;;  %v1085_v8 = vand.u32 2147483647, %v1075_v29  ;;  %vm1081_vm9 = vweird.f32 %v1075_v29 }
 0x292   :  { %2507 = vrcp.f32 %v4838_v28  ;;  %1396 = vmatpush.msrb.mxu3 %v6419_v50  ;;  %1416 = vmatpush.msrb.mxu0 %v6420_v48 }
 0x293   :  { %1377 = vmatpush.msra.mxu2 %v6421_v5  ;;  %vm1086_vm11 = vcmp.eq.f32.partialorder %v1085_v8, 8.507059e+37 }
 0x294   :  { %1397 = vmatpush.msrb.mxu3 %v6422_v46  ;;  %1417 = vmatpush.msrb.mxu0 %v6423_v9 }
 0x295   :  { %1378 = vmatpush.msra.mxu2 %v6424_v41 }
 0x296   :  { %1398 = vmatpush.msrb.mxu3 %v6425_v37  ;;  %1418 = vmatpush.msrb.mxu0 %v6426_v4  ;;  %v6434_v37 = vld [vmem:[#allocation87_spill] sm:$0xff] }
 0x297   :  { %v2506_v12 = vpop.eup %2505  ;;  %1379 = vmatpush.msra.mxu2 %v6427_v47 }
 0x298   :  { %v2508_v16 = vpop.eup %2507  ;;  %v1077_v14 = vmul.f32 %v2506_v12, %v1075_v29  ;;  %1399 = vmatpush.msrb.mxu3 %v6428_v39  ;;  %1419 = vmatpush.msrb.mxu0 %v4524_v52  ;;  %vm1082_vm8 = vweird.f32 %v2506_v12  ;;  %v1088_v39 = vor.u32 1.1754944e-38, %v1087_v11  ;;  %v6437_v11 = vld [vmem:[#allocation90_spill] sm:$0xff] }
 0x299   :  { %1380 = vmatpush.msra.mxu2 %v4531_v36  ;;  %v1097_v3 = vmul.f32 %v2508_v16, %v4838_v28  ;;  %v6429_v36 = vld [vmem:[#allocation83_spill] sm:$0xff]  ;;  %vm1083_vm10 = vmor %vm1081_vm9, %vm1082_vm8  ;;  %vm1102_vm12 = vweird.f32 %v2508_v16 }
 0x29a   :  { %v1078_v53 = vsub.f32 1.0, %v1077_v14  ;;  %1400 = vmatpush.msrb.mxu3 %v4537_v25  ;;  %1420 = vmatpush.msrb.mxu0 %v4543_v35  ;;  %v6430_v25 = vld [vmem:[#allocation84_spill] sm:$0xff]  ;;  %v6431_v35 = vld [vmem:[#allocation85_spill] sm:$0xff]  ;;  %vm1103_vm14 = vmor %vm1101_vm13, %vm1102_vm12 }
 0x29b   :  { %1381 = vmatpush.msra.mxu2 %v4549_v43  ;;  %v1098_v52 = vsub.f32 1.0, %v1097_v3  ;;  %v6433_v43 = vld [vmem:[#allocation86_spill] sm:$0xff] }
 0x29c   :  { %v1079_v51 = vmul.f32 %v2506_v12, %v1078_v53  ;;  %1401 = vmatpush.msrb.mxu3 %v4556_v27  ;;  %1421 = vmatpush.msrb.mxu0 %v4562_v54  ;;  %v6432_v53 = vld [vmem:[#allocation4_spill] sm:$0xff] }
 0x29d   :  { %1382 = vmatpush.msra.mxu2 %v6429_v36  ;;  %v1111_v47 = vadd.f32 %v1021_v61, %v6432_v53  ;;  %v6436_v36 = vld [vmem:[#allocation89_spill] sm:$0xff]  ;;  %v1099_v3 = vmul.f32 %v2508_v16, %v1098_v52  ;;  %v6440_v61 = vld [vmem:[#allocation92_spill] sm:$0xff]  ;;  %v6443_v52 = vld [vmem:[#allocation95_spill] sm:$0xff] }
 0x29e   :  { %v1080_v14 = vadd.f32 %v2506_v12, %v1079_v51  ;;  %1402 = vmatpush.msrb.mxu3 %v6430_v25  ;;  %1422 = vmatpush.msrb.mxu0 %v6431_v35  ;;  %v6435_v51 = vld [vmem:[#allocation88_spill] sm:$0xff]  ;;  %v6438_v25 = vld [vmem:[#allocation91_spill] sm:$0xff]  ;;  %v6439_v35 = vld [vmem:[#allocation65_spill] sm:$0xff] }
 0x29f   :  { %1383 = vmatpush.msra.mxu2 %v6433_v43 }
 0x2a0   :  { %v1084_v4 = vsel %vm1083_vm10, %v2506_v12, %v1080_v14  ;;  %1403 = vmatpush.msrb.mxu3 %v6434_v37  ;;  %1423 = vmatpush.msrb.mxu0 %v6435_v51  ;;  %v6441_v12 = vld [vmem:[#allocation93_spill] sm:$0xff] }
 0x2a1   :  { %v1089_v27 = vsel %vm1086_vm11, %v1088_v39, %v1084_v4  ;;  %1384 = vmatpush.msra.mxu2 %v6436_v36  ;;  %v1100_v4 = vadd.f32 %v2508_v16, %v1099_v3 }
 0x2a2   :  { %v1112_v29 = vmul.f32 %v1111_v47, %v1089_v27  ;;  %1404 = vmatpush.msrb.mxu3 %v6437_v11  ;;  %1424 = vmatpush.msrb.mxu0 %v6438_v25  ;;  %v6442_v27 = vld [vmem:[#allocation94_spill] sm:$0xff]  ;;  %v1107_v47 = vand.u32 2147483648, %v4838_v28 }
 0x2a3   :  { %1385 = vmatpush.msra.mxu2 %v6440_v61 }
 0x2a4   :  { %v1113_v54 = vadd.f32 %v1112_v29, %v6439_v35  ;;  %1405 = vmatpush.msrb.mxu3 %v4641_v34  ;;  %1425 = vmatpush.msrb.mxu0 %v6441_v12  ;;  %v1105_v35 = vand.u32 2147483647, %v4838_v28  ;;  %v1108_v8 = vor.u32 1.1754944e-38, %v1107_v47  ;;  %v6445_v28 = vld [vmem:[#allocation15_spill] sm:$0xff]  ;;  %v6455_v47 = vld [vmem:[#allocation13_spill] sm:$0xff] }
 0x2a5   :  { %1386 = vmatpush.msra.mxu2 %v4653_v15 }
 0x2a6   :  { %2509 = vtanh.f32 %v1113_v54  ;;  %1406 = vmatpush.msrb.mxu3 %v6442_v27  ;;  %1426 = vmatpush.msrb.mxu0 %v6443_v52  ;;  %v1104_v54 = vsel %vm1103_vm14, %v2508_v16, %v1100_v4  ;;  %vm1106_vm15 = vcmp.eq.f32.partialorder %v1105_v35, 8.507059e+37  ;;  %v6446_v16 = vld [vmem:[#allocation7_spill] sm:$0xff]  ;;  %v6457_v35 = vld [vmem:[#allocation14_spill] sm:$0xff] }
 0x2a7   :  { %1387 = vmatpush.msra.mxu2 %v4672_v17  ;;  %v1109_v53 = vsel %vm1106_vm15, %v1108_v8, %v1104_v54  ;;  %v6454_v4 = vld [vmem:[#allocation11_spill] sm:$0xff]  ;;  %v6458_v54 = vld [vmem:[#allocation16_spill] sm:$0xff]  ;;  %v6461_v8 = vld [vmem:[#allocation22_spill] sm:$0xff] }
 0x2a8   :  { %1407 = vmatpush.msrb.mxu3 %v4678_v22  ;;  %1427 = vmatpush.msrb.mxu0 %v4684_v21 }
 0x2ac   :  { %v2510_v39 = vpop.eup %2509 }
 0x2ad   :  { %v1115_v14 = vsub.f32 %v4687_v32, %v2510_v39 }
 0x2af   :  { %v1116_v29 = vmul.f32 %v1115_v14, %v1109_v53  ;;  %v6462_v14 = vld [vmem:[#allocation104_spill] sm:$0xff] }
 0x2b0   :  { %v6463_v53 = vld [vmem:[#allocation24_spill] sm:$0xff] }
 0x2b1   :  { %v4890_v3 = vadd.f32 %v2510_v39, %v1116_v29  ;;  %v6460_v39 = vld [vmem:[#allocation19_spill] sm:$0xff]  ;;  %v6464_v29 = vld [vmem:[#allocation26_spill] sm:$0xff] }
 0x2b3   :  { %6444 = vst [vmem:[#allocation25_spill] sm:$0xff] %v4890_v3  ;;  %1194 = vmatmul.f32.vlgmr.msrb.gmra.mxu1 %v4890_v3  ;;  %1214 = vmatmul.f32.vlgmr.msrb.gmra.mxu2 %v4890_v3 }
 0x2b4   :  { %1234 = vmatmul.f32.vlgmr.msra.gmra.mxu3 %v4890_v3  ;;  %1432 = vmatpush.msrb.mxu1 %v4695_v62 }
 0x2b5   :  { %1546 = vmatpush.msrb.mxu2 %v4152_v59  ;;  %1566 = vmatpush.msra.mxu3 %v4158_v18  ;;  %v6447_v59 = vld [vmem:[#allocation10_spill] sm:$0xff]  ;;  %v6448_v18 = vld [vmem:[#allocation8_spill] sm:$0xff] }
 0x2b6   :  { %1433 = vmatpush.msrb.mxu1 %v4703_v44 }
 0x2b7   :  { %1547 = vmatpush.msrb.mxu2 %v4165_v13  ;;  %1567 = vmatpush.msra.mxu3 %v4171_v57  ;;  %v6449_v13 = vld [vmem:[#allocation12_spill] sm:$0xff] }
 0x2b8   :  { %1434 = vmatpush.msrb.mxu1 %v4711_v2  ;;  %v6450_v57 = vld [vmem:[#allocation100_spill] sm:$0xff] }
 0x2b9   :  { %1548 = vmatpush.msrb.mxu2 %v4178_v20  ;;  %1568 = vmatpush.msra.mxu3 %v6445_v28  ;;  %v6451_v20 = vld [vmem:[#allocation9_spill] sm:$0xff] }
 0x2ba   :  { %1435 = vmatpush.msrb.mxu1 %v4719_v55  ;;  %v6465_v28 = vld [vmem:[#allocation105_spill] sm:$0xff] }
 0x2bb   :  { %1549 = vmatpush.msrb.mxu2 %v4191_v40  ;;  %1569 = vmatpush.msra.mxu3 %v6446_v16  ;;  %v6452_v40 = vld [vmem:[#allocation23_spill] sm:$0xff]  ;;  %v6466_v16 = vld [vmem:[#allocation30_spill] sm:$0xff] }
 0x2bc   :  { %1436 = vmatpush.msrb.mxu1 %v4727_v33 }
 0x2bd   :  { %1550 = vmatpush.msrb.mxu2 %v4204_v31  ;;  %1570 = vmatpush.msra.mxu3 %v6447_v59  ;;  %v6453_v31 = vld [vmem:[#allocation101_spill] sm:$0xff] }
 0x2be   :  { %1437 = vmatpush.msrb.mxu1 %v4735_v49  ;;  %v6467_v59 = vld [vmem:[#allocation33_spill] sm:$0xff] }
 0x2bf   :  { %1551 = vmatpush.msrb.mxu2 %v4217_v38  ;;  %1571 = vmatpush.msra.mxu3 %v6448_v18  ;;  %v6456_v38 = vld [vmem:[#allocation102_spill] sm:$0xff] }
 0x2c0   :  { %1438 = vmatpush.msrb.mxu1 %v4743_v26  ;;  %v6468_v18 = vld [vmem:[#allocation106_spill] sm:$0xff] }
 0x2c1   :  { %1552 = vmatpush.msrb.mxu2 %v4230_v1  ;;  %1572 = vmatpush.msra.mxu3 %v6449_v13  ;;  %v6459_v1 = vld [vmem:[#allocation103_spill] sm:$0xff]  ;;  %v6469_v13 = vld [vmem:[#allocation36_spill] sm:$0xff] }
 0x2c2   :  { %1439 = vmatpush.msrb.mxu1 %v6450_v57 }
 0x2c3   :  { %1553 = vmatpush.msrb.mxu2 %v6451_v20  ;;  %1573 = vmatpush.msra.mxu3 %v6452_v40  ;;  %v6470_v20 = vld [vmem:[#allocation27_spill] sm:$0xff] }
 0x2c4   :  { %1440 = vmatpush.msrb.mxu1 %v6453_v31  ;;  %v6471_v40 = vld [vmem:[#allocation107_spill] sm:$0xff] }
 0x2c5   :  { %1554 = vmatpush.msrb.mxu2 %v6454_v4  ;;  %1574 = vmatpush.msra.mxu3 %v6455_v47  ;;  %v6472_v4 = vld [vmem:[#allocation31_spill] sm:$0xff] }
 0x2c6   :  { %1441 = vmatpush.msrb.mxu1 %v6456_v38  ;;  %v6473_v47 = vld [vmem:[#allocation35_spill] sm:$0xff] }
 0x2c7   :  { %1555 = vmatpush.msrb.mxu2 %v6457_v35  ;;  %1575 = vmatpush.msra.mxu3 %v6458_v54  ;;  %v6474_v35 = vld [vmem:[#allocation108_spill] sm:$0xff]  ;;  %v6475_v54 = vld [vmem:[#allocation39_spill] sm:$0xff] }
 0x2c8   :  { %1442 = vmatpush.msrb.mxu1 %v6459_v1 }
 0x2c9   :  { %1556 = vmatpush.msrb.mxu2 %v6460_v39  ;;  %1576 = vmatpush.msra.mxu3 %v6461_v8  ;;  %v6476_v39 = vld [vmem:[#allocation46_spill] sm:$0xff] }
 0x2ca   :  { %1443 = vmatpush.msrb.mxu1 %v6462_v14 }
 0x2cb   :  { %1557 = vmatpush.msrb.mxu2 %v6463_v53  ;;  %1577 = vmatpush.msra.mxu3 %v6464_v29  ;;  %v6477_v29 = vld [vmem:[#allocation42_spill] sm:$0xff] }
 0x2cc   :  { %1444 = vmatpush.msrb.mxu1 %v6465_v28 }
 0x2cd   :  { %1558 = vmatpush.msrb.mxu2 %v6466_v16  ;;  %1578 = vmatpush.msra.mxu3 %v6467_v59  ;;  %v6478_v59 = vld [vmem:[#allocation40_spill] sm:$0xff] }
 0x2ce   :  { %1445 = vmatpush.msrb.mxu1 %v6468_v18 }
 0x2cf   :  { %1559 = vmatpush.msrb.mxu2 %v6469_v13  ;;  %1579 = vmatpush.msra.mxu3 %v6470_v20 }
 0x2d0   :  { %1446 = vmatpush.msrb.mxu1 %v6471_v40 }
 0x2d1   :  { %1560 = vmatpush.msrb.mxu2 %v6472_v4  ;;  %1580 = vmatpush.msra.mxu3 %v6473_v47 }
 0x2d2   :  { %1447 = vmatpush.msrb.mxu1 %v6474_v35 }
 0x2d3   :  { %1561 = vmatpush.msrb.mxu2 %v6475_v54  ;;  %1581 = vmatpush.msra.mxu3 %v6476_v39 }
 0x30b   :  { %v1135_v8 = vpop.f32.mrf.mxu2  ;;  %v1155_v53 = vpop.f32.mrf.mxu3 }
 0x30c   :  { %v1238_v16 = vadd.f32 %v1135_v8, %v6477_v29  ;;  %v1258_v13 = vadd.f32 %v1155_v53, %v6478_v59  ;;  %v1175_v53 = vpop.f32.mrf.mxu0 }
 0x30e   :  { %v2412_v32 = vmul.f32 -1.442695, %v1238_v16  ;;  %v2413_v20 = vmul.f32 -1.442695, %v1258_v13 }
 0x310   :  { %2511 = vpow2.f32 %v2412_v32 }
 0x311   :  { %2513 = vpow2.f32 %v2413_v20 }
 0x316   :  { %v2512_v40 = vpop.eup %2511 }
 0x317   :  { %v2514_v4 = vpop.eup %2513  ;;  %v1242_v18 = vadd.f32 1.0, %v2512_v40  ;;  %v4948_v40 = vld [vmem:[%s5948_s4] sm:$0xff] }
 0x318   :  { %v1262_v47 = vadd.f32 1.0, %v2514_v4  ;;  %v1278_v59 = vadd.f32 %v4948_v40, %v1175_v53 }
 0x319   :  { %2515 = vrcp.f32 %v1242_v18  ;;  %v1254_v14 = vand.u32 2147483648, %v1242_v18  ;;  %v1252_v8 = vand.u32 2147483647, %v1242_v18  ;;  %vm1248_vm1 = vweird.f32 %v1242_v18 }
 0x31a   :  { %2517 = vrcp.f32 %v1262_v47  ;;  %vm1268_vm5 = vweird.f32 %v1262_v47  ;;  %v1272_v26 = vand.u32 2147483647, %v1262_v47 }
 0x31b   :  { %v1255_v32 = vor.u32 1.1754944e-38, %v1254_v14  ;;  %vm1253_vm3 = vcmp.eq.f32.partialorder %v1252_v8, 8.507059e+37  ;;  %v1274_v14 = vand.u32 2147483648, %v1262_v47 }
 0x31c   :  { %vm1273_vm7 = vcmp.eq.f32.partialorder %v1272_v26, 8.507059e+37 }
 0x31f   :  { %v2516_v35 = vpop.eup %2515 }
 0x320   :  { %v2518_v54 = vpop.eup %2517  ;;  %v1244_v28 = vmul.f32 %v2516_v35, %v1242_v18  ;;  %vm1249_vm0 = vweird.f32 %v2516_v35 }
 0x321   :  { %v1264_v1 = vmul.f32 %v2518_v54, %v1262_v47  ;;  %vm1250_vm2 = vmor %vm1248_vm1, %vm1249_vm0  ;;  %vm1269_vm4 = vweird.f32 %v2518_v54 }
 0x322   :  { %v1245_v39 = vsub.f32 1.0, %v1244_v28  ;;  %vm1270_vm6 = vmor %vm1268_vm5, %vm1269_vm4 }
 0x323   :  { %v1265_v16 = vsub.f32 1.0, %v1264_v1  ;;  %v6480_v1 = vld [vmem:[#allocation51_spill] sm:$0xff] }
 0x324   :  { %v1246_v38 = vmul.f32 %v2516_v35, %v1245_v39  ;;  %v6479_v39 = vld [vmem:[#allocation28_spill] sm:$0xff] }
 0x325   :  { %v1266_v4 = vmul.f32 %v2518_v54, %v1265_v16 }
 0x326   :  { %v1247_v29 = vadd.f32 %v2516_v35, %v1246_v38 }
 0x327   :  { %v1267_v38 = vadd.f32 %v2518_v54, %v1266_v4  ;;  %v6489_v4 = vld [vmem:[#allocation78_spill] sm:$0xff] }
 0x328   :  { %v1251_v13 = vsel %vm1250_vm2, %v2516_v35, %v1247_v29  ;;  %v1275_v35 = vor.u32 1.1754944e-38, %v1274_v14 }
 0x329   :  { %v1256_v28 = vsel %vm1253_vm3, %v1255_v32, %v1251_v13  ;;  %v1271_v33 = vsel %vm1270_vm6, %v2518_v54, %v1267_v38  ;;  %v6481_v32 = vld [vmem:[#allocation58_spill] sm:$0xff] }
 0x32a   :  { %v1279_v20 = vmul.f32 %v1278_v59, %v1256_v28  ;;  %v1276_v16 = vsel %vm1273_vm7, %v1275_v35, %v1271_v33  ;;  %v6494_v35 = vld [vmem:[#allocation64_spill] sm:$0xff] }
 0x32c   :  { %v1280_v31 = vadd.f32 %v1279_v20, %v6479_v39  ;;  %v6490_v39 = vld [vmem:[#allocation79_spill] sm:$0xff] }
 0x32e   :  { %2519 = vtanh.f32 %v1280_v31 }
 0x330   :  { %v1195_v18 = vpop.f32.mrf.mxu1 }
 0x331   :  { %v1285_v57 = vadd.f32 %v1195_v18, %v6480_v1  ;;  %v6491_v18 = vld [vmem:[#allocation80_spill] sm:$0xff]  ;;  %v6492_v1 = vld [vmem:[#allocation81_spill] sm:$0xff] }
 0x333   :  { %v2414_v49 = vmul.f32 -1.442695, %v1285_v57  ;;  %v6488_v57 = vld [vmem:[#allocation77_spill] sm:$0xff] }
 0x334   :  { %v2520_v53 = vpop.eup %2519 }
 0x335   :  { %2521 = vpow2.f32 %v2414_v49  ;;  %v1282_v29 = vsub.f32 %v4827_v10, %v2520_v53 }
 0x336   :  { %v1215_v8 = vpop.f32.mrf.mxu2 }
 0x337   :  { %v1305_v31 = vadd.f32 %v1215_v8, %v6481_v32  ;;  %v1283_v59 = vmul.f32 %v1282_v29, %v1276_v16  ;;  %v6495_v29 = vld [vmem:[#allocation83_spill] sm:$0xff]  ;;  %v6496_v32 = vld [vmem:[#allocation84_spill] sm:$0xff] }
 0x339   :  { %v2415_v13 = vmul.f32 -1.442695, %v1305_v31  ;;  %v4955_v28 = vadd.f32 %v2520_v53, %v1283_v59  ;;  %v6493_v53 = vld [vmem:[#allocation82_spill] sm:$0xff]  ;;  %v6497_v31 = vld [vmem:[#allocation85_spill] sm:$0xff] }
 0x33b   :  { %6482 = vst [vmem:[#allocation56_spill] sm:$0xff] %v4955_v28  ;;  %v2522_v20 = vpop.eup %2521  ;;  %2523 = vpow2.f32 %v2415_v13  ;;  %1348 = vmatmul.f32.vlgmr.msra.gmra.mxu0 %v4955_v28  ;;  %1368 = vmatmul.f32.vlgmr.msra.gmra.mxu1 %v4955_v28 }
 0x33c   :  { %v1289_v47 = vadd.f32 1.0, %v2522_v20  ;;  %1388 = vmatmul.f32.vlgmr.msra.gmra.mxu2 %v4955_v28  ;;  %1586 = vmatpush.msra.mxu0 %v4373_v19  ;;  %v5097_v20 = vld [vmem:[%s5946_s2 + $0xf0] sm:$0xff] }
 0x33d   :  { %1606 = vmatpush.msra.mxu1 %v4380_v60  ;;  %1626 = vmatpush.msra.mxu2 %v4386_v63 }
 0x33e   :  { %2525 = vrcp.f32 %v1289_v47  ;;  %1587 = vmatpush.msra.mxu0 %v4392_v0  ;;  %v1301_v0 = vand.u32 2147483648, %v1289_v47  ;;  %vm1295_vm9 = vweird.f32 %v1289_v47 }
 0x33f   :  { %1607 = vmatpush.msra.mxu1 %v4398_v6  ;;  %1627 = vmatpush.msra.mxu2 %v4404_v42  ;;  %v1299_v42 = vand.u32 2147483647, %v1289_v47 }
 0x340   :  { %1588 = vmatpush.msra.mxu0 %v4410_v7 }
 0x341   :  { %v2524_v49 = vpop.eup %2523  ;;  %1608 = vmatpush.msra.mxu1 %v4418_v56  ;;  %1628 = vmatpush.msra.mxu2 %v4424_v24  ;;  %v1235_v56 = vpop.f32.mrf.mxu3  ;;  %v6483_v24 = vld [vmem:[#allocation72_spill] sm:$0xff]  ;;  %vm1300_vm11 = vcmp.eq.f32.partialorder %v1299_v42, 8.507059e+37  ;;  %v5136_v42 = vld [vmem:[%s5946_s2 + $0xa8] sm:$0xff] }
 0x342   :  { %v4967_v26 = vadd.f32 1.0, %v2524_v49  ;;  %1589 = vmatpush.msra.mxu0 %v4430_v23  ;;  %v6484_v23 = vld [vmem:[#allocation73_spill] sm:$0xff]  ;;  %v6500_v49 = vld [vmem:[#allocation99_spill] sm:$0xff] }
 0x343   :  { %1609 = vmatpush.msra.mxu1 %v6416_v30  ;;  %1629 = vmatpush.msra.mxu2 %v6417_v58  ;;  %v6485_v58 = vld [vmem:[#allocation74_spill] sm:$0xff] }
 0x344   :  { %v2526_v19 = vpop.eup %2525  ;;  %2527 = vrcp.f32 %v4967_v26  ;;  %1590 = vmatpush.msra.mxu0 %v6418_v45  ;;  %v1302_v45 = vor.u32 1.1754944e-38, %v1301_v0  ;;  %v1321_v59 = vand.u32 2147483648, %v4967_v26  ;;  %vm1315_vm13 = vweird.f32 %v4967_v26  ;;  %v5129_v0 = vld [vmem:[%s5946_s2 + $0xc8] sm:$0xff] }
 0x345   :  { %v1291_v60 = vmul.f32 %v2526_v19, %v1289_v47  ;;  %1610 = vmatpush.msra.mxu1 %v6419_v50  ;;  %1630 = vmatpush.msra.mxu2 %v6420_v48  ;;  %vm1296_vm8 = vweird.f32 %v2526_v19  ;;  %v6486_v50 = vld [vmem:[#allocation75_spill] sm:$0xff]  ;;  %v6487_v48 = vld [vmem:[#allocation76_spill] sm:$0xff]  ;;  %v1319_v13 = vand.u32 2147483647, %v4967_v26  ;;  %v5103_v47 = vld [vmem:[%s5946_s2 + $0xf8] sm:$0xff] }
 0x346   :  { %1591 = vmatpush.msra.mxu0 %v6421_v5  ;;  %vm1297_vm10 = vmor %vm1295_vm9, %vm1296_vm8 }
 0x347   :  { %v1292_v63 = vsub.f32 1.0, %v1291_v60  ;;  %1611 = vmatpush.msra.mxu1 %v6422_v46  ;;  %1631 = vmatpush.msra.mxu2 %v6423_v9  ;;  %v4991_v9 = vld [vmem:[%s5948_s4 + $0x8] sm:$0xff]  ;;  %vm1320_vm15 = vcmp.eq.f32.partialorder %v1319_v13, 8.507059e+37  ;;  %v6501_v60 = vld [vmem:[#allocation100_spill] sm:$0xff] }
 0x348   :  { %1592 = vmatpush.msra.mxu0 %v6424_v41  ;;  %v1325_v41 = vadd.f32 %v4991_v9, %v1235_v56  ;;  %v6503_v56 = vld [vmem:[#allocation102_spill] sm:$0xff] }
 0x349   :  { %v1293_v6 = vmul.f32 %v2526_v19, %v1292_v63  ;;  %1612 = vmatpush.msra.mxu1 %v6483_v24  ;;  %1632 = vmatpush.msra.mxu2 %v6484_v23  ;;  %v5123_v63 = vld [vmem:[%s5946_s2 + $0xc0] sm:$0xff]  ;;  %v5149_v24 = vld [vmem:[%s5946_s2 + $0x90] sm:$0xff]  ;;  %v5155_v23 = vld [vmem:[%s5946_s2 + $0x98] sm:$0xff] }
 0x34a   :  { %v2528_v7 = vpop.eup %2527  ;;  %1593 = vmatpush.msra.mxu0 %v6485_v58  ;;  %v5168_v58 = vld [vmem:[%s5946_s2 + $0x80] sm:$0xff] }
 0x34b   :  { %v1311_v33 = vmul.f32 %v2528_v7, %v4967_v26  ;;  %v1294_v30 = vadd.f32 %v2526_v19, %v1293_v6  ;;  %1613 = vmatpush.msra.mxu1 %v6486_v50  ;;  %1633 = vmatpush.msra.mxu2 %v6487_v48  ;;  %vm1316_vm12 = vweird.f32 %v2528_v7  ;;  %v5110_v26 = vld [vmem:[%s5946_s2 + $0xd8] sm:$0xff]  ;;  %v5175_v50 = vld [vmem:[%s5946_s2 + $0x60] sm:$0xff]  ;;  %v5181_v48 = vld [vmem:[%s5946_s2 + $0x68] sm:$0xff] }
 0x34c   :  { %1594 = vmatpush.msra.mxu0 %v6488_v57  ;;  %vm1317_vm14 = vmor %vm1315_vm13, %vm1316_vm12  ;;  %v6502_v6 = vld [vmem:[#allocation101_spill] sm:$0xff]  ;;  %v6507_v57 = vld [vmem:[#allocation106_spill] sm:$0xff] }
 0x34d   :  { %v1312_v5 = vsub.f32 1.0, %v1311_v33  ;;  %v1298_v46 = vsel %vm1297_vm10, %v2526_v19, %v1294_v30  ;;  %1614 = vmatpush.msra.mxu1 %v6489_v4  ;;  %1634 = vmatpush.msra.mxu2 %v6490_v39  ;;  %v5116_v19 = vld [vmem:[%s5946_s2 + $0xe0] sm:$0xff]  ;;  %v6504_v33 = vld [vmem:[#allocation103_spill] sm:$0xff]  ;;  %v5162_v30 = vld [vmem:[%s5946_s2 + $0x78] sm:$0xff] }
 0x34e   :  { %v1303_v54 = vsel %vm1300_vm11, %v1302_v45, %v1298_v46  ;;  %1595 = vmatpush.msra.mxu0 %v6491_v18  ;;  %v6505_v45 = vld [vmem:[#allocation104_spill] sm:$0xff]  ;;  %v5188_v46 = vld [vmem:[%s5946_s2 + $0x48] sm:$0xff]  ;;  %v5207_v4 = vld [vmem:[%s5946_s2 + $0x38] sm:$0xff] }
 0x34f   :  { %v1326_v38 = vmul.f32 %v1325_v41, %v1303_v54  ;;  %v1313_v14 = vmul.f32 %v2528_v7, %v1312_v5  ;;  %1615 = vmatpush.msra.mxu1 %v6492_v1  ;;  %1635 = vmatpush.msra.mxu2 %v6493_v53  ;;  %v6506_v5 = vld [vmem:[#allocation105_spill] sm:$0xff]  ;;  %v5194_v41 = vld [vmem:[%s5946_s2 + $0x50] sm:$0xff]  ;;  %v6508_v39 = vld [vmem:[#allocation107_spill] sm:$0xff] }
 0x350   :  { %1596 = vmatpush.msra.mxu0 %v6495_v29  ;;  %v5201_v54 = vld [vmem:[%s5946_s2 + $0x30] sm:$0xff]  ;;  %v5220_v18 = vld [vmem:[%s5946_s2 + $0x20] sm:$0xff]  ;;  %v5233_v53 = vld [vmem:[%s5946_s2 + $0x8] sm:$0xff] }
 0x351   :  { %v1327_v8 = vadd.f32 %v1326_v38, %v6494_v35  ;;  %1616 = vmatpush.msra.mxu1 %v6496_v32  ;;  %1636 = vmatpush.msra.mxu2 %v6497_v31  ;;  %v1314_v16 = vadd.f32 %v2528_v7, %v1313_v14  ;;  %v5214_v38 = vld [vmem:[%s5946_s2 + $0x18] sm:$0xff]  ;;  %v6509_v14 = vld [vmem:[#allocation108_spill] sm:$0xff]  ;;  %v5227_v1 = vld [vmem:[%s5946_s2] sm:$0xff] }
 0x352   :  { %1597 = vmatpush.msra.mxu0 %v6433_v43  ;;  %v6510_v29 = vld [vmem:[#allocation54_spill] sm:$0xff]  ;;  %v6511_v31 = vld [vmem:[#allocation47_spill] sm:$0xff] }
 0x353   :  { %2529 = vtanh.f32 %v1327_v8  ;;  %1617 = vmatpush.msra.mxu1 %v6434_v37  ;;  %1637 = vmatpush.msra.mxu2 %v6435_v51  ;;  %v1318_v43 = vsel %vm1317_vm14, %v2528_v7, %v1314_v16  ;;  %v1322_v51 = vor.u32 1.1754944e-38, %v1321_v59  ;;  %v5142_v7 = vld [vmem:[%s5946_s2 + $0xb0] sm:$0xff] }
 0x354   :  { %1598 = vmatpush.msra.mxu0 %v6436_v36 }
 0x355   :  { %1618 = vmatpush.msra.mxu1 %v6437_v11  ;;  %1638 = vmatpush.msra.mxu2 %v6438_v25  ;;  %v1323_v25 = vsel %vm1320_vm15, %v1322_v51, %v1318_v43 }
 0x356   :  { %1599 = vmatpush.msra.mxu0 %v6440_v61  ;;  %v5077_v61 = vld [vmem:[%s5946_s2 + $0x128] sm:$0xff] }
 0x357   :  { %1619 = vmatpush.msra.mxu1 %v4641_v34  ;;  %1639 = vmatpush.msra.mxu2 %v6441_v12  ;;  %v6498_v12 = vld [vmem:[#allocation97_spill] sm:$0xff] }
 0x358   :  { %1600 = vmatpush.msra.mxu0 %v4653_v15  ;;  %v5032_v15 = vld [vmem:[%s5946_s2 + $0x168] sm:$0xff] }
 0x359   :  { %v2530_v37 = vpop.eup %2529  ;;  %1620 = vmatpush.msra.mxu1 %v6442_v27  ;;  %1640 = vmatpush.msra.mxu2 %v6443_v52  ;;  %v5090_v27 = vld [vmem:[%s5946_s2 + $0x110] sm:$0xff]  ;;  %v6499_v52 = vld [vmem:[#allocation98_spill] sm:$0xff] }
 0x35a   :  { %v1329_v36 = vsub.f32 %v4890_v3, %v2530_v37  ;;  %1601 = vmatpush.msra.mxu0 %v4672_v17  ;;  %v5051_v17 = vld [vmem:[%s5946_s2 + $0x158] sm:$0xff]  ;;  %v5392_v3 = vld [vmem:[%s5947_s3 + $0xc0] sm:$0xff] }
 0x35b   :  { %1621 = vmatpush.msra.mxu1 %v4678_v22  ;;  %1641 = vmatpush.msra.mxu2 %v4684_v21  ;;  %v5038_v22 = vld [vmem:[%s5946_s2 + $0x170] sm:$0xff]  ;;  %6524 = vst [vmem:[#allocation4_spill] sm:$0xff] %v5392_v3 }
 0x35c   :  { %v1330_v11 = vmul.f32 %v1329_v36, %v1323_v25  ;;  %v5045_v21 = vld [vmem:[%s5946_s2 + $0x150] sm:$0xff] }
 0x35e   :  { %v5023_v34 = vadd.f32 %v2530_v37, %v1330_v11 }
 0x360   :  { %1408 = vmatmul.f32.vlgmr.msrb.gmra.mxu3 %v5023_v34  ;;  %1428 = vmatmul.f32.vlgmr.msrb.gmra.mxu0 %v5023_v34 }
 0x361   :  { %1448 = vmatmul.f32.vlgmr.msrb.gmra.mxu1 %v5023_v34  ;;  %1646 = vmatpush.msrb.mxu3 %v4695_v62  ;;  %v5058_v62 = vld [vmem:[%s5946_s2 + $0x138] sm:$0xff] }
 0x362   :  { %1760 = vmatpush.msrb.mxu0 %v5032_v15  ;;  %1780 = vmatpush.msrb.mxu1 %v5038_v22 }
 0x363   :  { %1647 = vmatpush.msrb.mxu3 %v4703_v44  ;;  %v5064_v44 = vld [vmem:[%s5946_s2 + $0x140] sm:$0xff] }
 0x364   :  { %1761 = vmatpush.msrb.mxu0 %v5045_v21  ;;  %1781 = vmatpush.msrb.mxu1 %v5051_v17 }
 0x365   :  { %1648 = vmatpush.msrb.mxu3 %v4711_v2  ;;  %v5071_v2 = vld [vmem:[%s5946_s2 + $0x120] sm:$0xff] }
 0x366   :  { %1762 = vmatpush.msrb.mxu0 %v5058_v62  ;;  %1782 = vmatpush.msrb.mxu1 %v5064_v44 }
 0x367   :  { %1649 = vmatpush.msrb.mxu3 %v4719_v55  ;;  %v5084_v55 = vld [vmem:[%s5946_s2 + $0x108] sm:$0xff] }
 0x368   :  { %1763 = vmatpush.msrb.mxu0 %v5071_v2  ;;  %1783 = vmatpush.msrb.mxu1 %v5077_v61 }
 0x369   :  { %1650 = vmatpush.msrb.mxu3 %v6498_v12 }
 0x36a   :  { %1764 = vmatpush.msrb.mxu0 %v5084_v55  ;;  %1784 = vmatpush.msrb.mxu1 %v5090_v27 }
 0x36b   :  { %1651 = vmatpush.msrb.mxu3 %v6499_v52 }
 0x36c   :  { %1765 = vmatpush.msrb.mxu0 %v5097_v20  ;;  %1785 = vmatpush.msrb.mxu1 %v5103_v47 }
 0x36d   :  { %1652 = vmatpush.msrb.mxu3 %v6500_v49 }
 0x36e   :  { %1766 = vmatpush.msrb.mxu0 %v5110_v26  ;;  %1786 = vmatpush.msrb.mxu1 %v5116_v19 }
 0x36f   :  { %1653 = vmatpush.msrb.mxu3 %v6501_v60 }
 0x370   :  { %1767 = vmatpush.msrb.mxu0 %v5123_v63  ;;  %1787 = vmatpush.msrb.mxu1 %v5129_v0 }
 0x371   :  { %1654 = vmatpush.msrb.mxu3 %v6502_v6 }
 0x372   :  { %1768 = vmatpush.msrb.mxu0 %v5136_v42  ;;  %1788 = vmatpush.msrb.mxu1 %v5142_v7 }
 0x373   :  { %1655 = vmatpush.msrb.mxu3 %v6503_v56 }
 0x374   :  { %1769 = vmatpush.msrb.mxu0 %v5149_v24  ;;  %1789 = vmatpush.msrb.mxu1 %v5155_v23 }
 0x375   :  { %1656 = vmatpush.msrb.mxu3 %v6504_v33 }
 0x376   :  { %1770 = vmatpush.msrb.mxu0 %v5162_v30  ;;  %1790 = vmatpush.msrb.mxu1 %v5168_v58 }
 0x377   :  { %1657 = vmatpush.msrb.mxu3 %v6505_v45 }
 0x378   :  { %1771 = vmatpush.msrb.mxu0 %v5175_v50  ;;  %1791 = vmatpush.msrb.mxu1 %v5181_v48 }
 0x379   :  { %1658 = vmatpush.msrb.mxu3 %v6506_v5 }
 0x37a   :  { %1772 = vmatpush.msrb.mxu0 %v5188_v46  ;;  %1792 = vmatpush.msrb.mxu1 %v5194_v41 }
 0x37b   :  { %1659 = vmatpush.msrb.mxu3 %v6507_v57 }
 0x37c   :  { %1773 = vmatpush.msrb.mxu0 %v5201_v54  ;;  %1793 = vmatpush.msrb.mxu1 %v5207_v4 }
 0x37d   :  { %1660 = vmatpush.msrb.mxu3 %v6508_v39 }
 0x37e   :  { %1774 = vmatpush.msrb.mxu0 %v5214_v38  ;;  %1794 = vmatpush.msrb.mxu1 %v5220_v18 }
 0x37f   :  { %1661 = vmatpush.msrb.mxu3 %v6509_v14 }
 0x380   :  { %1775 = vmatpush.msrb.mxu0 %v5227_v1  ;;  %1795 = vmatpush.msrb.mxu1 %v5233_v53 }
 0x3b8   :  { %v1349_v35 = vpop.f32.mrf.mxu0  ;;  %v1369_v8 = vpop.f32.mrf.mxu1 }
 0x3b9   :  { %v1452_v32 = vadd.f32 %v1349_v35, %v6510_v29  ;;  %v1472_v16 = vadd.f32 %v1369_v8, %v6511_v31 }
 0x3bb   :  { %v2416_v59 = vmul.f32 -1.442695, %v1452_v32  ;;  %v2417_v13 = vmul.f32 -1.442695, %v1472_v16  ;;  %v6512_v32 = vld [vmem:[#allocation32_spill] sm:$0xff] }
 0x3bd   :  { %2531 = vpow2.f32 %v2416_v59 }
 0x3be   :  { %2533 = vpow2.f32 %v2417_v13 }
 0x3bf   :  { %v1389_v33 = vpop.f32.mrf.mxu2 }
 0x3c0   :  { %v1492_v14 = vadd.f32 %v4948_v40, %v1389_v33 }
 0x3c3   :  { %v2532_v43 = vpop.eup %2531 }
 0x3c4   :  { %v2534_v37 = vpop.eup %2533  ;;  %v1456_v51 = vadd.f32 1.0, %v2532_v43  ;;  %v6513_v43 = vld [vmem:[#allocation3_spill] sm:$0xff] }
 0x3c5   :  { %v1476_v36 = vadd.f32 1.0, %v2534_v37 }
 0x3c6   :  { %2535 = vrcp.f32 %v1456_v51  ;;  %v1468_v60 = vand.u32 2147483648, %v1456_v51  ;;  %v1466_v56 = vand.u32 2147483647, %v1456_v51  ;;  %vm1462_vm1 = vweird.f32 %v1456_v51 }
 0x3c7   :  { %2537 = vrcp.f32 %v1476_v36  ;;  %v1488_v13 = vand.u32 2147483648, %v1476_v36  ;;  %vm1482_vm5 = vweird.f32 %v1476_v36 }
 0x3c8   :  { %v1469_v57 = vor.u32 1.1754944e-38, %v1468_v60  ;;  %vm1467_vm3 = vcmp.eq.f32.partialorder %v1466_v56, 8.507059e+37  ;;  %v6514_v56 = vld [vmem:[#allocation43_spill] sm:$0xff] }
 0x3cc   :  { %v2536_v25 = vpop.eup %2535 }
 0x3cd   :  { %v2538_v11 = vpop.eup %2537  ;;  %v1458_v12 = vmul.f32 %v2536_v25, %v1456_v51  ;;  %vm1463_vm0 = vweird.f32 %v2536_v25  ;;  %v1486_v51 = vand.u32 2147483647, %v1476_v36 }
 0x3ce   :  { %v1478_v49 = vmul.f32 %v2538_v11, %v1476_v36  ;;  %vm1464_vm2 = vmor %vm1462_vm1, %vm1463_vm0  ;;  %vm1483_vm4 = vweird.f32 %v2538_v11  ;;  %v5251_v36 = vld [vmem:[%s5946_s2 + $0x178] sm:$0xff] }
 0x3cf   :  { %v1459_v52 = vsub.f32 1.0, %v1458_v12  ;;  %vm1484_vm6 = vmor %vm1482_vm5, %vm1483_vm4  ;;  %vm1487_vm7 = vcmp.eq.f32.partialorder %v1486_v51, 8.507059e+37  ;;  %v5309_v51 = vld [vmem:[%s5946_s2 + $0x130] sm:$0xff] }
 0x3d0   :  { %v1479_v5 = vsub.f32 1.0, %v1478_v49  ;;  %v1489_v49 = vor.u32 1.1754944e-38, %v1488_v13 }
 0x3d1   :  { %v1460_v6 = vmul.f32 %v2536_v25, %v1459_v52 }
 0x3d2   :  { %v1480_v29 = vmul.f32 %v2538_v11, %v1479_v5 }
 0x3d3   :  { %v1461_v45 = vadd.f32 %v2536_v25, %v1460_v6 }
 0x3d4   :  { %v1481_v16 = vadd.f32 %v2538_v11, %v1480_v29  ;;  %v5275_v29 = vld [vmem:[%s5947_s3 + $0x150] sm:$0xff] }
 0x3d5   :  { %v1465_v39 = vsel %vm1464_vm2, %v2536_v25, %v1461_v45 }
 0x3d6   :  { %v1470_v35 = vsel %vm1467_vm3, %v1469_v57, %v1465_v39  ;;  %v1485_v25 = vsel %vm1484_vm6, %v2538_v11, %v1481_v16 }
 0x3d7   :  { %v1493_v8 = vmul.f32 %v1492_v14, %v1470_v35  ;;  %v1490_v45 = vsel %vm1487_vm7, %v1489_v49, %v1485_v25  ;;  %v5257_v14 = vld [vmem:[%s5947_s3 + $0x168] sm:$0xff]  ;;  %v5263_v35 = vld [vmem:[%s5947_s3 + $0x170] sm:$0xff] }
 0x3d8   :  { %v5322_v25 = vld [vmem:[%s5947_s3 + $0x128] sm:$0xff] }
 0x3d9   :  { %v1494_v31 = vadd.f32 %v1493_v8, %v6512_v32  ;;  %v5269_v8 = vld [vmem:[%s5946_s2 + $0x160] sm:$0xff]  ;;  %v5281_v32 = vld [vmem:[%s5947_s3 + $0x158] sm:$0xff]  ;;  %v5335_v49 = vld [vmem:[%s5947_s3 + $0x108] sm:$0xff] }
 0x3da   :  { %6515 = vst [vmem:[#allocation52_spill] sm:$0xff] %v5335_v49 }
 0x3db   :  { %2539 = vtanh.f32 %v1494_v31 }
 0x3dd   :  { %v1429_v59 = vpop.f32.mrf.mxu0 }
 0x3de   :  { %v1519_v37 = vadd.f32 %v1429_v59, %v6513_v43  ;;  %v5289_v59 = vld [vmem:[%s5946_s2 + $0x148] sm:$0xff]  ;;  %v5297_v43 = vld [vmem:[%s5947_s3 + $0x138] sm:$0xff] }
 0x3e0   :  { %v2419_v12 = vmul.f32 -1.442695, %v1519_v37  ;;  %v5303_v37 = vld [vmem:[%s5947_s3 + $0x140] sm:$0xff] }
 0x3e1   :  { %v2540_v52 = vpop.eup %2539 }
 0x3e2   :  { %v1496_v60 = vsub.f32 %v4955_v28, %v2540_v52  ;;  %2541 = vpow2.f32 %v2419_v12  ;;  %v5316_v12 = vld [vmem:[%s5947_s3 + $0x120] sm:$0xff]  ;;  %v5386_v28 = vld [vmem:[%s5946_s2 + $0xd0] sm:$0xff] }
 0x3e3   :  { %v1409_v6 = vpop.f32.mrf.mxu3  ;;  %6523 = vst [vmem:[#allocation71_spill] sm:$0xff] %v5386_v28 }
 0x3e4   :  { %v1499_v33 = vadd.f32 %v1409_v6, %v6514_v56  ;;  %v1497_v5 = vmul.f32 %v1496_v60, %v1490_v45  ;;  %v5341_v60 = vld [vmem:[%s5947_s3 + $0x110] sm:$0xff]  ;;  %v5347_v6 = vld [vmem:[%s5946_s2 + $0x100] sm:$0xff]  ;;  %v5365_v45 = vld [vmem:[%s5946_s2 + $0xe8] sm:$0xff] }
 0x3e5   :  { %6516 = vst [vmem:[#allocation53_spill] sm:$0xff] %v5341_v60  ;;  %v5353_v56 = vld [vmem:[%s5947_s3 + $0xf0] sm:$0xff] }
 0x3e6   :  { %v2418_v57 = vmul.f32 -1.442695, %v1499_v33  ;;  %v5243_v39 = vadd.f32 %v2540_v52, %v1497_v5  ;;  %v5329_v52 = vld [vmem:[%s5946_s2 + $0x118] sm:$0xff]  ;;  %6517 = vst [vmem:[#allocation55_spill] sm:$0xff] %v5347_v6 }
 0x3e7   :  { %6518 = vst [vmem:[#allocation18_spill] sm:$0xff] %v5353_v56  ;;  %v5359_v33 = vld [vmem:[%s5947_s3 + $0xf8] sm:$0xff] }
 0x3e8   :  { %2543 = vpow2.f32 %v2418_v57  ;;  %1562 = vmatmul.f32.vlgmr.msrb.gmra.mxu2 %v5243_v39  ;;  %1582 = vmatmul.f32.vlgmr.msra.gmra.mxu3 %v5243_v39  ;;  %v2542_v11 = vpop.eup %2541  ;;  %6519 = vst [vmem:[#allocation67_spill] sm:$0xff] %v5359_v33  ;;  %v5371_v57 = vld [vmem:[%s5947_s3 + $0xd8] sm:$0xff] }
 0x3e9   :  { %1602 = vmatmul.f32.vlgmr.msra.gmra.mxu0 %v5243_v39  ;;  %1800 = vmatpush.msrb.mxu2 %v5251_v36  ;;  %v5284_v16 = vadd.f32 1.0, %v2542_v11  ;;  %6520 = vst [vmem:[#allocation68_spill] sm:$0xff] %v5365_v45  ;;  %v5377_v11 = vld [vmem:[%s5947_s3 + $0xe0] sm:$0xff] }
 0x3ea   :  { %1820 = vmatpush.msra.mxu3 %v5257_v14  ;;  %1840 = vmatpush.msra.mxu0 %v5263_v35  ;;  %6521 = vst [vmem:[#allocation69_spill] sm:$0xff] %v5371_v57 }
 0x3eb   :  { %1801 = vmatpush.msrb.mxu2 %v5269_v8  ;;  %6522 = vst [vmem:[#allocation70_spill] sm:$0xff] %v5377_v11  ;;  %vm1529_vm13 = vweird.f32 %v5284_v16 }
 0x3ec   :  { %1821 = vmatpush.msra.mxu3 %v5275_v29  ;;  %1841 = vmatpush.msra.mxu0 %v5281_v32 }
 0x3ed   :  { %1802 = vmatpush.msrb.mxu2 %v5289_v59 }
 0x3ee   :  { %v2544_v31 = vpop.eup %2543  ;;  %1822 = vmatpush.msra.mxu3 %v5297_v43  ;;  %1842 = vmatpush.msra.mxu0 %v5303_v37 }
 0x3ef   :  { %v5292_v13 = vadd.f32 1.0, %v2544_v31  ;;  %1803 = vmatpush.msrb.mxu2 %v5309_v51 }
 0x3f0   :  { %1823 = vmatpush.msra.mxu3 %v5316_v12  ;;  %1843 = vmatpush.msra.mxu0 %v5322_v25 }
 0x3f1   :  { %2545 = vrcp.f32 %v5292_v13  ;;  %1804 = vmatpush.msrb.mxu2 %v5329_v52  ;;  %vm1509_vm9 = vweird.f32 %v5292_v13 }
 0x3f2   :  { %2547 = vrcp.f32 %v5284_v16  ;;  %1824 = vmatpush.msra.mxu3 %v5335_v49  ;;  %1844 = vmatpush.msra.mxu0 %v5341_v60  ;;  %v5451_v49 = vld [vmem:[%s5947_s3 + $0x78] sm:$0xff] }
 0x3f3   :  { %1805 = vmatpush.msrb.mxu2 %v5347_v6  ;;  %v1449_v6 = vpop.f32.mrf.mxu1  ;;  %6532 = vst [vmem:[#allocation92_spill] sm:$0xff] %v5451_v49 }
 0x3f4   :  { %1825 = vmatpush.msra.mxu3 %v5353_v56  ;;  %1845 = vmatpush.msra.mxu0 %v5359_v33  ;;  %v5413_v33 = vld [vmem:[%s5947_s3 + $0xa8] sm:$0xff]  ;;  %v5426_v56 = vld [vmem:[%s5946_s2 + $0xa0] sm:$0xff] }
 0x3f5   :  { %1806 = vmatpush.msrb.mxu2 %v5365_v45  ;;  %v5404_v45 = vld [vmem:[%s5946_s2 + $0xb8] sm:$0xff]  ;;  %6527 = vst [vmem:[#allocation88_spill] sm:$0xff] %v5413_v33 }
 0x3f6   :  { %1826 = vmatpush.msra.mxu3 %v5371_v57  ;;  %1846 = vmatpush.msra.mxu0 %v5377_v11  ;;  %v5398_v11 = vld [vmem:[%s5947_s3 + $0xc8] sm:$0xff]  ;;  %6526 = vst [vmem:[#allocation87_spill] sm:$0xff] %v5404_v45 }
 0x3f7   :  { %v2546_v5 = vpop.eup %2545  ;;  %1807 = vmatpush.msrb.mxu2 %v5386_v28  ;;  %6525 = vst [vmem:[#allocation86_spill] sm:$0xff] %v5398_v11 }
 0x3f8   :  { %v5380_v31 = vpop.eup %2547  ;;  %v1505_v10 = vmul.f32 %v2546_v5, %v5292_v13  ;;  %1827 = vmatpush.msra.mxu3 %v5392_v3  ;;  %1847 = vmatpush.msra.mxu0 %v5398_v11  ;;  %v1515_v3 = vand.u32 2147483648, %v5292_v13  ;;  %vm1510_vm8 = vweird.f32 %v2546_v5  ;;  %v1513_v11 = vand.u32 2147483647, %v5292_v13  ;;  %6529 = vst [vmem:[#allocation90_spill] sm:$0xff] %v5426_v56  ;;  %v5457_v13 = vld [vmem:[%s5947_s3 + $0x80] sm:$0xff] }
 0x3f9   :  { %1808 = vmatpush.msrb.mxu2 %v5404_v45  ;;  %v1525_v28 = vmul.f32 %v5380_v31, %v5284_v16  ;;  %vm1511_vm10 = vmor %vm1509_vm9, %vm1510_vm8  ;;  %vm1530_vm12 = vweird.f32 %v5380_v31 }
 0x3fa   :  { %v1506_v57 = vsub.f32 1.0, %v1505_v10  ;;  %1828 = vmatpush.msra.mxu3 %v5413_v33  ;;  %v5419_v10 = vld [vmem:[%s5947_s3 + $0xb0] sm:$0xff]  ;;  %vm1514_vm11 = vcmp.eq.f32.partialorder %v1513_v11, 8.507059e+37  ;;  %v5482_v11 = vld [vmem:[%s5946_s2 + $0x58] sm:$0xff]  ;;  %vm1531_vm14 = vmor %vm1529_vm13, %vm1530_vm12 }
 0x3fb   :  { %6528 = vst [vmem:[#allocation89_spill] sm:$0xff] %v5419_v10  ;;  %1848 = vmatpush.msra.mxu0 %v5419_v10  ;;  %1809 = vmatpush.msrb.mxu2 %v5426_v56  ;;  %v5432_v33 = vld [vmem:[%s5947_s3 + $0x90] sm:$0xff]  ;;  %v5445_v56 = vld [vmem:[%s5946_s2 + $0x88] sm:$0xff]  ;;  %v1526_v60 = vsub.f32 1.0, %v1525_v28 }
 0x3fc   :  { %v1507_v45 = vmul.f32 %v2546_v5, %v1506_v57  ;;  %6530 = vst [vmem:[#allocation91_spill] sm:$0xff] %v5432_v33  ;;  %1829 = vmatpush.msra.mxu3 %v5432_v33  ;;  %v5438_v57 = vld [vmem:[%s5947_s3 + $0x98] sm:$0xff]  ;;  %v1516_v33 = vor.u32 1.1754944e-38, %v1515_v3  ;;  %v5464_v3 = vld [vmem:[%s5946_s2 + $0x70] sm:$0xff] }
 0x3fd   :  { %1849 = vmatpush.msra.mxu0 %v5438_v57  ;;  %6531 = vst [vmem:[#allocation65_spill] sm:$0xff] %v5445_v56  ;;  %1810 = vmatpush.msrb.mxu2 %v5445_v56 }
 0x3fe   :  { %v1508_v10 = vadd.f32 %v2546_v5, %v1507_v45  ;;  %1830 = vmatpush.msra.mxu3 %v5451_v49  ;;  %v1539_v45 = vadd.f32 %v4991_v9, %v1449_v6  ;;  %6533 = vst [vmem:[#allocation93_spill] sm:$0xff] %v5464_v3  ;;  %v5470_v49 = vld [vmem:[%s5947_s3 + $0x60] sm:$0xff]  ;;  %v5476_v6 = vld [vmem:[%s5947_s3 + $0x68] sm:$0xff] }
 0x3ff   :  { %1850 = vmatpush.msra.mxu0 %v5457_v13  ;;  %1811 = vmatpush.msrb.mxu2 %v5464_v3  ;;  %6534 = vst [vmem:[#allocation94_spill] sm:$0xff] %v5470_v49 }
 0x400   :  { %v1512_v56 = vsel %vm1511_vm10, %v2546_v5, %v1508_v10  ;;  %1831 = vmatpush.msra.mxu3 %v5470_v49  ;;  %6535 = vst [vmem:[#allocation95_spill] sm:$0xff] %v5476_v6  ;;  %v5495_v10 = vld [vmem:[%s5947_s3 + $0x50] sm:$0xff] }
 0x401   :  { %v1517_v28 = vsel %vm1514_vm11, %v1516_v33, %v1512_v56  ;;  %1851 = vmatpush.msra.mxu0 %v5476_v6  ;;  %6536 = vst [vmem:[#allocation15_spill] sm:$0xff] %v5482_v11  ;;  %1812 = vmatpush.msrb.mxu2 %v5482_v11  ;;  %v1527_v56 = vmul.f32 %v5380_v31, %v1526_v60  ;;  %v5489_v33 = vld [vmem:[%s5947_s3 + $0x48] sm:$0xff]  ;;  %v5502_v60 = vld [vmem:[%s5946_s2 + $0x40] sm:$0xff] }
 0x402   :  { %v1540_v5 = vmul.f32 %v1539_v45, %v1517_v28  ;;  %6537 = vst [vmem:[#allocation7_spill] sm:$0xff] %v5489_v33  ;;  %1832 = vmatpush.msra.mxu3 %v5489_v33  ;;  %v6539_v45 = vld [vmem:[#allocation63_spill] sm:$0xff]  ;;  %v5508_v33 = vld [vmem:[%s5947_s3 + $0x30] sm:$0xff] }
 0x403   :  { %6538 = vst [vmem:[#allocation10_spill] sm:$0xff] %v5495_v10  ;;  %1852 = vmatpush.msra.mxu0 %v5495_v10  ;;  %1813 = vmatpush.msrb.mxu2 %v5502_v60  ;;  %v5514_v10 = vld [vmem:[%s5947_s3 + $0x38] sm:$0xff] }
 0x404   :  { %v1541_v28 = vadd.f32 %v1540_v5, %v6539_v45  ;;  %6540 = vst [vmem:[#allocation8_spill] sm:$0xff] %v5502_v60  ;;  %1833 = vmatpush.msra.mxu3 %v5508_v33  ;;  %v5520_v5 = vld [vmem:[%s5946_s2 + $0x28] sm:$0xff]  ;;  %v1528_v45 = vadd.f32 %v5380_v31, %v1527_v56  ;;  %v5541_v56 = vld [vmem:[%s5946_s2 + $0x10] sm:$0xff] }
 0x405   :  { %6541 = vst [vmem:[#allocation12_spill] sm:$0xff] %v5508_v33  ;;  %1853 = vmatpush.msra.mxu0 %v5514_v10  ;;  %1814 = vmatpush.msrb.mxu2 %v5520_v5  ;;  %v5528_v33 = vld [vmem:[%s5947_s3 + $0x18] sm:$0xff] }
 0x406   :  { %6542 = vst [vmem:[#allocation9_spill] sm:$0xff] %v5514_v10  ;;  %2549 = vtanh.f32 %v1541_v28  ;;  %1834 = vmatpush.msra.mxu3 %v5528_v33  ;;  %v5534_v28 = vld [vmem:[%s5947_s3 + $0x20] sm:$0xff] }
 0x407   :  { %6543 = vst [vmem:[#allocation23_spill] sm:$0xff] %v5520_v5  ;;  %1854 = vmatpush.msra.mxu0 %v5534_v28  ;;  %v1535_v5 = vand.u32 2147483648, %v5284_v16  ;;  %1815 = vmatpush.msrb.mxu2 %v5541_v56  ;;  %v5549_v10 = vld [vmem:[%s5947_s3] sm:$0xff] }
 0x408   :  { %6544 = vst [vmem:[#allocation11_spill] sm:$0xff] %v5528_v33  ;;  %v1533_v33 = vand.u32 2147483647, %v5284_v16  ;;  %1835 = vmatpush.msra.mxu3 %v5549_v10 }
 0x409   :  { %6545 = vst [vmem:[#allocation13_spill] sm:$0xff] %v5534_v28  ;;  %v5555_v28 = vld [vmem:[%s5947_s3 + $0x8] sm:$0xff]  ;;  %v1536_v11 = vor.u32 1.1754944e-38, %v1535_v5 }
 0x40a   :  { %6546 = vst [vmem:[#allocation14_spill] sm:$0xff] %v5541_v56  ;;  %1855 = vmatpush.msra.mxu0 %v5555_v28  ;;  %v1532_v56 = vsel %vm1531_vm14, %v5380_v31, %v1528_v45  ;;  %vm1534_vm15 = vcmp.eq.f32.partialorder %v1533_v33, 8.507059e+37  ;;  %v5584_v31 = vld [vmem:[%s5947_s3 + $0x148] sm:$0xff] }
 0x40b   :  { %6547 = vst [vmem:[#allocation16_spill] sm:$0xff] %v5555_v28  ;;  %v1537_v6 = vsel %vm1534_vm15, %v1536_v11, %v1532_v56  ;;  %v5568_v28 = vld [vmem:[%s5947_s3 + $0x178] sm:$0xff] }
 0x40c   :  { %v2550_v60 = vpop.eup %2549 }
 0x40d   :  { %v1543_v16 = vsub.f32 %v5023_v34, %v2550_v60 }
 0x40f   :  { %v1544_v49 = vmul.f32 %v1543_v16, %v1537_v6 }
 0x411   :  { %v5560_v3 = vadd.f32 %v2550_v60, %v1544_v49  ;;  %v5576_v49 = vld [vmem:[%s5947_s3 + $0x160] sm:$0xff] }
 0x413   :  { %1622 = vmatmul.f32.vlgmr.msra.gmra.mxu1 %v5560_v3  ;;  %1642 = vmatmul.f32.vlgmr.msra.gmra.mxu2 %v5560_v3 }
 0x414   :  { %1662 = vmatmul.f32.vlgmr.msrb.gmra.mxu3 %v5560_v3  ;;  %1860 = vmatpush.msra.mxu1 %v5568_v28 }
 0x415   :  { %1974 = vmatpush.msra.mxu2 %v5032_v15  ;;  %1994 = vmatpush.msrb.mxu3 %v5038_v22  ;;  %v5592_v15 = vld [vmem:[%s5947_s3 + $0x130] sm:$0xff]  ;;  %v5600_v22 = vld [vmem:[%s5947_s3 + $0x118] sm:$0xff] }
 0x416   :  { %1861 = vmatpush.msra.mxu1 %v5576_v49 }
 0x417   :  { %1975 = vmatpush.msra.mxu2 %v5045_v21  ;;  %1995 = vmatpush.msrb.mxu3 %v5051_v17  ;;  %v5608_v21 = vld [vmem:[%s5947_s3 + $0x100] sm:$0xff]  ;;  %v5616_v17 = vld [vmem:[%s5947_s3 + $0xe8] sm:$0xff] }
 0x418   :  { %1862 = vmatpush.msra.mxu1 %v5584_v31 }
 0x419   :  { %1976 = vmatpush.msra.mxu2 %v5058_v62  ;;  %1996 = vmatpush.msrb.mxu3 %v5064_v44  ;;  %v5624_v62 = vld [vmem:[%s5947_s3 + $0xd0] sm:$0xff]  ;;  %v5632_v44 = vld [vmem:[%s5947_s3 + $0xb8] sm:$0xff] }
 0x41a   :  { %1863 = vmatpush.msra.mxu1 %v5592_v15 }
 0x41b   :  { %1977 = vmatpush.msra.mxu2 %v5071_v2  ;;  %1997 = vmatpush.msrb.mxu3 %v5077_v61  ;;  %v5640_v2 = vld [vmem:[%s5947_s3 + $0xa0] sm:$0xff]  ;;  %v5648_v61 = vld [vmem:[%s5947_s3 + $0x88] sm:$0xff] }
 0x41c   :  { %1864 = vmatpush.msra.mxu1 %v5600_v22 }
 0x41d   :  { %1978 = vmatpush.msra.mxu2 %v5084_v55  ;;  %1998 = vmatpush.msrb.mxu3 %v5090_v27  ;;  %v5656_v55 = vld [vmem:[%s5947_s3 + $0x70] sm:$0xff]  ;;  %v5664_v27 = vld [vmem:[%s5947_s3 + $0x58] sm:$0xff] }
 0x41e   :  { %1865 = vmatpush.msra.mxu1 %v5608_v21 }
 0x41f   :  { %1979 = vmatpush.msra.mxu2 %v5097_v20  ;;  %1999 = vmatpush.msrb.mxu3 %v5103_v47  ;;  %v5672_v20 = vld [vmem:[%s5947_s3 + $0x40] sm:$0xff]  ;;  %v5680_v47 = vld [vmem:[%s5947_s3 + $0x28] sm:$0xff] }
 0x420   :  { %1866 = vmatpush.msra.mxu1 %v5616_v17 }
 0x421   :  { %1980 = vmatpush.msra.mxu2 %v5110_v26  ;;  %2000 = vmatpush.msrb.mxu3 %v5116_v19  ;;  %v5688_v26 = vld [vmem:[%s5947_s3 + $0x10] sm:$0xff] }
 0x422   :  { %1867 = vmatpush.msra.mxu1 %v5624_v62 }
 0x423   :  { %1981 = vmatpush.msra.mxu2 %v5123_v63  ;;  %2001 = vmatpush.msrb.mxu3 %v5129_v0  ;;  %v6548_v0 = vld [vmem:[#allocation6_spill] sm:$0xff] }
 0x424   :  { %1868 = vmatpush.msra.mxu1 %v5632_v44 }
 0x425   :  { %1982 = vmatpush.msra.mxu2 %v5136_v42  ;;  %2002 = vmatpush.msrb.mxu3 %v5142_v7  ;;  %v6549_v7 = vld [vmem:[#allocation2_spill] sm:$0xff] }
 0x426   :  { %1869 = vmatpush.msra.mxu1 %v5640_v2 }
 0x427   :  { %1983 = vmatpush.msra.mxu2 %v5149_v24  ;;  %2003 = vmatpush.msrb.mxu3 %v5155_v23 }
 0x428   :  { %1870 = vmatpush.msra.mxu1 %v5648_v61 }
 0x429   :  { %1984 = vmatpush.msra.mxu2 %v5162_v30  ;;  %2004 = vmatpush.msrb.mxu3 %v5168_v58 }
 0x42a   :  { %1871 = vmatpush.msra.mxu1 %v5656_v55 }
 0x42b   :  { %1985 = vmatpush.msra.mxu2 %v5175_v50  ;;  %2005 = vmatpush.msrb.mxu3 %v5181_v48 }
 0x42c   :  { %1872 = vmatpush.msra.mxu1 %v5664_v27 }
 0x42d   :  { %1986 = vmatpush.msra.mxu2 %v5188_v46  ;;  %2006 = vmatpush.msrb.mxu3 %v5194_v41 }
 0x42e   :  { %1873 = vmatpush.msra.mxu1 %v5672_v20 }
 0x42f   :  { %1987 = vmatpush.msra.mxu2 %v5201_v54  ;;  %2007 = vmatpush.msrb.mxu3 %v5207_v4 }
 0x430   :  { %1874 = vmatpush.msra.mxu1 %v5680_v47 }
 0x431   :  { %1988 = vmatpush.msra.mxu2 %v5214_v38  ;;  %2008 = vmatpush.msrb.mxu3 %v5220_v18 }
 0x432   :  { %1875 = vmatpush.msra.mxu1 %v5688_v26 }
 0x433   :  { %1989 = vmatpush.msra.mxu2 %v5227_v1  ;;  %2009 = vmatpush.msrb.mxu3 %v5233_v53 }
 0x466   :  { %v1603_v11 = vpop.f32.mrf.mxu0 }
 0x467   :  { %v1706_v45 = vadd.f32 %v4948_v40, %v1603_v11 }
 0x46b   :  { %v1563_v19 = vpop.f32.mrf.mxu2  ;;  %v1583_v63 = vpop.f32.mrf.mxu3 }
 0x46c   :  { %v1666_v42 = vadd.f32 %v1563_v19, %v6548_v0  ;;  %v1686_v24 = vadd.f32 %v1583_v63, %v6549_v7  ;;  %v6550_v0 = vld [vmem:[#allocation34_spill] sm:$0xff] }
 0x46e   :  { %v2420_v23 = vmul.f32 -1.442695, %v1666_v42  ;;  %v2421_v30 = vmul.f32 -1.442695, %v1686_v24 }
 0x470   :  { %2551 = vpow2.f32 %v2420_v23 }
 0x471   :  { %2553 = vpow2.f32 %v2421_v30  ;;  %v6551_v30 = vld [vmem:[#allocation37_spill] sm:$0xff] }
 0x476   :  { %v2552_v58 = vpop.eup %2551 }
 0x477   :  { %v2554_v50 = vpop.eup %2553  ;;  %v1670_v48 = vadd.f32 1.0, %v2552_v58 }
 0x478   :  { %v1690_v46 = vadd.f32 1.0, %v2554_v50 }
 0x479   :  { %2555 = vrcp.f32 %v1670_v48  ;;  %v1682_v18 = vand.u32 2147483648, %v1670_v48  ;;  %v1680_v6 = vand.u32 2147483647, %v1670_v48  ;;  %vm1676_vm1 = vweird.f32 %v1670_v48 }
 0x47a   :  { %2557 = vrcp.f32 %v1690_v46  ;;  %v1702_v23 = vand.u32 2147483648, %v1690_v46  ;;  %vm1696_vm5 = vweird.f32 %v1690_v46  ;;  %v1700_v50 = vand.u32 2147483647, %v1690_v46 }
 0x47b   :  { %v1683_v60 = vor.u32 1.1754944e-38, %v1682_v18  ;;  %vm1681_vm3 = vcmp.eq.f32.partialorder %v1680_v6, 8.507059e+37 }
 0x47c   :  { %vm1701_vm7 = vcmp.eq.f32.partialorder %v1700_v50, 8.507059e+37 }
 0x47f   :  { %v2556_v41 = vpop.eup %2555 }
 0x480   :  { %v2558_v54 = vpop.eup %2557  ;;  %v1672_v4 = vmul.f32 %v2556_v41, %v1670_v48  ;;  %vm1677_vm0 = vweird.f32 %v2556_v41 }
 0x481   :  { %v1692_v1 = vmul.f32 %v2558_v54, %v1690_v46  ;;  %vm1678_vm2 = vmor %vm1676_vm1, %vm1677_vm0  ;;  %vm1697_vm4 = vweird.f32 %v2558_v54 }
 0x482   :  { %v1673_v38 = vsub.f32 1.0, %v1672_v4  ;;  %vm1698_vm6 = vmor %vm1696_vm5, %vm1697_vm4 }
 0x483   :  { %v1693_v5 = vsub.f32 1.0, %v1692_v1  ;;  %v6552_v1 = vld [vmem:[#allocation50_spill] sm:$0xff] }
 0x484   :  { %v1674_v53 = vmul.f32 %v2556_v41, %v1673_v38 }
 0x485   :  { %v1694_v63 = vmul.f32 %v2558_v54, %v1693_v5 }
 0x486   :  { %v1675_v33 = vadd.f32 %v2556_v41, %v1674_v53 }
 0x487   :  { %v1695_v7 = vadd.f32 %v2558_v54, %v1694_v63 }
 0x488   :  { %v1679_v56 = vsel %vm1678_vm2, %v2556_v41, %v1675_v33  ;;  %v1703_v41 = vor.u32 1.1754944e-38, %v1702_v23  ;;  %v6563_v23 = vld [vmem:[#allocation86_spill] sm:$0xff] }
 0x489   :  { %v1684_v16 = vsel %vm1681_vm3, %v1683_v60, %v1679_v56  ;;  %v1699_v4 = vsel %vm1698_vm6, %v2558_v54, %v1695_v7  ;;  %v6558_v56 = vld [vmem:[#allocation68_spill] sm:$0xff] }
 0x48a   :  { %v1707_v19 = vmul.f32 %v1706_v45, %v1684_v16  ;;  %v1704_v6 = vsel %vm1701_vm7, %v1703_v41, %v1699_v4  ;;  %v6566_v41 = vld [vmem:[#allocation89_spill] sm:$0xff] }
 0x48c   :  { %v1708_v42 = vadd.f32 %v1707_v19, %v6550_v0  ;;  %v6560_v19 = vld [vmem:[#allocation70_spill] sm:$0xff] }
 0x48e   :  { %2559 = vtanh.f32 %v1708_v42  ;;  %v6561_v42 = vld [vmem:[#allocation71_spill] sm:$0xff] }
 0x490   :  { %v1623_v24 = vpop.f32.mrf.mxu1 }
 0x491   :  { %v1713_v58 = vadd.f32 %v1623_v24, %v6551_v30  ;;  %v6562_v24 = vld [vmem:[#allocation4_spill] sm:$0xff] }
 0x493   :  { %v2422_v48 = vmul.f32 -1.442695, %v1713_v58 }
 0x494   :  { %v2560_v40 = vpop.eup %2559 }
 0x495   :  { %2561 = vpow2.f32 %v2422_v48  ;;  %v1710_v18 = vsub.f32 %v5243_v39, %v2560_v40  ;;  %v6564_v48 = vld [vmem:[#allocation87_spill] sm:$0xff] }
 0x496   :  { %v1643_v38 = vpop.f32.mrf.mxu2 }
 0x497   :  { %v1733_v53 = vadd.f32 %v1643_v38, %v6552_v1  ;;  %v1711_v11 = vmul.f32 %v1710_v18, %v1704_v6  ;;  %v1663_v16 = vpop.f32.mrf.mxu3  ;;  %v6567_v18 = vld [vmem:[#allocation90_spill] sm:$0xff] }
 0x498   :  { %v1753_v50 = vadd.f32 %v4991_v9, %v1663_v16  ;;  %v6569_v6 = vld [vmem:[#allocation62_spill] sm:$0xff]  ;;  %v6571_v9 = vld [vmem:[#allocation92_spill] sm:$0xff]  ;;  %v6583_v16 = vld [vmem:[#allocation13_spill] sm:$0xff] }
 0x499   :  { %v2423_v33 = vmul.f32 -1.442695, %v1733_v53  ;;  %v5700_v60 = vadd.f32 %v2560_v40, %v1711_v11  ;;  %v6565_v40 = vld [vmem:[#allocation88_spill] sm:$0xff]  ;;  %v6568_v53 = vld [vmem:[#allocation91_spill] sm:$0xff] }
 0x49b   :  { %v2562_v5 = vpop.eup %2561  ;;  %2563 = vpow2.f32 %v2423_v33  ;;  %1776 = vmatmul.f32.vlgmr.msrb.gmra.mxu0 %v5700_v60  ;;  %1796 = vmatmul.f32.vlgmr.msrb.gmra.mxu1 %v5700_v60  ;;  %v6570_v33 = vld [vmem:[#allocation65_spill] sm:$0xff] }
 0x49c   :  { %v1717_v46 = vadd.f32 1.0, %v2562_v5  ;;  %1816 = vmatmul.f32.vlgmr.msrb.gmra.mxu2 %v5700_v60  ;;  %2014 = vmatpush.msrb.mxu0 %v5251_v36  ;;  %v6572_v5 = vld [vmem:[#allocation93_spill] sm:$0xff] }
 0x49d   :  { %2034 = vmatpush.msrb.mxu1 %v5257_v14  ;;  %2054 = vmatpush.msrb.mxu2 %v5263_v35  ;;  %v6553_v35 = vld [vmem:[#allocation52_spill] sm:$0xff] }
 0x49e   :  { %2565 = vrcp.f32 %v1717_v46  ;;  %2015 = vmatpush.msrb.mxu0 %v5269_v8  ;;  %v6554_v8 = vld [vmem:[#allocation53_spill] sm:$0xff]  ;;  %vm1723_vm9 = vweird.f32 %v1717_v46 }
 0x49f   :  { %2035 = vmatpush.msrb.mxu1 %v5275_v29  ;;  %2055 = vmatpush.msrb.mxu2 %v5281_v32  ;;  %v6555_v32 = vld [vmem:[#allocation55_spill] sm:$0xff] }
 0x4a0   :  { %2016 = vmatpush.msrb.mxu0 %v5289_v59  ;;  %v1729_v59 = vand.u32 2147483648, %v1717_v46 }
 0x4a1   :  { %v2564_v54 = vpop.eup %2563  ;;  %2036 = vmatpush.msrb.mxu1 %v5297_v43  ;;  %2056 = vmatpush.msrb.mxu2 %v5303_v37  ;;  %v6556_v43 = vld [vmem:[#allocation18_spill] sm:$0xff]  ;;  %v6557_v37 = vld [vmem:[#allocation67_spill] sm:$0xff] }
 0x4a2   :  { %v5712_v45 = vadd.f32 1.0, %v2564_v54  ;;  %2017 = vmatpush.msrb.mxu0 %v5309_v51  ;;  %v1730_v7 = vor.u32 1.1754944e-38, %v1729_v59  ;;  %v6573_v54 = vld [vmem:[#allocation94_spill] sm:$0xff]  ;;  %v6579_v59 = vld [vmem:[#allocation12_spill] sm:$0xff] }
 0x4a3   :  { %2037 = vmatpush.msrb.mxu1 %v5316_v12  ;;  %2057 = vmatpush.msrb.mxu2 %v5322_v25  ;;  %v1727_v12 = vand.u32 2147483647, %v1717_v46 }
 0x4a4   :  { %v2566_v36 = vpop.eup %2565  ;;  %2567 = vrcp.f32 %v5712_v45  ;;  %2018 = vmatpush.msrb.mxu0 %v5329_v52  ;;  %v6559_v52 = vld [vmem:[#allocation69_spill] sm:$0xff]  ;;  %vm1743_vm13 = vweird.f32 %v5712_v45 }
 0x4a5   :  { %v1719_v14 = vmul.f32 %v2566_v36, %v1717_v46  ;;  %2038 = vmatpush.msrb.mxu1 %v6553_v35  ;;  %2058 = vmatpush.msrb.mxu2 %v6554_v8  ;;  %vm1724_vm8 = vweird.f32 %v2566_v36  ;;  %vm1728_vm11 = vcmp.eq.f32.partialorder %v1727_v12, 8.507059e+37  ;;  %v1747_v35 = vand.u32 2147483647, %v5712_v45  ;;  %v6576_v8 = vld [vmem:[#allocation7_spill] sm:$0xff] }
 0x4a6   :  { %2019 = vmatpush.msrb.mxu0 %v6555_v32  ;;  %vm1725_vm10 = vmor %vm1723_vm9, %vm1724_vm8  ;;  %v6581_v12 = vld [vmem:[#allocation23_spill] sm:$0xff] }
 0x4a7   :  { %v1720_v29 = vsub.f32 1.0, %v1719_v14  ;;  %2039 = vmatpush.msrb.mxu1 %v6556_v43  ;;  %2059 = vmatpush.msrb.mxu2 %v6557_v37  ;;  %v1749_v14 = vand.u32 2147483648, %v5712_v45  ;;  %v6580_v43 = vld [vmem:[#allocation9_spill] sm:$0xff]  ;;  %vm1748_vm15 = vcmp.eq.f32.partialorder %v1747_v35, 8.507059e+37 }
 0x4a8   :  { %2020 = vmatpush.msrb.mxu0 %v6558_v56 }
 0x4a9   :  { %v1721_v51 = vmul.f32 %v2566_v36, %v1720_v29  ;;  %2040 = vmatpush.msrb.mxu1 %v6559_v52  ;;  %2060 = vmatpush.msrb.mxu2 %v6560_v19  ;;  %v6578_v29 = vld [vmem:[#allocation8_spill] sm:$0xff]  ;;  %v6584_v19 = vld [vmem:[#allocation14_spill] sm:$0xff] }
 0x4aa   :  { %v2568_v25 = vpop.eup %2567  ;;  %2021 = vmatpush.msrb.mxu0 %v6561_v42 }
 0x4ab   :  { %v1739_v63 = vmul.f32 %v2568_v25, %v5712_v45  ;;  %v1722_v0 = vadd.f32 %v2566_v36, %v1721_v51  ;;  %2041 = vmatpush.msrb.mxu1 %v6562_v24  ;;  %2061 = vmatpush.msrb.mxu2 %v6563_v23  ;;  %vm1744_vm12 = vweird.f32 %v2568_v25  ;;  %v1750_v51 = vor.u32 1.1754944e-38, %v1749_v14  ;;  %v6582_v45 = vld [vmem:[#allocation11_spill] sm:$0xff] }
 0x4ac   :  { %2022 = vmatpush.msrb.mxu0 %v6564_v48  ;;  %vm1745_vm14 = vmor %vm1743_vm13, %vm1744_vm12 }
 0x4ad   :  { %v1740_v30 = vsub.f32 1.0, %v1739_v63  ;;  %v1726_v58 = vsel %vm1725_vm10, %v2566_v36, %v1722_v0  ;;  %2042 = vmatpush.msrb.mxu1 %v6565_v40  ;;  %2062 = vmatpush.msrb.mxu2 %v6566_v41  ;;  %v6574_v36 = vld [vmem:[#allocation95_spill] sm:$0xff] }
 0x4ae   :  { %v1731_v4 = vsel %vm1728_vm11, %v1730_v7, %v1726_v58  ;;  %2023 = vmatpush.msrb.mxu0 %v6567_v18 }
 0x4af   :  { %v1754_v38 = vmul.f32 %v1753_v50, %v1731_v4  ;;  %v1741_v1 = vmul.f32 %v2568_v25, %v1740_v30  ;;  %2043 = vmatpush.msrb.mxu1 %v6568_v53  ;;  %2063 = vmatpush.msrb.mxu2 %v5438_v57  ;;  %v6575_v57 = vld [vmem:[#allocation15_spill] sm:$0xff]  ;;  %v5789_v4 = vld [vmem:[%s5948_s4] sm:$0xff] }
 0x4b0   :  { %2024 = vmatpush.msrb.mxu0 %v6570_v33 }
 0x4b1   :  { %v1755_v11 = vadd.f32 %v1754_v38, %v6569_v6  ;;  %2044 = vmatpush.msrb.mxu1 %v6571_v9  ;;  %2064 = vmatpush.msrb.mxu2 %v5457_v13  ;;  %v1742_v46 = vadd.f32 %v2568_v25, %v1741_v1  ;;  %v6577_v13 = vld [vmem:[#allocation10_spill] sm:$0xff]  ;;  %v6588_v1 = vld [vmem:[#allocation44_spill] sm:$0xff] }
 0x4b2   :  { %2025 = vmatpush.msrb.mxu0 %v6572_v5  ;;  %v6589_v9 = vld [vmem:[#allocation48_spill] sm:$0xff] }
 0x4b3   :  { %2569 = vtanh.f32 %v1755_v11  ;;  %2045 = vmatpush.msrb.mxu1 %v6573_v54  ;;  %2065 = vmatpush.msrb.mxu2 %v6574_v36  ;;  %v1746_v32 = vsel %vm1745_vm14, %v2568_v25, %v1742_v46  ;;  %v6585_v25 = vld [vmem:[#allocation16_spill] sm:$0xff] }
 0x4b4   :  { %2026 = vmatpush.msrb.mxu0 %v6575_v57  ;;  %v1751_v52 = vsel %vm1748_vm15, %v1750_v51, %v1746_v32 }
 0x4b5   :  { %2046 = vmatpush.msrb.mxu1 %v6576_v8  ;;  %2066 = vmatpush.msrb.mxu2 %v6577_v13  ;;  %v6590_v13 = vld [vmem:[#allocation38_spill] sm:$0xff] }
 0x4b6   :  { %2027 = vmatpush.msrb.mxu0 %v6578_v29 }
 0x4b7   :  { %2047 = vmatpush.msrb.mxu1 %v6579_v59  ;;  %2067 = vmatpush.msrb.mxu2 %v6580_v43 }
 0x4b8   :  { %2028 = vmatpush.msrb.mxu0 %v6581_v12 }
 0x4b9   :  { %v2570_v37 = vpop.eup %2569  ;;  %2048 = vmatpush.msrb.mxu1 %v6582_v45  ;;  %2068 = vmatpush.msrb.mxu2 %v6583_v16 }
 0x4ba   :  { %v1757_v56 = vsub.f32 %v5560_v3, %v2570_v37  ;;  %2029 = vmatpush.msrb.mxu0 %v6584_v19 }
 0x4bb   :  { %2049 = vmatpush.msrb.mxu1 %v5549_v10  ;;  %2069 = vmatpush.msrb.mxu2 %v6585_v25 }
 0x4bc   :  { %v1758_v63 = vmul.f32 %v1757_v56, %v1751_v52 }
 0x4be   :  { %v5763_v0 = vadd.f32 %v2570_v37, %v1758_v63 }
 0x4c0   :  { %1836 = vmatmul.f32.vlgmr.msra.gmra.mxu3 %v5763_v0  ;;  %1856 = vmatmul.f32.vlgmr.msra.gmra.mxu0 %v5763_v0 }
 0x4c1   :  { %1876 = vmatmul.f32.vlgmr.msra.gmra.mxu1 %v5763_v0  ;;  %2074 = vmatpush.msra.mxu3 %v5568_v28 }
 0x4c3   :  { %2075 = vmatpush.msra.mxu3 %v5576_v49  ;;  %v6586_v49 = vld [vmem:[#allocation17_spill] sm:$0xff] }
 0x4c5   :  { %2076 = vmatpush.msra.mxu3 %v5584_v31 }
 0x4c7   :  { %2077 = vmatpush.msra.mxu3 %v5592_v15  ;;  %v6587_v15 = vld [vmem:[#allocation57_spill] sm:$0xff] }
 0x4c9   :  { %2078 = vmatpush.msra.mxu3 %v5600_v22 }
 0x4cb   :  { %2079 = vmatpush.msra.mxu3 %v5608_v21 }
 0x4cd   :  { %2080 = vmatpush.msra.mxu3 %v5616_v17 }
 0x4cf   :  { %2081 = vmatpush.msra.mxu3 %v5624_v62 }
 0x4d1   :  { %2082 = vmatpush.msra.mxu3 %v5632_v44 }
 0x4d3   :  { %2083 = vmatpush.msra.mxu3 %v5640_v2 }
 0x4d5   :  { %2084 = vmatpush.msra.mxu3 %v5648_v61 }
 0x4d7   :  { %2085 = vmatpush.msra.mxu3 %v5656_v55 }
 0x4d9   :  { %2086 = vmatpush.msra.mxu3 %v5664_v27 }
 0x4db   :  { %2087 = vmatpush.msra.mxu3 %v5672_v20 }
 0x4dd   :  { %2088 = vmatpush.msra.mxu3 %v5680_v47 }
 0x4df   :  { %2089 = vmatpush.msra.mxu3 %v5688_v26 }
 0x518   :  { %v1777_v10 = vpop.f32.mrf.mxu0  ;;  %v1797_v28 = vpop.f32.mrf.mxu1 }
 0x519   :  { %v1880_v31 = vadd.f32 %v1777_v10, %v6586_v49  ;;  %v1900_v22 = vadd.f32 %v1797_v28, %v6587_v15 }
 0x51b   :  { %v2424_v21 = vmul.f32 -1.442695, %v1880_v31  ;;  %v2425_v17 = vmul.f32 -1.442695, %v1900_v22 }
 0x51d   :  { %2571 = vpow2.f32 %v2424_v21 }
 0x51e   :  { %2573 = vpow2.f32 %v2425_v17  ;;  %v5804_v17 = vld [vmem:[%s5948_s4 + $0x8] sm:$0xff] }
 0x51f   :  { %v1817_v23 = vpop.f32.mrf.mxu2 }
 0x520   :  { %v1920_v40 = vadd.f32 %v5789_v4, %v1817_v23 }
 0x523   :  { %v2572_v62 = vpop.eup %2571 }
 0x524   :  { %v2574_v44 = vpop.eup %2573  ;;  %v1884_v2 = vadd.f32 1.0, %v2572_v62 }
 0x525   :  { %v1904_v61 = vadd.f32 1.0, %v2574_v44 }
 0x526   :  { %2575 = vrcp.f32 %v1884_v2  ;;  %v1896_v42 = vand.u32 2147483648, %v1884_v2  ;;  %v1894_v24 = vand.u32 2147483647, %v1884_v2  ;;  %vm1890_vm1 = vweird.f32 %v1884_v2 }
 0x527   :  { %2577 = vrcp.f32 %v1904_v61  ;;  %v1916_v33 = vand.u32 2147483648, %v1904_v61  ;;  %vm1910_vm5 = vweird.f32 %v1904_v61  ;;  %v1914_v46 = vand.u32 2147483647, %v1904_v61 }
 0x528   :  { %v1897_v50 = vor.u32 1.1754944e-38, %v1896_v42  ;;  %vm1895_vm3 = vcmp.eq.f32.partialorder %v1894_v24, 8.507059e+37 }
 0x529   :  { %v1917_v57 = vor.u32 1.1754944e-38, %v1916_v33  ;;  %vm1915_vm7 = vcmp.eq.f32.partialorder %v1914_v46, 8.507059e+37 }
 0x52c   :  { %v2576_v55 = vpop.eup %2575 }
 0x52d   :  { %v2578_v27 = vpop.eup %2577  ;;  %v1886_v20 = vmul.f32 %v2576_v55, %v1884_v2  ;;  %vm1891_vm0 = vweird.f32 %v2576_v55 }
 0x52e   :  { %v1906_v26 = vmul.f32 %v2578_v27, %v1904_v61  ;;  %vm1892_vm2 = vmor %vm1890_vm1, %vm1891_vm0  ;;  %vm1911_vm4 = vweird.f32 %v2578_v27 }
 0x52f   :  { %v1887_v47 = vsub.f32 1.0, %v1886_v20  ;;  %vm1912_vm6 = vmor %vm1910_vm5, %vm1911_vm4 }
 0x530   :  { %v1907_v58 = vsub.f32 1.0, %v1906_v26 }
 0x531   :  { %v1888_v7 = vmul.f32 %v2576_v55, %v1887_v47 }
 0x532   :  { %v1908_v18 = vmul.f32 %v2578_v27, %v1907_v58 }
 0x533   :  { %v1889_v30 = vadd.f32 %v2576_v55, %v1888_v7 }
 0x534   :  { %v1909_v6 = vadd.f32 %v2578_v27, %v1908_v18 }
 0x535   :  { %v1893_v48 = vsel %vm1892_vm2, %v2576_v55, %v1889_v30 }
 0x536   :  { %v1898_v41 = vsel %vm1895_vm3, %v1897_v50, %v1893_v48  ;;  %v1913_v36 = vsel %vm1912_vm6, %v2578_v27, %v1909_v6  ;;  %v6591_v27 = vld [vmem:[#allocation61_spill] sm:$0xff] }
 0x537   :  { %v1921_v38 = vmul.f32 %v1920_v40, %v1898_v41  ;;  %v1918_v32 = vsel %vm1915_vm7, %v1917_v57, %v1913_v36 }
 0x539   :  { %v1922_v53 = vadd.f32 %v1921_v38, %v6588_v1  ;;  %v6592_v38 = vld [vmem:[#allocation20_spill] sm:$0xff]  ;;  %v6593_v1 = vld [vmem:[#allocation59_spill] sm:$0xff] }
 0x53b   :  { %2579 = vtanh.f32 %v1922_v53 }
 0x53d   :  { %v1857_v11 = vpop.f32.mrf.mxu0 }
 0x53e   :  { %v1947_v5 = vadd.f32 %v1857_v11, %v6589_v9  ;;  %v1877_v31 = vpop.f32.mrf.mxu1 }
 0x53f   :  { %v1967_v62 = vadd.f32 %v5804_v17, %v1877_v31 }
 0x540   :  { %v2427_v54 = vmul.f32 -1.442695, %v1947_v5 }
 0x541   :  { %v2580_v14 = vpop.eup %2579 }
 0x542   :  { %v1924_v35 = vsub.f32 %v5700_v60, %v2580_v14  ;;  %2581 = vpow2.f32 %v2427_v54 }
 0x543   :  { %v1837_v8 = vpop.f32.mrf.mxu3 }
 0x544   :  { %v1927_v29 = vadd.f32 %v1837_v8, %v6590_v13  ;;  %v1925_v59 = vmul.f32 %v1924_v35, %v1918_v32 }
 0x546   :  { %v2426_v43 = vmul.f32 -1.442695, %v1927_v29  ;;  %v5796_v37 = vadd.f32 %v2580_v14, %v1925_v59 }
 0x548   :  { %2583 = vpow2.f32 %v2426_v43  ;;  %1990 = vmatmul.f32.vlgmr.msra.gmra.mxu2 %v5796_v37  ;;  %2010 = vmatmul.f32.vlgmr.msrb.gmra.mxu3 %v5796_v37  ;;  %v2582_v51 = vpop.eup %2581 }
 0x549   :  { %2030 = vmatmul.f32.vlgmr.msrb.gmra.mxu0 %v5796_v37  ;;  %v1951_v56 = vadd.f32 1.0, %v2582_v51 }
 0x54b   :  { %v1963_v26 = vand.u32 2147483648, %v1951_v56  ;;  %vm1957_vm13 = vweird.f32 %v1951_v56  ;;  %v1961_v42 = vand.u32 2147483647, %v1951_v56 }
 0x54d   :  { %v1964_v23 = vor.u32 1.1754944e-38, %v1963_v26  ;;  %vm1962_vm15 = vcmp.eq.f32.partialorder %v1961_v42, 8.507059e+37 }
 0x54e   :  { %v2584_v12 = vpop.eup %2583 }
 0x54f   :  { %v1931_v45 = vadd.f32 1.0, %v2584_v12 }
 0x551   :  { %2585 = vrcp.f32 %v1931_v45  ;;  %v1943_v10 = vand.u32 2147483648, %v1931_v45  ;;  %v1941_v49 = vand.u32 2147483647, %v1931_v45  ;;  %vm1937_vm9 = vweird.f32 %v1931_v45 }
 0x552   :  { %2587 = vrcp.f32 %v1951_v56 }
 0x553   :  { %v1944_v21 = vor.u32 1.1754944e-38, %v1943_v10  ;;  %vm1942_vm11 = vcmp.eq.f32.partialorder %v1941_v49, 8.507059e+37  ;;  %v6595_v49 = vld [vmem:[#allocation29_spill] sm:$0xff] }
 0x557   :  { %v2586_v16 = vpop.eup %2585 }
 0x558   :  { %v2588_v52 = vpop.eup %2587  ;;  %v1933_v19 = vmul.f32 %v2586_v16, %v1931_v45  ;;  %vm1938_vm8 = vweird.f32 %v2586_v16 }
 0x559   :  { %v1953_v25 = vmul.f32 %v2588_v52, %v1951_v56  ;;  %vm1939_vm10 = vmor %vm1937_vm9, %vm1938_vm8  ;;  %vm1958_vm12 = vweird.f32 %v2588_v52 }
 0x55a   :  { %v1934_v63 = vsub.f32 1.0, %v1933_v19  ;;  %vm1959_vm14 = vmor %vm1957_vm13, %vm1958_vm12  ;;  %v6594_v19 = vld [vmem:[#allocation45_spill] sm:$0xff] }
 0x55b   :  { %v1954_v22 = vsub.f32 1.0, %v1953_v25 }
 0x55c   :  { %v1935_v28 = vmul.f32 %v2586_v16, %v1934_v63 }
 0x55d   :  { %v1955_v55 = vmul.f32 %v2588_v52, %v1954_v22 }
 0x55e   :  { %v1936_v15 = vadd.f32 %v2586_v16, %v1935_v28 }
 0x55f   :  { %v1956_v47 = vadd.f32 %v2588_v52, %v1955_v55 }
 0x560   :  { %v1940_v44 = vsel %vm1939_vm10, %v2586_v16, %v1936_v15 }
 0x561   :  { %v1945_v2 = vsel %vm1942_vm11, %v1944_v21, %v1940_v44  ;;  %v1960_v7 = vsel %vm1959_vm14, %v2588_v52, %v1956_v47 }
 0x562   :  { %v1968_v61 = vmul.f32 %v1967_v62, %v1945_v2  ;;  %v1965_v58 = vsel %vm1962_vm15, %v1964_v23, %v1960_v7 }
 0x564   :  { %v1969_v20 = vadd.f32 %v1968_v61, %v6591_v27  ;;  %v6596_v61 = vld [vmem:[#allocation41_spill] sm:$0xff] }
 0x566   :  { %2589 = vtanh.f32 %v1969_v20 }
 0x56c   :  { %v2590_v24 = vpop.eup %2589 }
 0x56d   :  { %v1971_v30 = vsub.f32 %v5763_v0, %v2590_v24 }
 0x56f   :  { %v1972_v50 = vmul.f32 %v1971_v30, %v1965_v58  ;;  %v6598_v30 = vld [vmem:[#allocation96_spill] sm:$0xff] }
 0x570   :  { %v5830_v58 = vadd.f32 %v5796_v37, %v6598_v30  ;;  %v2211_v30 = vld [vmem:[%s5950_s5 + $0x28] sm:$0xff] }
 0x571   :  { %v5809_v48 = vadd.f32 %v2590_v24, %v1972_v50  ;;  %v6597_v24 = vld [vmem:[#allocation5_spill] sm:$0xff] }
 0x573   :  { %2050 = vmatmul.f32.vlgmr.msrb.gmra.mxu1 %v5809_v48  ;;  %2070 = vmatmul.f32.vlgmr.msrb.gmra.mxu2 %v5809_v48 }
 0x574   :  { %2090 = vmatmul.f32.vlgmr.msra.gmra.mxu3 %v5809_v48 }
 0x5c6   :  { %v2031_v32 = vpop.f32.mrf.mxu0 }
 0x5c7   :  { %v2134_v12 = vadd.f32 %v5789_v4, %v2031_v32 }
 0x5cb   :  { %v1991_v40 = vpop.f32.mrf.mxu2  ;;  %v2011_v41 = vpop.f32.mrf.mxu3 }
 0x5cc   :  { %v2094_v18 = vadd.f32 %v1991_v40, %v6592_v38  ;;  %v2114_v53 = vadd.f32 %v2011_v41, %v6593_v1  ;;  %v6599_v38 = vld [vmem:[#allocation25_spill] sm:$0xff] }
 0x5ce   :  { %v2428_v6 = vmul.f32 -1.442695, %v2094_v18  ;;  %v2429_v11 = vmul.f32 -1.442695, %v2114_v53  ;;  %v5835_v18 = vadd.f32 %v5700_v60, %v6599_v38  ;;  %v2210_v38 = vld [vmem:[%s5950_s5 + $0x20] sm:$0xff] }
 0x5d0   :  { %2591 = vpow2.f32 %v2428_v6 }
 0x5d1   :  { %2593 = vpow2.f32 %v2429_v11  ;;  %v5840_v11 = vadd.f32 %v5243_v39, %v5023_v34 }
 0x5d6   :  { %v2592_v33 = vpop.eup %2591 }
 0x5d7   :  { %v2594_v9 = vpop.eup %2593  ;;  %v2098_v5 = vadd.f32 1.0, %v2592_v33 }
 0x5d8   :  { %v2118_v46 = vadd.f32 1.0, %v2594_v9 }
 0x5d9   :  { %2595 = vrcp.f32 %v2098_v5  ;;  %v2110_v35 = vand.u32 2147483648, %v2098_v5  ;;  %v2108_v29 = vand.u32 2147483647, %v2098_v5  ;;  %vm2104_vm1 = vweird.f32 %v2098_v5 }
 0x5da   :  { %2597 = vrcp.f32 %v2118_v46  ;;  %v2130_v28 = vand.u32 2147483648, %v2118_v46  ;;  %vm2124_vm5 = vweird.f32 %v2118_v46  ;;  %v2128_v15 = vand.u32 2147483647, %v2118_v46 }
 0x5db   :  { %v2111_v43 = vor.u32 1.1754944e-38, %v2110_v35  ;;  %vm2109_vm3 = vcmp.eq.f32.partialorder %v2108_v29, 8.507059e+37 }
 0x5dc   :  { %v2131_v62 = vor.u32 1.1754944e-38, %v2130_v28  ;;  %vm2129_vm7 = vcmp.eq.f32.partialorder %v2128_v15, 8.507059e+37 }
 0x5df   :  { %v2596_v54 = vpop.eup %2595 }
 0x5e0   :  { %v2598_v36 = vpop.eup %2597  ;;  %v2100_v14 = vmul.f32 %v2596_v54, %v2098_v5  ;;  %vm2105_vm0 = vweird.f32 %v2596_v54 }
 0x5e1   :  { %v2120_v8 = vmul.f32 %v2598_v36, %v2118_v46  ;;  %vm2106_vm2 = vmor %vm2104_vm1, %vm2105_vm0  ;;  %vm2125_vm4 = vweird.f32 %v2598_v36  ;;  %vm2255_vm0 = vcmask 523264  }
 0x5e2   :  { %v2101_v57 = vsub.f32 1.0, %v2100_v14  ;;  %vm2126_vm6 = vmor %vm2124_vm5, %vm2125_vm4 }
 0x5e3   :  { %v2121_v51 = vsub.f32 1.0, %v2120_v8 }
 0x5e4   :  { %v2102_v13 = vmul.f32 %v2596_v54, %v2101_v57 }
 0x5e5   :  { %v2122_v52 = vmul.f32 %v2598_v36, %v2121_v51 }
 0x5e6   :  { %v2103_v59 = vadd.f32 %v2596_v54, %v2102_v13  ;;  %v6601_v13 = vld [vmem:[#allocation21_spill] sm:$0xff] }
 0x5e7   :  { %v2123_v10 = vadd.f32 %v2598_v36, %v2122_v52  ;;  %v5851_v29 = vadd.f32 %v5763_v0, %v6601_v13 }
 0x5e8   :  { %v2107_v56 = vsel %vm2106_vm2, %v2596_v54, %v2103_v59  ;;  %v6602_v59 = vld [vmem:[#allocation60_spill] sm:$0xff] }
 0x5e9   :  { %v2112_v45 = vsel %vm2109_vm3, %v2111_v43, %v2107_v56  ;;  %v2127_v21 = vsel %vm2126_vm6, %v2598_v36, %v2123_v10  ;;  %v6600_v36 = vld [vmem:[#allocation56_spill] sm:$0xff]  ;;  %v6604_v10 = vld [vmem:[#allocation66_spill] sm:$0xff] }
 0x5ea   :  { %v2135_v16 = vmul.f32 %v2134_v12, %v2112_v45  ;;  %v2132_v27 = vsel %vm2129_vm7, %v2131_v62, %v2127_v21  ;;  %v5845_v14 = vadd.f32 %v5560_v3, %v6600_v36  ;;  %v6603_v3 = vld [vmem:[#allocation49_spill] sm:$0xff]  ;;  %v2203_v21 = vmul.f32 0.125, %v5835_v18  ;;  %v2212_v36 = vld [vmem:[%s5950_s5 + $0x30] sm:$0xff] }
 0x5eb   :  { %v5857_v51 = vadd.f32 %v5809_v48, %v6603_v3 }
 0x5ec   :  { %v2136_v63 = vadd.f32 %v2135_v16, %v6594_v19  ;;  %v2201_v15 = vmul.f32 0.125, %v5845_v14 }
 0x5ee   :  { %2599 = vtanh.f32 %v2136_v63 }
 0x5f0   :  { %v2051_v25 = vpop.f32.mrf.mxu1 }
 0x5f1   :  { %v2141_v31 = vadd.f32 %v2051_v25, %v6595_v49 }
 0x5f3   :  { %v2430_v22 = vmul.f32 -1.442695, %v2141_v31  ;;  %v2199_v31 = vmul.f32 0.125, %v5857_v51 }
 0x5f4   :  { %v2600_v4 = vpop.eup %2599 }
 0x5f5   :  { %2601 = vpow2.f32 %v2430_v22  ;;  %v2138_v2 = vsub.f32 %v5796_v37, %v2600_v4  ;;  %v2202_v22 = vmul.f32 0.125, %v5840_v11 }
 0x5f6   :  { %v2071_v44 = vpop.f32.mrf.mxu2 }
 0x5f7   :  { %v2161_v55 = vadd.f32 %v2071_v44, %v6596_v61  ;;  %v2139_v20 = vmul.f32 %v2138_v2, %v2132_v27  ;;  %v2091_v5 = vpop.f32.mrf.mxu3 }
 0x5f8   :  { %v2181_v34 = vadd.f32 %v5804_v17, %v2091_v5 }
 0x5f9   :  { %v2431_v47 = vmul.f32 -1.442695, %v2161_v55  ;;  %v2140_v26 = vadd.f32 %v2600_v4, %v2139_v20  ;;  %v2204_v4 = vmul.f32 0.125, %v5830_v58  ;;  %v2209_v55 = vld [vmem:[%s5950_s5 + $0x18] sm:$0xff] }
 0x5fb   :  { %v2602_v42 = vpop.eup %2601  ;;  %2603 = vpow2.f32 %v2431_v47  ;;  %v5822_v23 = vadd.f32 %v2140_v26, %v6597_v24  ;;  %2188 = vst [vmem:[%s5949_s8] sm:$0xff] %v2140_v26  ;;  %v2208_v26 = vld [vmem:[%s5950_s5 + $0x10] sm:$0xff] }
 0x5fc   :  { %v2145_v7 = vadd.f32 1.0, %v2602_v42 }
 0x5fd   :  { %2222 = vmatpush.xpose.msra.mxu0 %v5822_v23  ;;  %v2205_v62 = vmul.f32 0.125, %v5822_v23 }
 0x5fe   :  { %2605 = vrcp.f32 %v2145_v7  ;;  %v2157_v6 = vand.u32 2147483648, %v2145_v7  ;;  %v2155_v33 = vand.u32 2147483647, %v2145_v7  ;;  %vm2151_vm9 = vweird.f32 %v2145_v7 }
 0x600   :  { %v2158_v60 = vor.u32 1.1754944e-38, %v2157_v6  ;;  %vm2156_vm11 = vcmp.eq.f32.partialorder %v2155_v33, 8.507059e+37  ;;  %v2213_v33 = vld [vmem:[%s5950_s5 + $0x38] sm:$0xff] }
 0x601   :  { %v2604_v50 = vpop.eup %2603  ;;  %2223 = vmatpush.xpose.msra.mxu0 %v5830_v58 }
 0x602   :  { %v2165_v40 = vadd.f32 1.0, %v2604_v50 }
 0x604   :  { %v2606_v41 = vpop.eup %2605  ;;  %2607 = vrcp.f32 %v2165_v40  ;;  %v2177_v17 = vand.u32 2147483648, %v2165_v40  ;;  %vm2171_vm13 = vweird.f32 %v2165_v40  ;;  %v2175_v56 = vand.u32 2147483647, %v2165_v40 }
 0x605   :  { %v2147_v1 = vmul.f32 %v2606_v41, %v2145_v7  ;;  %2224 = vmatpush.xpose.msra.mxu0 %v5835_v18  ;;  %vm2152_vm8 = vweird.f32 %v2606_v41 }
 0x606   :  { %vm2153_vm10 = vmor %vm2151_vm9, %vm2152_vm8  ;;  %v2178_v16 = vor.u32 1.1754944e-38, %v2177_v17  ;;  %vm2176_vm15 = vcmp.eq.f32.partialorder %v2175_v56, 8.507059e+37 }
 0x607   :  { %v2148_v53 = vsub.f32 1.0, %v2147_v1 }
 0x609   :  { %v2149_v37 = vmul.f32 %v2606_v41, %v2148_v53  ;;  %2225 = vmatpush.xpose.msra.mxu0 %v5840_v11 }
 0x60a   :  { %v2608_v9 = vpop.eup %2607 }
 0x60b   :  { %v2167_v46 = vmul.f32 %v2608_v9, %v2165_v40  ;;  %v2150_v54 = vadd.f32 %v2606_v41, %v2149_v37  ;;  %vm2172_vm12 = vweird.f32 %v2608_v9  ;;  %v2206_v37 = vld [vmem:[%s5950_s5] sm:$0xff] }
 0x60c   :  { %vm2173_vm14 = vmor %vm2171_vm13, %vm2172_vm12 }
 0x60d   :  { %v2168_v57 = vsub.f32 1.0, %v2167_v46  ;;  %v2154_v35 = vsel %vm2153_vm10, %v2606_v41, %v2150_v54  ;;  %2226 = vmatpush.xpose.msra.mxu0 %v5845_v14 }
 0x60e   :  { %v2159_v39 = vsel %vm2156_vm11, %v2158_v60, %v2154_v35 }
 0x60f   :  { %v2182_v8 = vmul.f32 %v2181_v34, %v2159_v39  ;;  %v2169_v32 = vmul.f32 %v2608_v9, %v2168_v57  ;;  %v2207_v34 = vld [vmem:[%s5950_s5 + $0x8] sm:$0xff] }
 0x611   :  { %v2183_v43 = vadd.f32 %v2182_v8, %v6602_v59  ;;  %2227 = vmatpush.xpose.msra.mxu0 %v5851_v29  ;;  %v2170_v12 = vadd.f32 %v2608_v9, %v2169_v32 }
 0x613   :  { %2609 = vtanh.f32 %v2183_v43  ;;  %v2174_v0 = vsel %vm2173_vm14, %v2608_v9, %v2170_v12 }
 0x614   :  { %v2179_v19 = vsel %vm2176_vm15, %v2178_v16, %v2174_v0 }
 0x615   :  { %2228 = vmatpush.xpose.msra.mxu0 %v5857_v51 }
 0x619   :  { %v2610_v45 = vpop.eup %2609 }
 0x61a   :  { %v2185_v52 = vsub.f32 %v5809_v48, %v2610_v45  ;;  %v2200_v48 = vmul.f32 0.125, %v5851_v29 }
 0x61c   :  { %v2186_v63 = vmul.f32 %v2185_v52, %v2179_v19 }
 0x61e   :  { %v2187_v25 = vadd.f32 %v2610_v45, %v2186_v63 }
 0x620   :  { %2189 = vst [vmem:[%s5949_s8 + $0x8] sm:$0xff] %v2187_v25  ;;  %v5865_v28 = vadd.f32 %v2187_v25, %v6604_v10 }
 0x622   :  { %2229 = vmatpush.xpose.msra.mxu0 %v5865_v28  ;;  %v2198_v49 = vmul.f32 0.125, %v5865_v28 }
 0x625   :  { %2230 = vmatmul.f32.vlgmr.msra.gmra.mxu0 %v2198_v49 }
 0x62d   :  { %2233 = vmatmul.f32.gmra.mxu0 %v2199_v31 }
 0x635   :  { %2236 = vmatmul.f32.gmra.mxu0 %v2200_v48 }
 0x63d   :  { %2239 = vmatmul.f32.gmra.mxu0 %v2201_v15 }
 0x645   :  { %2242 = vmatmul.f32.gmra.mxu0 %v2202_v22 }
 0x64d   :  { %2245 = vmatmul.f32.gmra.mxu0 %v2203_v21 }
 0x655   :  { %2248 = vmatmul.f32.gmra.mxu0 %v2204_v4 }
 0x65d   :  { %2251 = vmatmul.f32.gmra.mxu0 %v2205_v62 }
 0x6a2   :  { %v2231_v44 = vpop.f32.mrf.mxu0 }
 0x6a3   :  { %v2232_v9 = vadd.f32 %v2231_v44, %v2206_v37 }
 0x6a5   :  { %v2256_v60 = vsel %vm2255_vm0, %v2232_v9, -inf }
 0x6aa   :  { %v2234_v2 = vpop.f32.mrf.mxu0 }
 0x6ab   :  { %v2235_v39 = vadd.f32 %v2234_v2, %v2207_v34 }
 0x6ad   :  { %v2259_v8 = vsel %vm2255_vm0, %v2235_v39, -inf }
 0x6b2   :  { %v2237_v61 = vpop.f32.mrf.mxu0 }
 0x6b3   :  { %v2238_v42 = vadd.f32 %v2237_v61, %v2208_v26 }
 0x6b5   :  { %v2262_v24 = vsel %vm2255_vm0, %v2238_v42, -inf }
 0x6ba   :  { %v2240_v27 = vpop.f32.mrf.mxu0 }
 0x6bb   :  { %v5879_v20 = vadd.f32 %v2240_v27, %v2209_v55 }
 0x6bd   :  { %v2265_v47 = vsel %vm2255_vm0, %v5879_v20, -inf }
 0x6be   :  { %2266 = vmax.xlane.f32.xlu2 %v2265_v47 }
 0x6c2   :  { %v2243_v7 = vpop.f32.mrf.mxu0 }
 0x6c3   :  { %v2244_v1 = vadd.f32 %v2243_v7, %v2210_v38 }
 0x6c5   :  { %v2268_v6 = vsel %vm2255_vm0, %v2244_v1, -inf }
 0x6c6   :  { %2263 = vmax.xlane.f32.xlu2 %v2262_v24 }
 0x6ca   :  { %v2246_v50 = vpop.f32.mrf.mxu0 }
 0x6cb   :  { %v2247_v40 = vadd.f32 %v2246_v50, %v2211_v30 }
 0x6cd   :  { %v2271_v41 = vsel %vm2255_vm0, %v2247_v40, -inf }
 0x6ce   :  { %2272 = vmax.xlane.f32.xlu1 %v2271_v41 }
 0x6d2   :  { %v2249_v53 = vpop.f32.mrf.mxu0 }
 0x6d3   :  { %v2250_v57 = vadd.f32 %v2249_v53, %v2212_v36 }
 0x6d5   :  { %v2274_v35 = vsel %vm2255_vm0, %v2250_v57, -inf }
 0x6d6   :  { %2269 = vmax.xlane.f32.xlu1 %v2268_v6 }
 0x6da   :  { %v2252_v5 = vpop.f32.mrf.mxu0 }
 0x6db   :  { %v2253_v46 = vadd.f32 %v2252_v5, %v2213_v33 }
 0x6dd   :  { %v2277_v54 = vsel %vm2255_vm0, %v2253_v46, -inf }
 0x6de   :  { %2278 = vmax.xlane.f32.xlu0 %v2277_v54  ;;  %2257 = vmax.xlane.f32.xlu1 %v2256_v60 }
 0x6e6   :  { %2275 = vmax.xlane.f32.xlu0 %v2274_v35 }
 0x6ee   :  { %2260 = vmax.xlane.f32.xlu0 %v2259_v8 }
 0x731   :  { %v2267_v13 = vpop.xlane.xlu2 %2266 }
 0x732   :  { %v2283_v22 = vsub.f32 %v5879_v20, %v2267_v13 }
 0x734   :  { %v2294_v62 = vmul.f32 1.442695, %v2283_v22 }
 0x739   :  { %v2264_v32 = vpop.xlane.xlu2 %2263 }
 0x73a   :  { %v2282_v3 = vsub.f32 %v2238_v42, %v2264_v32 }
 0x73c   :  { %v2292_v17 = vmul.f32 1.442695, %v2282_v3 }
 0x741   :  { %v2273_v59 = vpop.xlane.xlu1 %2272 }
 0x742   :  { %v2285_v43 = vsub.f32 %v2247_v40, %v2273_v59 }
 0x744   :  { %v2298_v12 = vmul.f32 1.442695, %v2285_v43 }
 0x746   :  { %2611 = vpow2.f32 %v2298_v12 }
 0x747   :  { %2613 = vpow2.f32 %v2292_v17 }
 0x749   :  { %v2270_v45 = vpop.xlane.xlu1 %2269 }
 0x74a   :  { %v2284_v63 = vsub.f32 %v2244_v1, %v2270_v45 }
 0x74c   :  { %v5911_v56 = vpop.eup %2611  ;;  %v2296_v49 = vmul.f32 1.442695, %v2284_v63 }
 0x74d   :  { %v2319_v0 = vsel %vm2255_vm0, %v5911_v56, 0.0  ;;  %v5915_v52 = vpop.eup %2613 }
 0x74e   :  { %2320 = vadd.xlane.f32.xlu1 %v2319_v0  ;;  %v2310_v10 = vsel %vm2255_vm0, %v5915_v52, 0.0 }
 0x751   :  { %v2279_v16 = vpop.xlane.xlu0 %2278  ;;  %v2258_v44 = vpop.xlane.xlu1 %2257 }
 0x752   :  { %v2287_v19 = vsub.f32 %v2253_v46, %v2279_v16  ;;  %v2280_v47 = vsub.f32 %v2232_v9, %v2258_v44 }
 0x754   :  { %v2302_v25 = vmul.f32 1.442695, %v2287_v19  ;;  %v2288_v20 = vmul.f32 1.442695, %v2280_v47 }
 0x756   :  { %2615 = vpow2.f32 %v2302_v25  ;;  %2311 = vadd.xlane.f32.xlu1 %v2310_v10 }
 0x757   :  { %2617 = vpow2.f32 %v2296_v49 }
 0x759   :  { %v2276_v31 = vpop.xlane.xlu0 %2275 }
 0x75a   :  { %v2286_v48 = vsub.f32 %v2250_v57, %v2276_v31 }
 0x75c   :  { %v2616_v15 = vpop.eup %2615  ;;  %v2300_v21 = vmul.f32 1.442695, %v2286_v48 }
 0x75d   :  { %v2325_v4 = vsel %vm2255_vm0, %v2616_v15, 0.0  ;;  %v2618_v61 = vpop.eup %2617 }
 0x75e   :  { %2619 = vpow2.f32 %v2300_v21  ;;  %2326 = vadd.xlane.f32.xlu2 %v2325_v4  ;;  %v2316_v42 = vsel %vm2255_vm0, %v2618_v61, 0.0 }
 0x75f   :  { %2621 = vpow2.f32 %v2294_v62 }
 0x761   :  { %v2261_v2 = vpop.xlane.xlu0 %2260 }
 0x762   :  { %v2281_v55 = vsub.f32 %v2235_v39, %v2261_v2 }
 0x764   :  { %v2620_v27 = vpop.eup %2619  ;;  %v2290_v26 = vmul.f32 1.442695, %v2281_v55 }
 0x765   :  { %v2322_v7 = vsel %vm2255_vm0, %v2620_v27, 0.0  ;;  %v2622_v24 = vpop.eup %2621 }
 0x766   :  { %2623 = vpow2.f32 %v2290_v26  ;;  %2317 = vadd.xlane.f32.xlu2 %v2316_v42  ;;  %2323 = vadd.xlane.f32.xlu0 %v2322_v7  ;;  %v2313_v50 = vsel %vm2255_vm0, %v2622_v24, 0.0 }
 0x767   :  { %2625 = vpow2.f32 %v2288_v20 }
 0x76c   :  { %v2624_v30 = vpop.eup %2623 }
 0x76d   :  { %v2307_v40 = vsel %vm2255_vm0, %v2624_v30, 0.0  ;;  %v2626_v41 = vpop.eup %2625 }
 0x76e   :  { %2314 = vadd.xlane.f32.xlu0 %v2313_v50  ;;  %2308 = vadd.xlane.f32.xlu2 %v2307_v40  ;;  %v2304_v38 = vsel %vm2255_vm0, %v2626_v41, 0.0 }
 0x776   :  { %2305 = vadd.xlane.f32.xlu0 %v2304_v38 }
 0x7c1   :  { %v2321_v53 = vpop.xlane.xlu1 %2320 }
 0x7c9   :  { %v2312_v5 = vpop.xlane.xlu1 %2311 }
 0x7d1   :  { %v2327_v1 = vpop.xlane.xlu2 %2326 }
 0x7d2   :  { %2627 = vrcp.f32 %v2327_v1 }
 0x7d3   :  { %2629 = vrcp.f32 %v2321_v53 }
 0x7d8   :  { %v2628_v6 = vpop.eup %2627 }
 0x7d9   :  { %v2318_v37 = vpop.xlane.xlu2 %2317  ;;  %v2324_v33 = vpop.xlane.xlu0 %2323  ;;  %v2343_v9 = vmul.f32 %v2628_v6, %v2616_v15 }
 0x7da   :  { %2631 = vrcp.f32 %v2324_v33  ;;  %v2630_v46 = vpop.eup %2629 }
 0x7db   :  { %2356 = vmatpush.msra.mxu2 %v2343_v9  ;;  %2633 = vrcp.f32 %v2318_v37  ;;  %v2341_v34 = vmul.f32 %v2630_v46, %v5911_v56  ;;  %v2344_v56 = vld [vmem:[%s5951_s6] sm:$0xff] }
 0x7dc   :  { %2635 = vrcp.f32 %v2312_v5 }
 0x7e0   :  { %v2632_v54 = vpop.eup %2631 }
 0x7e1   :  { %v2315_v60 = vpop.xlane.xlu0 %2314  ;;  %v2309_v36 = vpop.xlane.xlu2 %2308  ;;  %v2342_v57 = vmul.f32 %v2632_v54, %v2620_v27 }
 0x7e2   :  { %v2634_v35 = vpop.eup %2633  ;;  %2637 = vrcp.f32 %v2315_v60 }
 0x7e3   :  { %2357 = vmatpush.msra.mxu2 %v2342_v57  ;;  %2639 = vrcp.f32 %v2309_v36  ;;  %v2340_v39 = vmul.f32 %v2634_v35, %v2618_v61  ;;  %v2636_v8 = vpop.eup %2635 }
 0x7e4   :  { %v2338_v3 = vmul.f32 %v2636_v8, %v5915_v52 }
 0x7e5   :  { %2358 = vmatpush.msra.mxu2 %v2341_v34 }
 0x7e7   :  { %2359 = vmatpush.msra.mxu2 %v2340_v39 }
 0x7e8   :  { %v2638_v13 = vpop.eup %2637 }
 0x7e9   :  { %v2306_v32 = vpop.xlane.xlu0 %2305  ;;  %v2339_v59 = vmul.f32 %v2638_v13, %v2622_v24  ;;  %v2640_v43 = vpop.eup %2639 }
 0x7ea   :  { %2641 = vrcp.f32 %v2306_v32  ;;  %v2337_v12 = vmul.f32 %v2640_v43, %v2624_v30 }
 0x7eb   :  { %2360 = vmatpush.msra.mxu2 %v2339_v59 }
 0x7ed   :  { %2361 = vmatpush.msra.mxu2 %v2338_v3 }
 0x7ef   :  { %2362 = vmatpush.msra.mxu2 %v2337_v12 }
 0x7f0   :  { %v2642_v17 = vpop.eup %2641 }
 0x7f1   :  { %v2336_v0 = vmul.f32 %v2642_v17, %v2626_v41 }
 0x7f3   :  { %2363 = vmatpush.msra.mxu2 %v2336_v0 }
 0x7f4   :  { %2432 = vmatmul.msk.f32.vlgmr.msra.gmra.mxu2 %vm2255_vm0, %v2344_v56 }
 0x7f5   :  { %2379 = vmatpush.msrb.mxu2 %v5822_v23 }
 0x7f7   :  { %2380 = vmatpush.msrb.mxu2 %v5830_v58 }
 0x7f9   :  { %2381 = vmatpush.msrb.mxu2 %v5835_v18 }
 0x7fb   :  { %2382 = vmatpush.msrb.mxu2 %v5840_v11 }
 0x7fd   :  { %2383 = vmatpush.msrb.mxu2 %v5845_v14 }
 0x7ff   :  { %2384 = vmatpush.msrb.mxu2 %v5851_v29 }
 0x801   :  { %2385 = vmatpush.msrb.mxu2 %v5857_v51 }
 0x803   :  { %2386 = vmatpush.msrb.mxu2 %v5865_v28 }
 0x877   :  { %v2365_v45 = vpop.f32.mrf.mxu2 }
 0x878   :  { %2433 = vmatmul.msk.f32.vlgmr.msrb.gmra.mxu2 %vm2255_vm0, %v2365_v45 }
 0x8fb   :  { %v2388_v16 = vpop.f32.mrf.mxu2 }
 0x8fc   :  { %2391 = vst [vmem:[%s5952_s7] sm:$0xff] %v2388_v16 }

</bundles_post_ra>
